<compile_context>
chip_gen: v7x
topology: tpu7x:2x2x1
jax: 0.10.0
libtpu: 0.0.40
codegen_flags: <defaults>
</compile_context>

<pallas_src>
import numpy as np
import jax
import jax.numpy as jnp
from jax.experimental import pallas as pl
from jax.experimental.pallas import tpu as pltpu

GN_EPS = 1e-5  # PyTorch GroupNorm default eps


# ----------------------------- static helpers (host / trace time) ------------

def _upsample_matrix_1d(n_in, n_out):
    """(n_out, n_in) bilinear interpolation matrix, align_corners=True."""
    u = np.zeros((n_out, n_in), np.float32)
    if n_in == 1 or n_out == 1:
        u[:, 0] = 1.0
        return u
    scale = (n_in - 1) / (n_out - 1)
    for o in range(n_out):
        src = o * scale
        lo = min(int(np.floor(src)), n_in - 2)
        f = src - lo
        u[o, lo] += 1.0 - f
        u[o, lo + 1] += f
    return u


def _group_average_matrix(C, G, count):
    """(C, C) matrix A = M M^T / count: A @ per-channel-sums = per-channel group mean."""
    gidx = np.arange(C) // (C // G)
    a = (gidx[:, None] == gidx[None, :]).astype(np.float32) / float(count)
    return jnp.asarray(a)


def _pad_scatter_matrix(H2, W2, Wp, guard, Rtot):
    """(S2, Rtot) operator: interior -> padded+guarded flattened layout, zeros elsewhere."""
    p = np.zeros((H2 * W2, Rtot), np.float32)
    for h in range(H2):
        for w in range(W2):
            p[h * W2 + w, guard + (h + 1) * Wp + (w + 1)] = 1.0
    return jnp.asarray(p)


def _interior_mask(H2, W2, Wp, R):
    hp = np.arange(R) // Wp
    wp = np.arange(R) % Wp
    m = ((hp >= 1) & (hp <= H2) & (wp >= 1) & (wp <= W2)).astype(np.float32)
    return jnp.asarray(m[None, :])  # (1, R)


# ------------------------------ parameters ------------------------------------

def init_up_params(key, in_channels, out_channels, factor=2):
    """Deterministic synthetic parameters matching the module's shapes (channel-major)."""
    cm = in_channels // factor
    mid = out_channels  # DoubleConv mid_channels defaults to out_channels
    ks = jax.random.split(key, 4)

    def conv_w(k, fan_in, shape):
        return jax.random.normal(k, shape, jnp.float32) / jnp.sqrt(jnp.float32(fan_in))

    return {
        # 1x1 convs stored channel-major: (Cout, Cin)   [= PyTorch weight[:, :, 0, 0]]
        "w_conv1": conv_w(ks[0], in_channels, (cm, in_channels)),
        "w_conv2": conv_w(ks[1], cm, (out_channels, cm)),
        "g_norm1": jnp.ones((cm, 1), jnp.float32), "b_norm1": jnp.zeros((cm, 1), jnp.float32),
        "g_norm2": jnp.ones((cm, 1), jnp.float32), "b_norm2": jnp.zeros((cm, 1), jnp.float32),
        # 3x3 convs stored as (Cout, 9*Cin), tap-major / channel-minor columns:
        # from PyTorch (Co,Ci,3,3): w.reshape(Co,Ci,9).transpose(0,2,1).reshape(Co,9*Ci)
        "w_dc1": conv_w(ks[2], 9 * cm, (mid, 9 * cm)),
        "g_dc1": jnp.ones((mid, 1), jnp.float32), "b_dc1": jnp.zeros((mid, 1), jnp.float32),
        "w_dc2": conv_w(ks[3], 9 * mid, (out_channels, 9 * mid)),
        "g_dc2": jnp.ones((out_channels, 1), jnp.float32),
        "b_dc2": jnp.zeros((out_channels, 1), jnp.float32),
    }


# ------------------------------- forward --------------------------------------

def up_forward(params, x1_nchw, x2_nchw, *, group_channel=32, group_num=16,
               mxu_dtype=jnp.float32):
    """Up.forward(x1, x2) with the default config; NCHW in, NCHW out.

    mxu_dtype=jnp.bfloat16 enables the v6e/v7x MXU fast path (f32 accumulation,
    GroupNorm statistics stay f32); default f32 matches PyTorch numerics.
    """
    N, Cin, H1, W1 = x1_nchw.shape
    _, C2, H2, W2 = x2_nchw.shape
    cm = params["w_conv1"].shape[0]
    out_ch = params["w_conv2"].shape[0]
    mid = params["w_dc1"].shape[0]
    assert C2 == cm and H2 == 2 * H1 and W2 == 2 * W1
    # required by norm1(x2) + norm2(x1) in the PyTorch module (and shared buffers here)
    assert out_ch == cm and mid == cm

    S1, S2 = H1 * W1, H2 * W2
    Hp, Wp = H2 + 2, W2 + 2            # zero-padded spatial extent for the 3x3 convs
    R = Hp * Wp                        # padded-flattened spatial length (lane dim)
    guard = Wp + 1                     # extra zero lanes so every conv tap is a lane shift
    Rtot = R + 2 * guard
    G1 = cm // group_channel
    Gdc = group_num

    f32 = jnp.float32
    cd = mxu_dtype                     # MXU operand dtype; accumulation is always f32

    # channel-major, spatially flattened inputs -- this IS the NCHW memory order
    x1f = x1_nchw.reshape(N, Cin, S1).astype(cd)
    x2f = x2_nchw.reshape(N, cm, S2).astype(cd)

    # dense x2 bilinear upsample operator (align_corners=True): kron of the 1-D operators
    ut = jnp.asarray(np.kron(_upsample_matrix_1d(H1, H2),
                             _upsample_matrix_1d(W1, W2)).T).astype(cd)      # (S1, S2)
    ptot = _pad_scatter_matrix(H2, W2, Wp, guard, Rtot).astype(cd)           # (S2, Rtot)
    msk = _interior_mask(H2, W2, Wp, R)                                      # (1, R) f32

    cnt_br = S2 * (cm // G1)
    inv_cnt_br = 1.0 / float(cnt_br)
    a_br = _group_average_matrix(cm, G1, cnt_br)                # only read when G1 > 1
    a_dc = _group_average_matrix(mid, Gdc, S2 * (mid // Gdc))   # DoubleConv GN averaging

    def kernel(x1_ref, x2_ref, ut_ref, ptot_ref, msk_ref,
               w1_ref, w2_ref, g1_ref, b1_ref, g2_ref, b2_ref, a_br_ref,
               wd1_ref, gd1_ref, bd1_ref, wd2_ref, gd2_ref, bd2_ref, a_dc_ref,
               out_ref,
               xbuf, hbuf, icol):
        mask = msk_ref[...]                                   # (1, R)
        a_dc_m = a_dc_ref[...]                                # (C, C) group-averaging

        def group_norm(x, gamma, beta, a_avg=None, inv_count=None, m=None):
            """One-pass GroupNorm on (C, S); stats restricted to `m` lanes if given."""
            xm = x if m is None else x * m
            s = jnp.sum(xm, axis=1, keepdims=True)            # (C, 1)
            ss = jnp.sum(xm * xm, axis=1, keepdims=True)      # (C, 1)
            if a_avg is None:     # single group: pure VPU/XLU reductions, no MXU pushes
                mu = jnp.sum(s, axis=0, keepdims=True) * inv_count
                ex2 = jnp.sum(ss, axis=0, keepdims=True) * inv_count
            else:                 # one fused (M M^T / count) matmul on stacked [s, ss]
                col = jax.lax.broadcasted_iota(jnp.int32, (x.shape[0], 2), 1)
                st = jnp.dot(a_avg, jnp.where(col == 0, s, ss),
                             preferred_element_type=f32)      # (C, 2)
                mu, ex2 = st[:, 0:1], st[:, 1:2]
            var = jnp.maximum(ex2 - mu * mu, 0.0)             # guard one-pass cancellation
            return (x - mu) * jax.lax.rsqrt(var + GN_EPS) * gamma + beta

        # ---- branch A: 1x1 conv, then dense bilinear x2 upsample (ONE matmul)
        c1 = jnp.dot(w1_ref[...], x1_ref[...], preferred_element_type=f32)   # (Cm, S1)
        xa = jnp.dot(c1.astype(cd), ut_ref[...], preferred_element_type=f32)  # (Cm, S2)

        # ---- branch B: 1x1 conv
        xb = jnp.dot(w2_ref[...], x2_ref[...], preferred_element_type=f32)   # (Co, S2)

        # ---- x = norm1(branch B) + norm2(branch A)
        abr = a_br_ref[...] if G1 > 1 else None
        xs = (group_norm(xb, g1_ref[...], b1_ref[...], a_avg=abr, inv_count=inv_cnt_br)
              + group_norm(xa, g2_ref[...], b2_ref[...], a_avg=abr, inv_count=inv_cnt_br))

        # ---- zero-pad + guard scatter fused into one matmul: rewrites the WHOLE padded
        #      buffer (zeros at pad/guard), so no separate zero fill of xbuf is needed.
        xbuf[...] = jnp.dot(xs.astype(cd), ptot_ref[...],
                            preferred_element_type=f32).astype(cd)           # (Cm, Rtot)

        # hbuf guard strips must be zero; its interior is fully rewritten below.
        # (kept per-step -- tiny 19-lane strips -- so it stays correct under megacore
        #  sharding of the batch grid axis, unlike a pl.when(program_id==0) init)
        hbuf[:, 0:guard] = jnp.zeros((mid, guard), cd)
        hbuf[:, guard + R:Rtot] = jnp.zeros((mid, guard), cd)

        # ---- DoubleConv stage: 3x3 conv (taps folded into K=9*C via im2col) + GN + ReLU,
        #      written straight through the destination ref (lane-dense R columns).
        def conv3x3_gn_relu(src, w9, gamma, beta, dst, dst_off, out_dtype):
            ci = src.shape[0]
            for k in range(9):
                dh, dw = divmod(k, 3)
                off = guard + (dh - 1) * Wp + (dw - 1)
                icol[k * ci:(k + 1) * ci, :] = src[:, off:off + R]
            y = jnp.dot(w9, icol[...], preferred_element_type=f32)           # (Co, R)
            y = group_norm(y, gamma, beta, a_avg=a_dc_m, m=mask)
            # zeros at pad/garbage lanes act as the next conv's zero padding
            dst[:, dst_off:dst_off + R] = (jnp.maximum(y, 0.0) * mask).astype(out_dtype)

        conv3x3_gn_relu(xbuf, wd1_ref[...], gd1_ref[...], bd1_ref[...], hbuf, guard, cd)
        conv3x3_gn_relu(hbuf, wd2_ref[...], gd2_ref[...], bd2_ref[...], out_ref, 0, f32)

    operands = (x1f, x2f, ut, ptot, msk,
                params["w_conv1"].astype(cd), params["w_conv2"].astype(cd),
                params["g_norm1"], params["b_norm1"],
                params["g_norm2"], params["b_norm2"],
                a_br,
                params["w_dc1"].astype(cd), params["g_dc1"], params["b_dc1"],
                params["w_dc2"].astype(cd), params["g_dc2"], params["b_dc2"],
                a_dc)

    in_specs = [pl.BlockSpec((None, Cin, S1), lambda i: (i, 0, 0)),
                pl.BlockSpec((None, cm, S2), lambda i: (i, 0, 0))]
    # grid-invariant operands: full-array blocks, constant index map
    in_specs += [pl.BlockSpec(a.shape, lambda i: (0, 0)) for a in operands[2:]]

    out = pl.pallas_call(
        kernel,
        out_shape=jax.ShapeDtypeStruct((N, out_ch, R), jnp.float32),
        grid=(N,),   # batch axis; keep N even on v7x so both TensorCores are fed
        in_specs=in_specs,
        out_specs=pl.BlockSpec((None, out_ch, R), lambda i: (i, 0, 0)),
        scratch_shapes=[
            pltpu.VMEM((cm, Rtot), cd),        # xbuf : padded+guarded DC1 input
            pltpu.VMEM((mid, Rtot), cd),       # hbuf : padded+guarded DC2 input
            pltpu.VMEM((9 * cm, R), cd),       # icol : im2col (K = 9*C, lane-dense R)
        ],
        compiler_params=pltpu.CompilerParams(dimension_semantics=("parallel",)),
    )(*operands)

    # (N, Co, R) is already NCHW-ordered over the padded grid; crop the interior.
    return out.reshape(N, out_ch, Hp, Wp)[:, :, 1:1 + H2, 1:1 + W2]


# ----------------------------------- main --------------------------------------

if __name__ == "__main__":
    # Smallest shapes compatible with the module's constraints:
    #   group_channel=32 -> in_channels//2 must be a positive multiple of 32
    #   DoubleConv group_num=16 -> out_channels a multiple of 16
    in_channels, out_channels = 64, 32
    N, H1, W1 = 2, 8, 8   # N even -> both v7x TensorCores get work

    key = jax.random.PRNGKey(0)
    kp, k1, k2 = jax.random.split(key, 3)
    params = init_up_params(kp, in_channels, out_channels)

    x1 = jax.random.normal(k1, (N, in_channels, H1, W1), jnp.float32)                 # NCHW
    x2 = jax.random.normal(k2, (N, in_channels // 2, 2 * H1, 2 * W1), jnp.float32)    # NCHW

    y = up_forward(params, x1, x2)
    y = jax.block_until_ready(y)

    assert y.shape == (N, out_channels, 2 * H1, 2 * W1), y.shape
    assert bool(jnp.all(jnp.isfinite(y)))
    print("KERNEL_OK")
</pallas_src>

<mosaic_0001>
module attributes {stable_mosaic.version = 11 : i64} {
  func.func @kernel(%arg0: i32, %arg1: memref<1x64x64xf32, #tpu.memory_space<vmem>>, %arg2: memref<1x32x256xf32, #tpu.memory_space<vmem>>, %arg3: memref<64x256xf32, #tpu.memory_space<vmem>>, %arg4: memref<256x362xf32, #tpu.memory_space<vmem>>, %arg5: memref<1x324xf32, #tpu.memory_space<vmem>>, %arg6: memref<32x64xf32, #tpu.memory_space<vmem>>, %arg7: memref<32x32xf32, #tpu.memory_space<vmem>>, %arg8: memref<32x1xf32, #tpu.memory_space<vmem>>, %arg9: memref<32x1xf32, #tpu.memory_space<vmem>>, %arg10: memref<32x1xf32, #tpu.memory_space<vmem>>, %arg11: memref<32x1xf32, #tpu.memory_space<vmem>>, %arg12: memref<32x32xf32, #tpu.memory_space<vmem>>, %arg13: memref<32x288xf32, #tpu.memory_space<vmem>>, %arg14: memref<32x1xf32, #tpu.memory_space<vmem>>, %arg15: memref<32x1xf32, #tpu.memory_space<vmem>>, %arg16: memref<32x288xf32, #tpu.memory_space<vmem>>, %arg17: memref<32x1xf32, #tpu.memory_space<vmem>>, %arg18: memref<32x1xf32, #tpu.memory_space<vmem>>, %arg19: memref<32x32xf32, #tpu.memory_space<vmem>>, %arg20: memref<1x32x324xf32, #tpu.memory_space<vmem>>, %arg21: memref<32x362xf32, #tpu.memory_space<vmem>>, %arg22: memref<32x362xf32, #tpu.memory_space<vmem>>, %arg23: memref<288x324xf32, #tpu.memory_space<vmem>>) attributes {dimension_semantics = [#tpu.dimension_semantics<parallel>], iteration_bounds = array<i64: 2>, scalar_prefetch = 0 : i64, scratch_operands = 3 : i64, tpu.core_type = #tpu.core_type<tc>, window_params = [{transform_indices = @transform_0, window_bounds = array<i64: 1, 64, 64>}, {transform_indices = @transform_1, window_bounds = array<i64: 1, 32, 256>}, {pipeline_mode = #tpu.pipeline_mode<synchronous>, transform_indices = @transform_2, window_bounds = array<i64: 64, 256>}, {pipeline_mode = #tpu.pipeline_mode<synchronous>, transform_indices = @transform_3, window_bounds = array<i64: 256, 362>}, {pipeline_mode = #tpu.pipeline_mode<synchronous>, transform_indices = @transform_4, window_bounds = array<i64: 1, 324>}, {pipeline_mode = #tpu.pipeline_mode<synchronous>, transform_indices = @transform_5, window_bounds = array<i64: 32, 64>}, {pipeline_mode = #tpu.pipeline_mode<synchronous>, transform_indices = @transform_6, window_bounds = array<i64: 32, 32>}, {pipeline_mode = #tpu.pipeline_mode<synchronous>, transform_indices = @transform_7, window_bounds = array<i64: 32, 1>}, {pipeline_mode = #tpu.pipeline_mode<synchronous>, transform_indices = @transform_8, window_bounds = array<i64: 32, 1>}, {pipeline_mode = #tpu.pipeline_mode<synchronous>, transform_indices = @transform_9, window_bounds = array<i64: 32, 1>}, {pipeline_mode = #tpu.pipeline_mode<synchronous>, transform_indices = @transform_10, window_bounds = array<i64: 32, 1>}, {pipeline_mode = #tpu.pipeline_mode<synchronous>, transform_indices = @transform_11, window_bounds = array<i64: 32, 32>}, {pipeline_mode = #tpu.pipeline_mode<synchronous>, transform_indices = @transform_12, window_bounds = array<i64: 32, 288>}, {pipeline_mode = #tpu.pipeline_mode<synchronous>, transform_indices = @transform_13, window_bounds = array<i64: 32, 1>}, {pipeline_mode = #tpu.pipeline_mode<synchronous>, transform_indices = @transform_14, window_bounds = array<i64: 32, 1>}, {pipeline_mode = #tpu.pipeline_mode<synchronous>, transform_indices = @transform_15, window_bounds = array<i64: 32, 288>}, {pipeline_mode = #tpu.pipeline_mode<synchronous>, transform_indices = @transform_16, window_bounds = array<i64: 32, 1>}, {pipeline_mode = #tpu.pipeline_mode<synchronous>, transform_indices = @transform_17, window_bounds = array<i64: 32, 1>}, {pipeline_mode = #tpu.pipeline_mode<synchronous>, transform_indices = @transform_18, window_bounds = array<i64: 32, 32>}, {transform_indices = @transform_19, window_bounds = array<i64: 1, 32, 324>}]} {
    %c0 = arith.constant 0 : index
    %c0_0 = arith.constant 0 : index
    %0 = vector.load %arg5[%c0, %c0_0] : memref<1x324xf32, #tpu.memory_space<vmem>>, vector<1x324xf32>
    %c0_1 = arith.constant 0 : index
    %c0_2 = arith.constant 0 : index
    %1 = vector.load %arg19[%c0_1, %c0_2] : memref<32x32xf32, #tpu.memory_space<vmem>>, vector<32x32xf32>
    %c0_3 = arith.constant 0 : index
    %c0_4 = arith.constant 0 : index
    %2 = vector.load %arg6[%c0_3, %c0_4] : memref<32x64xf32, #tpu.memory_space<vmem>>, vector<32x64xf32>
    %c0_5 = arith.constant 0 : index
    %c0_6 = arith.constant 0 : index
    %c0_7 = arith.constant 0 : index
    %3 = vector.load %arg1[%c0_5, %c0_6, %c0_7] : memref<1x64x64xf32, #tpu.memory_space<vmem>>, vector<1x64x64xf32>
    %4 = vector.shape_cast %3 : vector<1x64x64xf32> to vector<64x64xf32>
    %cst = arith.constant dense<0.000000e+00> : vector<32x64xf32>
    %5 = tpu.matmul %2, %4, %cst {dimension_numbers = #tpu.dot_dimension_numbers<[1], [0], [0], [1], [0, 0, 1, 1], [], []>} : vector<32x64xf32>, vector<64x64xf32>, vector<32x64xf32> -> vector<32x64xf32>
    %c0_8 = arith.constant 0 : index
    %c0_9 = arith.constant 0 : index
    %6 = vector.load %arg3[%c0_8, %c0_9] : memref<64x256xf32, #tpu.memory_space<vmem>>, vector<64x256xf32>
    %cst_10 = arith.constant dense<0.000000e+00> : vector<32x256xf32>
    %7 = tpu.matmul %5, %6, %cst_10 {dimension_numbers = #tpu.dot_dimension_numbers<[1], [0], [0], [1], [0, 0, 1, 1], [], []>} : vector<32x64xf32>, vector<64x256xf32>, vector<32x256xf32> -> vector<32x256xf32>
    %c0_11 = arith.constant 0 : index
    %c0_12 = arith.constant 0 : index
    %8 = vector.load %arg7[%c0_11, %c0_12] : memref<32x32xf32, #tpu.memory_space<vmem>>, vector<32x32xf32>
    %c0_13 = arith.constant 0 : index
    %c0_14 = arith.constant 0 : index
    %c0_15 = arith.constant 0 : index
    %9 = vector.load %arg2[%c0_13, %c0_14, %c0_15] : memref<1x32x256xf32, #tpu.memory_space<vmem>>, vector<1x32x256xf32>
    %10 = vector.shape_cast %9 : vector<1x32x256xf32> to vector<32x256xf32>
    %cst_16 = arith.constant dense<0.000000e+00> : vector<32x256xf32>
    %11 = tpu.matmul %8, %10, %cst_16 {dimension_numbers = #tpu.dot_dimension_numbers<[1], [0], [0], [1], [0, 0, 1, 1], [], []>} : vector<32x32xf32>, vector<32x256xf32>, vector<32x256xf32> -> vector<32x256xf32>
    %c0_17 = arith.constant 0 : index
    %c0_18 = arith.constant 0 : index
    %12 = vector.load %arg8[%c0_17, %c0_18] : memref<32x1xf32, #tpu.memory_space<vmem>>, vector<32x1xf32>
    %c0_19 = arith.constant 0 : index
    %c0_20 = arith.constant 0 : index
    %13 = vector.load %arg9[%c0_19, %c0_20] : memref<32x1xf32, #tpu.memory_space<vmem>>, vector<32x1xf32>
    %cst_21 = arith.constant dense<0.000000e+00> : vector<32xf32>
    %14 = vector.multi_reduction <add>, %11, %cst_21 [1] : vector<32x256xf32> to vector<32xf32>
    %15 = vector.shape_cast %14 : vector<32xf32> to vector<32x1xf32>
    %16 = arith.mulf %11, %11 : vector<32x256xf32>
    %cst_22 = arith.constant dense<0.000000e+00> : vector<32xf32>
    %17 = vector.multi_reduction <add>, %16, %cst_22 [1] : vector<32x256xf32> to vector<32xf32>
    %18 = vector.shape_cast %17 : vector<32xf32> to vector<32x1xf32>
    %cst_23 = arith.constant dense<0.000000e+00> : vector<1xf32>
    %19 = vector.multi_reduction <add>, %15, %cst_23 [0] : vector<32x1xf32> to vector<1xf32>
    %20 = vector.shape_cast %19 : vector<1xf32> to vector<1x1xf32>
    %cst_24 = arith.constant 1.22070313E-4 : f32
    %21 = vector.broadcast %cst_24 : f32 to vector<1x1xf32>
    %22 = arith.mulf %20, %21 : vector<1x1xf32>
    %cst_25 = arith.constant dense<0.000000e+00> : vector<1xf32>
    %23 = vector.multi_reduction <add>, %18, %cst_25 [0] : vector<32x1xf32> to vector<1xf32>
    %24 = vector.shape_cast %23 : vector<1xf32> to vector<1x1xf32>
    %cst_26 = arith.constant 1.22070313E-4 : f32
    %25 = vector.broadcast %cst_26 : f32 to vector<1x1xf32>
    %26 = arith.mulf %24, %25 : vector<1x1xf32>
    %27 = arith.mulf %22, %22 : vector<1x1xf32>
    %28 = arith.subf %26, %27 : vector<1x1xf32>
    %cst_27 = arith.constant 0.000000e+00 : f32
    %29 = vector.broadcast %cst_27 : f32 to vector<1x1xf32>
    %30 = arith.maximumf %28, %29 : vector<1x1xf32>
    %31 = vector.broadcast %22 : vector<1x1xf32> to vector<32x256xf32>
    %32 = arith.subf %11, %31 : vector<32x256xf32>
    %cst_28 = arith.constant 9.99999974E-6 : f32
    %33 = vector.broadcast %cst_28 : f32 to vector<1x1xf32>
    %34 = arith.addf %30, %33 : vector<1x1xf32>
    %35 = math.rsqrt %34 : vector<1x1xf32>
    %36 = vector.broadcast %35 : vector<1x1xf32> to vector<32x256xf32>
    %37 = arith.mulf %32, %36 : vector<32x256xf32>
    %38 = vector.broadcast %12 : vector<32x1xf32> to vector<32x256xf32>
    %39 = arith.mulf %37, %38 : vector<32x256xf32>
    %40 = vector.broadcast %13 : vector<32x1xf32> to vector<32x256xf32>
    %41 = arith.addf %39, %40 : vector<32x256xf32>
    %c0_29 = arith.constant 0 : index
    %c0_30 = arith.constant 0 : index
    %42 = vector.load %arg10[%c0_29, %c0_30] : memref<32x1xf32, #tpu.memory_space<vmem>>, vector<32x1xf32>
    %c0_31 = arith.constant 0 : index
    %c0_32 = arith.constant 0 : index
    %43 = vector.load %arg11[%c0_31, %c0_32] : memref<32x1xf32, #tpu.memory_space<vmem>>, vector<32x1xf32>
    %cst_33 = arith.constant dense<0.000000e+00> : vector<32xf32>
    %44 = vector.multi_reduction <add>, %7, %cst_33 [1] : vector<32x256xf32> to vector<32xf32>
    %45 = vector.shape_cast %44 : vector<32xf32> to vector<32x1xf32>
    %46 = arith.mulf %7, %7 : vector<32x256xf32>
    %cst_34 = arith.constant dense<0.000000e+00> : vector<32xf32>
    %47 = vector.multi_reduction <add>, %46, %cst_34 [1] : vector<32x256xf32> to vector<32xf32>
    %48 = vector.shape_cast %47 : vector<32xf32> to vector<32x1xf32>
    %cst_35 = arith.constant dense<0.000000e+00> : vector<1xf32>
    %49 = vector.multi_reduction <add>, %45, %cst_35 [0] : vector<32x1xf32> to vector<1xf32>
    %50 = vector.shape_cast %49 : vector<1xf32> to vector<1x1xf32>
    %cst_36 = arith.constant 1.22070313E-4 : f32
    %51 = vector.broadcast %cst_36 : f32 to vector<1x1xf32>
    %52 = arith.mulf %50, %51 : vector<1x1xf32>
    %cst_37 = arith.constant dense<0.000000e+00> : vector<1xf32>
    %53 = vector.multi_reduction <add>, %48, %cst_37 [0] : vector<32x1xf32> to vector<1xf32>
    %54 = vector.shape_cast %53 : vector<1xf32> to vector<1x1xf32>
    %cst_38 = arith.constant 1.22070313E-4 : f32
    %55 = vector.broadcast %cst_38 : f32 to vector<1x1xf32>
    %56 = arith.mulf %54, %55 : vector<1x1xf32>
    %57 = arith.mulf %52, %52 : vector<1x1xf32>
    %58 = arith.subf %56, %57 : vector<1x1xf32>
    %cst_39 = arith.constant 0.000000e+00 : f32
    %59 = vector.broadcast %cst_39 : f32 to vector<1x1xf32>
    %60 = arith.maximumf %58, %59 : vector<1x1xf32>
    %61 = vector.broadcast %52 : vector<1x1xf32> to vector<32x256xf32>
    %62 = arith.subf %7, %61 : vector<32x256xf32>
    %cst_40 = arith.constant 9.99999974E-6 : f32
    %63 = vector.broadcast %cst_40 : f32 to vector<1x1xf32>
    %64 = arith.addf %60, %63 : vector<1x1xf32>
    %65 = math.rsqrt %64 : vector<1x1xf32>
    %66 = vector.broadcast %65 : vector<1x1xf32> to vector<32x256xf32>
    %67 = arith.mulf %62, %66 : vector<32x256xf32>
    %68 = vector.broadcast %42 : vector<32x1xf32> to vector<32x256xf32>
    %69 = arith.mulf %67, %68 : vector<32x256xf32>
    %70 = vector.broadcast %43 : vector<32x1xf32> to vector<32x256xf32>
    %71 = arith.addf %69, %70 : vector<32x256xf32>
    %72 = arith.addf %41, %71 : vector<32x256xf32>
    %c0_41 = arith.constant 0 : index
    %c0_42 = arith.constant 0 : index
    %73 = vector.load %arg4[%c0_41, %c0_42] : memref<256x362xf32, #tpu.memory_space<vmem>>, vector<256x362xf32>
    %cst_43 = arith.constant dense<0.000000e+00> : vector<32x362xf32>
    %74 = tpu.matmul %72, %73, %cst_43 {dimension_numbers = #tpu.dot_dimension_numbers<[1], [0], [0], [1], [0, 0, 1, 1], [], []>} : vector<32x256xf32>, vector<256x362xf32>, vector<32x362xf32> -> vector<32x362xf32>
    %c0_44 = arith.constant 0 : index
    %c0_45 = arith.constant 0 : index
    %75 = vector.load %arg21[%c0_44, %c0_45] : memref<32x362xf32, #tpu.memory_space<vmem>>, vector<32x362xf32>
    tpu.vector_store %arg21[%c0_44, %c0_45], %74 {strides = array<i32>} : memref<32x362xf32, #tpu.memory_space<vmem>>, vector<32x362xf32>,
    %cst_46 = arith.constant 0.000000e+00 : f32
    %76 = vector.broadcast %cst_46 : f32 to vector<32x19xf32>
    %c0_47 = arith.constant 0 : index
    %c0_48 = arith.constant 0 : index
    %77 = vector.load %arg22[%c0_47, %c0_48] : memref<32x362xf32, #tpu.memory_space<vmem>>, vector<32x19xf32>
    tpu.vector_store %arg22[%c0_47, %c0_48], %76 {strides = array<i32>} : memref<32x362xf32, #tpu.memory_space<vmem>>, vector<32x19xf32>,
    %cst_49 = arith.constant 0.000000e+00 : f32
    %78 = vector.broadcast %cst_49 : f32 to vector<32x19xf32>
    %c0_50 = arith.constant 0 : index
    %c343 = arith.constant 343 : index
    %79 = vector.load %arg22[%c0_50, %c343] : memref<32x362xf32, #tpu.memory_space<vmem>>, vector<32x19xf32>
    tpu.vector_store %arg22[%c0_50, %c343], %78 {strides = array<i32>} : memref<32x362xf32, #tpu.memory_space<vmem>>, vector<32x19xf32>,
    %c0_51 = arith.constant 0 : index
    %c0_52 = arith.constant 0 : index
    %80 = vector.load %arg13[%c0_51, %c0_52] : memref<32x288xf32, #tpu.memory_space<vmem>>, vector<32x288xf32>
    %c0_53 = arith.constant 0 : index
    %c0_54 = arith.constant 0 : index
    %81 = vector.load %arg14[%c0_53, %c0_54] : memref<32x1xf32, #tpu.memory_space<vmem>>, vector<32x1xf32>
    %c0_55 = arith.constant 0 : index
    %c0_56 = arith.constant 0 : index
    %82 = vector.load %arg15[%c0_55, %c0_56] : memref<32x1xf32, #tpu.memory_space<vmem>>, vector<32x1xf32>
    %c0_57 = arith.constant 0 : index
    %c0_58 = arith.constant 0 : index
    %83 = vector.load %arg21[%c0_57, %c0_58] : memref<32x362xf32, #tpu.memory_space<vmem>>, vector<32x324xf32>
    %c0_59 = arith.constant 0 : index
    %c0_60 = arith.constant 0 : index
    %84 = vector.load %arg23[%c0_59, %c0_60] : memref<288x324xf32, #tpu.memory_space<vmem>>, vector<32x324xf32>
    tpu.vector_store %arg23[%c0_59, %c0_60], %83 {strides = array<i32>} : memref<288x324xf32, #tpu.memory_space<vmem>>, vector<32x324xf32>,
    %c0_61 = arith.constant 0 : index
    %c1 = arith.constant 1 : index
    %85 = vector.load %arg21[%c0_61, %c1] : memref<32x362xf32, #tpu.memory_space<vmem>>, vector<32x324xf32>
    %c32 = arith.constant 32 : index
    %c0_62 = arith.constant 0 : index
    %86 = vector.load %arg23[%c32, %c0_62] : memref<288x324xf32, #tpu.memory_space<vmem>>, vector<32x324xf32>
    tpu.vector_store %arg23[%c32, %c0_62], %85 {strides = array<i32>} : memref<288x324xf32, #tpu.memory_space<vmem>>, vector<32x324xf32>,
    %c0_63 = arith.constant 0 : index
    %c2 = arith.constant 2 : index
    %87 = vector.load %arg21[%c0_63, %c2] : memref<32x362xf32, #tpu.memory_space<vmem>>, vector<32x324xf32>
    %c64 = arith.constant 64 : index
    %c0_64 = arith.constant 0 : index
    %88 = vector.load %arg23[%c64, %c0_64] : memref<288x324xf32, #tpu.memory_space<vmem>>, vector<32x324xf32>
    tpu.vector_store %arg23[%c64, %c0_64], %87 {strides = array<i32>} : memref<288x324xf32, #tpu.memory_space<vmem>>, vector<32x324xf32>,
    %c0_65 = arith.constant 0 : index
    %c18 = arith.constant 18 : index
    %89 = vector.load %arg21[%c0_65, %c18] : memref<32x362xf32, #tpu.memory_space<vmem>>, vector<32x324xf32>
    %c96 = arith.constant 96 : index
    %c0_66 = arith.constant 0 : index
    %90 = vector.load %arg23[%c96, %c0_66] : memref<288x324xf32, #tpu.memory_space<vmem>>, vector<32x324xf32>
    tpu.vector_store %arg23[%c96, %c0_66], %89 {strides = array<i32>} : memref<288x324xf32, #tpu.memory_space<vmem>>, vector<32x324xf32>,
    %c0_67 = arith.constant 0 : index
    %c19 = arith.constant 19 : index
    %91 = vector.load %arg21[%c0_67, %c19] : memref<32x362xf32, #tpu.memory_space<vmem>>, vector<32x324xf32>
    %c128 = arith.constant 128 : index
    %c0_68 = arith.constant 0 : index
    %92 = vector.load %arg23[%c128, %c0_68] : memref<288x324xf32, #tpu.memory_space<vmem>>, vector<32x324xf32>
    tpu.vector_store %arg23[%c128, %c0_68], %91 {strides = array<i32>} : memref<288x324xf32, #tpu.memory_space<vmem>>, vector<32x324xf32>,
    %c0_69 = arith.constant 0 : index
    %c20 = arith.constant 20 : index
    %93 = vector.load %arg21[%c0_69, %c20] : memref<32x362xf32, #tpu.memory_space<vmem>>, vector<32x324xf32>
    %c160 = arith.constant 160 : index
    %c0_70 = arith.constant 0 : index
    %94 = vector.load %arg23[%c160, %c0_70] : memref<288x324xf32, #tpu.memory_space<vmem>>, vector<32x324xf32>
    tpu.vector_store %arg23[%c160, %c0_70], %93 {strides = array<i32>} : memref<288x324xf32, #tpu.memory_space<vmem>>, vector<32x324xf32>,
    %c0_71 = arith.constant 0 : index
    %c36 = arith.constant 36 : index
    %95 = vector.load %arg21[%c0_71, %c36] : memref<32x362xf32, #tpu.memory_space<vmem>>, vector<32x324xf32>
    %c192 = arith.constant 192 : index
    %c0_72 = arith.constant 0 : index
    %96 = vector.load %arg23[%c192, %c0_72] : memref<288x324xf32, #tpu.memory_space<vmem>>, vector<32x324xf32>
    tpu.vector_store %arg23[%c192, %c0_72], %95 {strides = array<i32>} : memref<288x324xf32, #tpu.memory_space<vmem>>, vector<32x324xf32>,
    %c0_73 = arith.constant 0 : index
    %c37 = arith.constant 37 : index
    %97 = vector.load %arg21[%c0_73, %c37] : memref<32x362xf32, #tpu.memory_space<vmem>>, vector<32x324xf32>
    %c224 = arith.constant 224 : index
    %c0_74 = arith.constant 0 : index
    %98 = vector.load %arg23[%c224, %c0_74] : memref<288x324xf32, #tpu.memory_space<vmem>>, vector<32x324xf32>
    tpu.vector_store %arg23[%c224, %c0_74], %97 {strides = array<i32>} : memref<288x324xf32, #tpu.memory_space<vmem>>, vector<32x324xf32>,
    %c0_75 = arith.constant 0 : index
    %c38 = arith.constant 38 : index
    %99 = vector.load %arg21[%c0_75, %c38] : memref<32x362xf32, #tpu.memory_space<vmem>>, vector<32x324xf32>
    %c256 = arith.constant 256 : index
    %c0_76 = arith.constant 0 : index
    %100 = vector.load %arg23[%c256, %c0_76] : memref<288x324xf32, #tpu.memory_space<vmem>>, vector<32x324xf32>
    tpu.vector_store %arg23[%c256, %c0_76], %99 {strides = array<i32>} : memref<288x324xf32, #tpu.memory_space<vmem>>, vector<32x324xf32>,
    %c0_77 = arith.constant 0 : index
    %c0_78 = arith.constant 0 : index
    %101 = vector.load %arg23[%c0_77, %c0_78] : memref<288x324xf32, #tpu.memory_space<vmem>>, vector<288x324xf32>
    %cst_79 = arith.constant dense<0.000000e+00> : vector<32x324xf32>
    %102 = tpu.matmul %80, %101, %cst_79 {dimension_numbers = #tpu.dot_dimension_numbers<[1], [0], [0], [1], [0, 0, 1, 1], [], []>} : vector<32x288xf32>, vector<288x324xf32>, vector<32x324xf32> -> vector<32x324xf32>
    %103 = vector.broadcast %0 : vector<1x324xf32> to vector<32x324xf32>
    %104 = arith.mulf %102, %103 : vector<32x324xf32>
    %cst_80 = arith.constant dense<0.000000e+00> : vector<32xf32>
    %105 = vector.multi_reduction <add>, %104, %cst_80 [1] : vector<32x324xf32> to vector<32xf32>
    %106 = vector.shape_cast %105 : vector<32xf32> to vector<32x1xf32>
    %107 = arith.mulf %104, %104 : vector<32x324xf32>
    %cst_81 = arith.constant dense<0.000000e+00> : vector<32xf32>
    %108 = vector.multi_reduction <add>, %107, %cst_81 [1] : vector<32x324xf32> to vector<32xf32>
    %109 = vector.shape_cast %108 : vector<32xf32> to vector<32x1xf32>
    %110 = tpu.iota {dimensions = array<i32: 1>} : vector<32x2xi32>
    %c0_i32 = arith.constant 0 : i32
    %111 = vector.broadcast %c0_i32 : i32 to vector<32x2xi32>
    %112 = arith.cmpi eq, %110, %111 : vector<32x2xi32>
    %113 = vector.shape_cast %106 : vector<32x1xf32> to vector<32x1xf32>
    %114 = vector.broadcast %113 : vector<32x1xf32> to vector<32x2xf32>
    %115 = vector.shape_cast %109 : vector<32x1xf32> to vector<32x1xf32>
    %116 = vector.broadcast %115 : vector<32x1xf32> to vector<32x2xf32>
    %117 = arith.select %112, %114, %116 : vector<32x2xi1>, vector<32x2xf32>
    %cst_82 = arith.constant dense<0.000000e+00> : vector<32x2xf32>
    %118 = tpu.matmul %1, %117, %cst_82 {dimension_numbers = #tpu.dot_dimension_numbers<[1], [0], [0], [1], [0, 0, 1, 1], [], []>} : vector<32x32xf32>, vector<32x2xf32>, vector<32x2xf32> -> vector<32x2xf32>
    %119 = vector.extract_strided_slice %118 {offsets = [0, 0], sizes = [32, 1], strides = [1, 1]} : vector<32x2xf32> to vector<32x1xf32>
    %120 = vector.extract_strided_slice %118 {offsets = [0, 1], sizes = [32, 1], strides = [1, 1]} : vector<32x2xf32> to vector<32x1xf32>
    %121 = arith.mulf %119, %119 : vector<32x1xf32>
    %122 = arith.subf %120, %121 : vector<32x1xf32>
    %cst_83 = arith.constant 0.000000e+00 : f32
    %123 = vector.broadcast %cst_83 : f32 to vector<32x1xf32>
    %124 = arith.maximumf %122, %123 : vector<32x1xf32>
    %125 = vector.broadcast %119 : vector<32x1xf32> to vector<32x324xf32>
    %126 = arith.subf %102, %125 : vector<32x324xf32>
    %cst_84 = arith.constant 9.99999974E-6 : f32
    %127 = vector.broadcast %cst_84 : f32 to vector<32x1xf32>
    %128 = arith.addf %124, %127 : vector<32x1xf32>
    %129 = math.rsqrt %128 : vector<32x1xf32>
    %130 = vector.broadcast %129 : vector<32x1xf32> to vector<32x324xf32>
    %131 = arith.mulf %126, %130 : vector<32x324xf32>
    %132 = vector.broadcast %81 : vector<32x1xf32> to vector<32x324xf32>
    %133 = arith.mulf %131, %132 : vector<32x324xf32>
    %134 = vector.broadcast %82 : vector<32x1xf32> to vector<32x324xf32>
    %135 = arith.addf %133, %134 : vector<32x324xf32>
    %cst_85 = arith.constant 0.000000e+00 : f32
    %136 = vector.broadcast %cst_85 : f32 to vector<32x324xf32>
    %137 = arith.maximumf %135, %136 : vector<32x324xf32>
    %138 = vector.broadcast %0 : vector<1x324xf32> to vector<32x324xf32>
    %139 = arith.mulf %137, %138 : vector<32x324xf32>
    %c0_86 = arith.constant 0 : index
    %c19_87 = arith.constant 19 : index
    %140 = vector.load %arg22[%c0_86, %c19_87] : memref<32x362xf32, #tpu.memory_space<vmem>>, vector<32x324xf32>
    tpu.vector_store %arg22[%c0_86, %c19_87], %139 {strides = array<i32>} : memref<32x362xf32, #tpu.memory_space<vmem>>, vector<32x324xf32>,
    %c0_88 = arith.constant 0 : index
    %c0_89 = arith.constant 0 : index
    %141 = vector.load %arg16[%c0_88, %c0_89] : memref<32x288xf32, #tpu.memory_space<vmem>>, vector<32x288xf32>
    %c0_90 = arith.constant 0 : index
    %c0_91 = arith.constant 0 : index
    %142 = vector.load %arg17[%c0_90, %c0_91] : memref<32x1xf32, #tpu.memory_space<vmem>>, vector<32x1xf32>
    %c0_92 = arith.constant 0 : index
    %c0_93 = arith.constant 0 : index
    %143 = vector.load %arg18[%c0_92, %c0_93] : memref<32x1xf32, #tpu.memory_space<vmem>>, vector<32x1xf32>
    %c0_94 = arith.constant 0 : index
    %c0_95 = arith.constant 0 : index
    %144 = vector.load %arg22[%c0_94, %c0_95] : memref<32x362xf32, #tpu.memory_space<vmem>>, vector<32x324xf32>
    %c0_96 = arith.constant 0 : index
    %c0_97 = arith.constant 0 : index
    %145 = vector.load %arg23[%c0_96, %c0_97] : memref<288x324xf32, #tpu.memory_space<vmem>>, vector<32x324xf32>
    tpu.vector_store %arg23[%c0_96, %c0_97], %144 {strides = array<i32>} : memref<288x324xf32, #tpu.memory_space<vmem>>, vector<32x324xf32>,
    %c0_98 = arith.constant 0 : index
    %c1_99 = arith.constant 1 : index
    %146 = vector.load %arg22[%c0_98, %c1_99] : memref<32x362xf32, #tpu.memory_space<vmem>>, vector<32x324xf32>
    %c32_100 = arith.constant 32 : index
    %c0_101 = arith.constant 0 : index
    %147 = vector.load %arg23[%c32_100, %c0_101] : memref<288x324xf32, #tpu.memory_space<vmem>>, vector<32x324xf32>
    tpu.vector_store %arg23[%c32_100, %c0_101], %146 {strides = array<i32>} : memref<288x324xf32, #tpu.memory_space<vmem>>, vector<32x324xf32>,
    %c0_102 = arith.constant 0 : index
    %c2_103 = arith.constant 2 : index
    %148 = vector.load %arg22[%c0_102, %c2_103] : memref<32x362xf32, #tpu.memory_space<vmem>>, vector<32x324xf32>
    %c64_104 = arith.constant 64 : index
    %c0_105 = arith.constant 0 : index
    %149 = vector.load %arg23[%c64_104, %c0_105] : memref<288x324xf32, #tpu.memory_space<vmem>>, vector<32x324xf32>
    tpu.vector_store %arg23[%c64_104, %c0_105], %148 {strides = array<i32>} : memref<288x324xf32, #tpu.memory_space<vmem>>, vector<32x324xf32>,
    %c0_106 = arith.constant 0 : index
    %c18_107 = arith.constant 18 : index
    %150 = vector.load %arg22[%c0_106, %c18_107] : memref<32x362xf32, #tpu.memory_space<vmem>>, vector<32x324xf32>
    %c96_108 = arith.constant 96 : index
    %c0_109 = arith.constant 0 : index
    %151 = vector.load %arg23[%c96_108, %c0_109] : memref<288x324xf32, #tpu.memory_space<vmem>>, vector<32x324xf32>
    tpu.vector_store %arg23[%c96_108, %c0_109], %150 {strides = array<i32>} : memref<288x324xf32, #tpu.memory_space<vmem>>, vector<32x324xf32>,
    %c0_110 = arith.constant 0 : index
    %c19_111 = arith.constant 19 : index
    %152 = vector.load %arg22[%c0_110, %c19_111] : memref<32x362xf32, #tpu.memory_space<vmem>>, vector<32x324xf32>
    %c128_112 = arith.constant 128 : index
    %c0_113 = arith.constant 0 : index
    %153 = vector.load %arg23[%c128_112, %c0_113] : memref<288x324xf32, #tpu.memory_space<vmem>>, vector<32x324xf32>
    tpu.vector_store %arg23[%c128_112, %c0_113], %152 {strides = array<i32>} : memref<288x324xf32, #tpu.memory_space<vmem>>, vector<32x324xf32>,
    %c0_114 = arith.constant 0 : index
    %c20_115 = arith.constant 20 : index
    %154 = vector.load %arg22[%c0_114, %c20_115] : memref<32x362xf32, #tpu.memory_space<vmem>>, vector<32x324xf32>
    %c160_116 = arith.constant 160 : index
    %c0_117 = arith.constant 0 : index
    %155 = vector.load %arg23[%c160_116, %c0_117] : memref<288x324xf32, #tpu.memory_space<vmem>>, vector<32x324xf32>
    tpu.vector_store %arg23[%c160_116, %c0_117], %154 {strides = array<i32>} : memref<288x324xf32, #tpu.memory_space<vmem>>, vector<32x324xf32>,
    %c0_118 = arith.constant 0 : index
    %c36_119 = arith.constant 36 : index
    %156 = vector.load %arg22[%c0_118, %c36_119] : memref<32x362xf32, #tpu.memory_space<vmem>>, vector<32x324xf32>
    %c192_120 = arith.constant 192 : index
    %c0_121 = arith.constant 0 : index
    %157 = vector.load %arg23[%c192_120, %c0_121] : memref<288x324xf32, #tpu.memory_space<vmem>>, vector<32x324xf32>
    tpu.vector_store %arg23[%c192_120, %c0_121], %156 {strides = array<i32>} : memref<288x324xf32, #tpu.memory_space<vmem>>, vector<32x324xf32>,
    %c0_122 = arith.constant 0 : index
    %c37_123 = arith.constant 37 : index
    %158 = vector.load %arg22[%c0_122, %c37_123] : memref<32x362xf32, #tpu.memory_space<vmem>>, vector<32x324xf32>
    %c224_124 = arith.constant 224 : index
    %c0_125 = arith.constant 0 : index
    %159 = vector.load %arg23[%c224_124, %c0_125] : memref<288x324xf32, #tpu.memory_space<vmem>>, vector<32x324xf32>
    tpu.vector_store %arg23[%c224_124, %c0_125], %158 {strides = array<i32>} : memref<288x324xf32, #tpu.memory_space<vmem>>, vector<32x324xf32>,
    %c0_126 = arith.constant 0 : index
    %c38_127 = arith.constant 38 : index
    %160 = vector.load %arg22[%c0_126, %c38_127] : memref<32x362xf32, #tpu.memory_space<vmem>>, vector<32x324xf32>
    %c256_128 = arith.constant 256 : index
    %c0_129 = arith.constant 0 : index
    %161 = vector.load %arg23[%c256_128, %c0_129] : memref<288x324xf32, #tpu.memory_space<vmem>>, vector<32x324xf32>
    tpu.vector_store %arg23[%c256_128, %c0_129], %160 {strides = array<i32>} : memref<288x324xf32, #tpu.memory_space<vmem>>, vector<32x324xf32>,
    %c0_130 = arith.constant 0 : index
    %c0_131 = arith.constant 0 : index
    %162 = vector.load %arg23[%c0_130, %c0_131] : memref<288x324xf32, #tpu.memory_space<vmem>>, vector<288x324xf32>
    %cst_132 = arith.constant dense<0.000000e+00> : vector<32x324xf32>
    %163 = tpu.matmul %141, %162, %cst_132 {dimension_numbers = #tpu.dot_dimension_numbers<[1], [0], [0], [1], [0, 0, 1, 1], [], []>} : vector<32x288xf32>, vector<288x324xf32>, vector<32x324xf32> -> vector<32x324xf32>
    %164 = vector.broadcast %0 : vector<1x324xf32> to vector<32x324xf32>
    %165 = arith.mulf %163, %164 : vector<32x324xf32>
    %cst_133 = arith.constant dense<0.000000e+00> : vector<32xf32>
    %166 = vector.multi_reduction <add>, %165, %cst_133 [1] : vector<32x324xf32> to vector<32xf32>
    %167 = vector.shape_cast %166 : vector<32xf32> to vector<32x1xf32>
    %168 = arith.mulf %165, %165 : vector<32x324xf32>
    %cst_134 = arith.constant dense<0.000000e+00> : vector<32xf32>
    %169 = vector.multi_reduction <add>, %168, %cst_134 [1] : vector<32x324xf32> to vector<32xf32>
    %170 = vector.shape_cast %169 : vector<32xf32> to vector<32x1xf32>
    %171 = tpu.iota {dimensions = array<i32: 1>} : vector<32x2xi32>
    %c0_i32_135 = arith.constant 0 : i32
    %172 = vector.broadcast %c0_i32_135 : i32 to vector<32x2xi32>
    %173 = arith.cmpi eq, %171, %172 : vector<32x2xi32>
    %174 = vector.shape_cast %167 : vector<32x1xf32> to vector<32x1xf32>
    %175 = vector.broadcast %174 : vector<32x1xf32> to vector<32x2xf32>
    %176 = vector.shape_cast %170 : vector<32x1xf32> to vector<32x1xf32>
    %177 = vector.broadcast %176 : vector<32x1xf32> to vector<32x2xf32>
    %178 = arith.select %173, %175, %177 : vector<32x2xi1>, vector<32x2xf32>
    %cst_136 = arith.constant dense<0.000000e+00> : vector<32x2xf32>
    %179 = tpu.matmul %1, %178, %cst_136 {dimension_numbers = #tpu.dot_dimension_numbers<[1], [0], [0], [1], [0, 0, 1, 1], [], []>} : vector<32x32xf32>, vector<32x2xf32>, vector<32x2xf32> -> vector<32x2xf32>
    %180 = vector.extract_strided_slice %179 {offsets = [0, 0], sizes = [32, 1], strides = [1, 1]} : vector<32x2xf32> to vector<32x1xf32>
    %181 = vector.extract_strided_slice %179 {offsets = [0, 1], sizes = [32, 1], strides = [1, 1]} : vector<32x2xf32> to vector<32x1xf32>
    %182 = arith.mulf %180, %180 : vector<32x1xf32>
    %183 = arith.subf %181, %182 : vector<32x1xf32>
    %cst_137 = arith.constant 0.000000e+00 : f32
    %184 = vector.broadcast %cst_137 : f32 to vector<32x1xf32>
    %185 = arith.maximumf %183, %184 : vector<32x1xf32>
    %186 = vector.broadcast %180 : vector<32x1xf32> to vector<32x324xf32>
    %187 = arith.subf %163, %186 : vector<32x324xf32>
    %cst_138 = arith.constant 9.99999974E-6 : f32
    %188 = vector.broadcast %cst_138 : f32 to vector<32x1xf32>
    %189 = arith.addf %185, %188 : vector<32x1xf32>
    %190 = math.rsqrt %189 : vector<32x1xf32>
    %191 = vector.broadcast %190 : vector<32x1xf32> to vector<32x324xf32>
    %192 = arith.mulf %187, %191 : vector<32x324xf32>
    %193 = vector.broadcast %142 : vector<32x1xf32> to vector<32x324xf32>
    %194 = arith.mulf %192, %193 : vector<32x324xf32>
    %195 = vector.broadcast %143 : vector<32x1xf32> to vector<32x324xf32>
    %196 = arith.addf %194, %195 : vector<32x324xf32>
    %cst_139 = arith.constant 0.000000e+00 : f32
    %197 = vector.broadcast %cst_139 : f32 to vector<32x324xf32>
    %198 = arith.maximumf %196, %197 : vector<32x324xf32>
    %199 = vector.broadcast %0 : vector<1x324xf32> to vector<32x324xf32>
    %200 = arith.mulf %198, %199 : vector<32x324xf32>
    %c0_140 = arith.constant 0 : index
    %c0_141 = arith.constant 0 : index
    %c0_142 = arith.constant 0 : index
    %201 = vector.load %arg20[%c0_140, %c0_141, %c0_142] : memref<1x32x324xf32, #tpu.memory_space<vmem>>, vector<1x32x324xf32>
    %202 = vector.shape_cast %201 : vector<1x32x324xf32> to vector<32x324xf32>
    %203 = vector.shape_cast %200 : vector<32x324xf32> to vector<1x32x324xf32>
    tpu.vector_store %arg20[%c0_140, %c0_141, %c0_142], %203 {strides = array<i32>} : memref<1x32x324xf32, #tpu.memory_space<vmem>>, vector<1x32x324xf32>,
    return
  }
  func.func @transform_0(%arg0: i32) -> (i32, i32, i32) {
    %c0_i32 = arith.constant 0 : i32
    %c0_i32_0 = arith.constant 0 : i32
    %c0_i32_1 = arith.constant 0 : i32
    return %arg0, %c0_i32, %c0_i32_0 : i32, i32, i32
  }
  func.func @transform_1(%arg0: i32) -> (i32, i32, i32) {
    %c0_i32 = arith.constant 0 : i32
    %c0_i32_0 = arith.constant 0 : i32
    %c0_i32_1 = arith.constant 0 : i32
    return %arg0, %c0_i32, %c0_i32_0 : i32, i32, i32
  }
  func.func @transform_2(%arg0: i32) -> (i32, i32) {
    %c0_i32 = arith.constant 0 : i32
    %c0_i32_0 = arith.constant 0 : i32
    %c0_i32_1 = arith.constant 0 : i32
    return %c0_i32, %c0_i32_0 : i32, i32
  }
  func.func @transform_3(%arg0: i32) -> (i32, i32) {
    %c0_i32 = arith.constant 0 : i32
    %c0_i32_0 = arith.constant 0 : i32
    %c0_i32_1 = arith.constant 0 : i32
    return %c0_i32, %c0_i32_0 : i32, i32
  }
  func.func @transform_4(%arg0: i32) -> (i32, i32) {
    %c0_i32 = arith.constant 0 : i32
    %c0_i32_0 = arith.constant 0 : i32
    %c0_i32_1 = arith.constant 0 : i32
    return %c0_i32, %c0_i32_0 : i32, i32
  }
  func.func @transform_5(%arg0: i32) -> (i32, i32) {
    %c0_i32 = arith.constant 0 : i32
    %c0_i32_0 = arith.constant 0 : i32
    %c0_i32_1 = arith.constant 0 : i32
    return %c0_i32, %c0_i32_0 : i32, i32
  }
  func.func @transform_6(%arg0: i32) -> (i32, i32) {
    %c0_i32 = arith.constant 0 : i32
    %c0_i32_0 = arith.constant 0 : i32
    %c0_i32_1 = arith.constant 0 : i32
    return %c0_i32, %c0_i32_0 : i32, i32
  }
  func.func @transform_7(%arg0: i32) -> (i32, i32) {
    %c0_i32 = arith.constant 0 : i32
    %c0_i32_0 = arith.constant 0 : i32
    %c0_i32_1 = arith.constant 0 : i32
    return %c0_i32, %c0_i32_0 : i32, i32
  }
  func.func @transform_8(%arg0: i32) -> (i32, i32) {
    %c0_i32 = arith.constant 0 : i32
    %c0_i32_0 = arith.constant 0 : i32
    %c0_i32_1 = arith.constant 0 : i32
    return %c0_i32, %c0_i32_0 : i32, i32
  }
  func.func @transform_9(%arg0: i32) -> (i32, i32) {
    %c0_i32 = arith.constant 0 : i32
    %c0_i32_0 = arith.constant 0 : i32
    %c0_i32_1 = arith.constant 0 : i32
    return %c0_i32, %c0_i32_0 : i32, i32
  }
  func.func @transform_10(%arg0: i32) -> (i32, i32) {
    %c0_i32 = arith.constant 0 : i32
    %c0_i32_0 = arith.constant 0 : i32
    %c0_i32_1 = arith.constant 0 : i32
    return %c0_i32, %c0_i32_0 : i32, i32
  }
  func.func @transform_11(%arg0: i32) -> (i32, i32) {
    %c0_i32 = arith.constant 0 : i32
    %c0_i32_0 = arith.constant 0 : i32
    %c0_i32_1 = arith.constant 0 : i32
    return %c0_i32, %c0_i32_0 : i32, i32
  }
  func.func @transform_12(%arg0: i32) -> (i32, i32) {
    %c0_i32 = arith.constant 0 : i32
    %c0_i32_0 = arith.constant 0 : i32
    %c0_i32_1 = arith.constant 0 : i32
    return %c0_i32, %c0_i32_0 : i32, i32
  }
  func.func @transform_13(%arg0: i32) -> (i32, i32) {
    %c0_i32 = arith.constant 0 : i32
    %c0_i32_0 = arith.constant 0 : i32
    %c0_i32_1 = arith.constant 0 : i32
    return %c0_i32, %c0_i32_0 : i32, i32
  }
  func.func @transform_14(%arg0: i32) -> (i32, i32) {
    %c0_i32 = arith.constant 0 : i32
    %c0_i32_0 = arith.constant 0 : i32
    %c0_i32_1 = arith.constant 0 : i32
    return %c0_i32, %c0_i32_0 : i32, i32
  }
  func.func @transform_15(%arg0: i32) -> (i32, i32) {
    %c0_i32 = arith.constant 0 : i32
    %c0_i32_0 = arith.constant 0 : i32
    %c0_i32_1 = arith.constant 0 : i32
    return %c0_i32, %c0_i32_0 : i32, i32
  }
  func.func @transform_16(%arg0: i32) -> (i32, i32) {
    %c0_i32 = arith.constant 0 : i32
    %c0_i32_0 = arith.constant 0 : i32
    %c0_i32_1 = arith.constant 0 : i32
    return %c0_i32, %c0_i32_0 : i32, i32
  }
  func.func @transform_17(%arg0: i32) -> (i32, i32) {
    %c0_i32 = arith.constant 0 : i32
    %c0_i32_0 = arith.constant 0 : i32
    %c0_i32_1 = arith.constant 0 : i32
    return %c0_i32, %c0_i32_0 : i32, i32
  }
  func.func @transform_18(%arg0: i32) -> (i32, i32) {
    %c0_i32 = arith.constant 0 : i32
    %c0_i32_0 = arith.constant 0 : i32
    %c0_i32_1 = arith.constant 0 : i32
    return %c0_i32, %c0_i32_0 : i32, i32
  }
  func.func @transform_19(%arg0: i32) -> (i32, i32, i32) {
    %c0_i32 = arith.constant 0 : i32
    %c0_i32_0 = arith.constant 0 : i32
    %c0_i32_1 = arith.constant 0 : i32
    return %arg0, %c0_i32, %c0_i32_0 : i32, i32, i32
  }
}

</mosaic_0001>

<bundles_post_ra>
// kernel: tpu_custom_call.1
= control target key start
LH: loop header
LB: loop body
LE: loop exit
PB: predicated region body
PF: predicated region fallthrough
CT: control target
= control target key end

     0   :  { %s7888_s0 = inlined_call_operand.vmem [shape: f32[2,64,64], index: 0, kind: input, shape index: {}]   ;;  %s7889_s1 = inlined_call_operand.vmem [shape: f32[2,32,256], index: 1, kind: input, shape index: {}]   ;;  %s7890_s2 = inlined_call_operand.vmem [shape: f32[64,256], index: 2, kind: input, shape index: {}]   ;;  %s7891_s3 = inlined_call_operand.vmem [shape: f32[256,362], index: 3, kind: input, shape index: {}]   ;;  %s7892_s4 = inlined_call_operand.vmem [shape: f32[1,324], index: 4, kind: input, shape index: {}]   ;;  %s7893_s5 = inlined_call_operand.vmem [shape: f32[32,64], index: 5, kind: input, shape index: {}]   ;;  %s7894_s6 = inlined_call_operand.vmem [shape: f32[32,32], index: 6, kind: input, shape index: {}]   ;;  %s7895_s7 = inlined_call_operand.vmem [shape: f32[32,1], index: 7, kind: input, shape index: {}]   ;;  %s7896_s8 = inlined_call_operand.vmem [shape: f32[32,1], index: 8, kind: input, shape index: {}]   ;;  %s7897_s9 = inlined_call_operand.vmem [shape: f32[32,1], index: 9, kind: input, shape index: {}]   ;;  %s7898_s10 = inlined_call_operand.vmem [shape: f32[32,1], index: 10, kind: input, shape index: {}]   ;;  %s7899_s11 = inlined_call_operand.vmem [shape: f32[32,32], index: 11, kind: input, shape index: {}]   ;;  %s7900_s12 = inlined_call_operand.vmem [shape: f32[32,288], index: 12, kind: input, shape index: {}]   ;;  %s7901_s13 = inlined_call_operand.vmem [shape: f32[32,1], index: 13, kind: input, shape index: {}]   ;;  %s7902_s14 = inlined_call_operand.vmem [shape: f32[32,1], index: 14, kind: input, shape index: {}]   ;;  %s7903_s15 = inlined_call_operand.vmem [shape: f32[32,288], index: 15, kind: input, shape index: {}]   ;;  %s7904_s16 = inlined_call_operand.vmem [shape: f32[32,1], index: 16, kind: input, shape index: {}]   ;;  %s7905_s17 = inlined_call_operand.vmem [shape: f32[32,1], index: 17, kind: input, shape index: {}]   ;;  %s7906_s18 = inlined_call_operand.vmem [shape: f32[32,32], index: 18, kind: input, shape index: {}]   ;;  %s7907_s19 = inlined_call_operand.hbm [shape: f32[2,32,324], index: 19, kind: output, shape index: {}]  }
   0x1   :  { %7936 = sst [smem:[#allocation16_spill]] %s7888_s0 }
   0x2   :  { %7937 = sst [smem:[#allocation17_spill]] %s7889_s1 }
   0x3   :  { %7938 = sst [smem:[#allocation18_spill]] %s7890_s2 }
   0x4   :  { %7939 = sst [smem:[#allocation19_spill]] %s7891_s3 }
   0x5   :  { %24 = vsyncpa [#allocation6], 0 }
   0x6   :  { %26 = vsyncpa [#allocation6 + $0x1], 0  ;;  %s5703_s29 = smov 0   ;;  %s5705_s0 = smov 0  }
   0x7   :  { %s5707_s30 = smov 0   ;;  %s5709_s20 = smov 0  }
   0x8 LB: > { %7940 = sst [smem:[#allocation8_spill]] %s5573_s29  ;;  %s5724_s21 = sadd.s32 4294967295, %s5585_s20   ;;  %s5585_s20 = sphi %s5709_s20, %s7969_s20   ;;  %s5581_s30 = sphi %s5707_s30, %s7971_s30   ;;  %s5577_s0 = sphi %s5705_s0, %s7973_s0   ;;  %s5573_s29 = sphi %s5703_s29, %s7972_s29  }
   0x9   : > { %7941 = sst [smem:[#allocation9_spill]] %s5581_s30  ;;  %s4738_s1 = sadd.s32 4294967294, %s5585_s20  }
   0xa   : > { %s5728_s22 = sadd.s32 1, %s5585_s20   ;;  %s448_s2 = sadd.s32 1, %s5581_s30 }
   0xb   : > { %7942 = sst [smem:[#allocation10_spill]] %s5728_s22  ;;  %s445_s23 = ssub.s32 %s5585_s20, %s5728_s22 }
   0xc   : > { %p458_p0 = scmp.ne.s32.totalorder %s5581_s30, %s5577_s0  ;;  %p446_p1 = scmp.eq.s32.totalorder %s445_s23, 0 }
   0xd   : > { %p459_p2 = scmp.eq.s32.totalorder %s5724_s21, 1  ;;  %p464_p3 = scmp.ne.s32.totalorder %s5577_s0, %s5573_s29 }
   0xe   : > { %p465_p4 = scmp.eq.s32.totalorder %s4738_s1, 1  ;;  %p4741_p7 = scmp.ge.s32.totalorder %s5585_s20, 1 }
   0xf   : > { %s5739_s24 = scalar_select %p446_p1, %s5581_s30, %s448_s2  }
  0x10   : > { %p5741_p5 = por %p459_p2, %p458_p0  ;;  %p5745_p6 = por %p465_p4, %p464_p3 }
  0x11   : > { %7943 = sst [smem:[#allocation11_spill]] %s5739_s24  ;;  %p550_p8 = scmp.lt.s32.totalorder %s5585_s20, 3 }
  0x12   : > { %s7945_s3 = scalar_select %p5745_p6, 1, 0 }
  0x13   : > { %p551_p9 = pnand %p4741_p7, %p550_p8 }
  0x14   : > { %7946 = sst [smem:[#allocation12_spill]] %s7945_s3 }
  0x15   : > { %554 = sbr.rel (%p551_p9) target bundleno = 3484 (0xd9c), region = 96 }
  0x1c   : > { %p611_p10 = scmp.lt.s32.totalorder %s5724_s21, 1  ;;  %v626_v0 = vld [vmem:[%s7893_s5] sm:$0xff]  ;;  %vm638_vm0 = vcmask 523264   ;;  %v7918_v1 = vmov 0.0   ;;  %s7947_s23 = sld [smem:[#allocation16_spill]]  ;;  %vm865_vm1 = vcmask 261120  }
  0x1d   : > { %4979 = vmatprep.mubr.msk.f32.mxu1 %vm638_vm0, %v626_v0  ;;  %942 = vmatprep.mubr.f32.mxu0 %v7918_v1  ;;  %s7948_s3 = sld [smem:[#allocation17_spill]]  ;;  %v853_v28 = vld [vmem:[%s7894_s6] sm:$0xff]  ;;  %v854_v34 = vld [vmem:[%s7894_s6 + $0x8] sm:$0xff]  ;;  %v628_v37 = vld [vmem:[%s7893_s5 + $0x10] sm:$0xff]  ;;  %s7950_s26 = sld [smem:[#allocation19_spill]]  ;;  %vm1521_vm2 = vcmask 867328  }
  0x1e   : > { %s612_s27 = scalar_select %p611_p10, %s5724_s21, 1  ;;  %v627_v35 = vld [vmem:[%s7893_s5 + $0x8] sm:$0xff]  ;;  %v855_v43 = vld [vmem:[%s7894_s6 + $0x10] sm:$0xff]  ;;  %v629_v44 = vld [vmem:[%s7893_s5 + $0x18] sm:$0xff]  ;;  %vm1576_vm3 = vcmask 556032   ;;  %vm1635_vm4 = vcmask 1039360  }
  0x1f   : > { %v856_v51 = vld [vmem:[%s7894_s6 + $0x18] sm:$0xff]  ;;  %s5590_s1 = smov 126   ;;  %s5591_s2 = smov 110   ;;  %vm1716_vm5 = vcmask 1031168   ;;  %vm1797_vm6 = vcmask 900096   ;;  %vm1878_vm7 = vcmask 891904  }
  0x20   : > { %s4785_s28 = sshll.u32 %s612_s27, 6  ;;  %s7926_s30 = smov 92   ;;  %vm1959_vm8 = vcmask 883712   ;;  %vm2040_vm9 = vcmask 752640   ;;  %vm2121_vm10 = vcmask 744448   ;;  %vm2202_vm11 = vcmask 736256  }
  0x21   : > { %s7924_s22 = smov 91   ;;  %s7922_s11 = smov 90   ;;  %vm1532_vm13 = vcmask 154624   ;;  %vm1537_vm14 = vcmask 868024   ;;  %vm3131_vm15 = vcmask 1047704  }
  0x22   : > { %s615_s24 = scalar_lea.vmem %s7947_s23, %s4785_s28  ;;  %s7928_s23 = smov 108  }
  0x23   : > { %s620_s29 = scalar_lea.vmem %s7948_s3, %s4785_s28  ;;  %v630_v2 = vld [vmem:[%s615_s24] sm:$0xff]  ;;  %v631_v3 = vld [vmem:[%s615_s24 + $0x8] sm:$0xff]  ;;  %v632_v4 = vld [vmem:[%s615_s24 + $0x10] sm:$0xff]  ;;  %s7949_s3 = sld [smem:[#allocation18_spill]] }
  0x24   : > { %v5041_v5 = vpack.c.bf16 %v631_v3, %v630_v2  ;;  %v633_v6 = vld [vmem:[%s615_s24 + $0x18] sm:$0xff]  ;;  %v634_v8 = vld [vmem:[%s615_s24 + $0x20] sm:$0xff]  ;;  %v635_v9 = vld [vmem:[%s615_s24 + $0x28] sm:$0xff]  ;;  %s5589_s28 = smov 127   ;;  %s5599_s27 = smov 19  }
  0x25   : > { %v5045_v7 = vpack.c.bf16 %v633_v6, %v632_v4  ;;  %v858_v10 = vld [vmem:[%s620_s29 + $0x8] sm:$0xff]  ;;  %v860_v11 = vld [vmem:[%s620_s29 + $0x18] sm:$0xff]  ;;  %v857_v12 = vld [vmem:[%s620_s29] sm:$0xff]  ;;  %v5049_v19 = vpack.c.bf16 %v635_v9, %v634_v8 }
  0x26   : > { %5042 = vmatprep.subr.bf16.mxu1 %v5041_v5  ;;  %v859_v13 = vld [vmem:[%s620_s29 + $0x10] sm:$0xff]  ;;  %v5073_v14 = vpack.c.bf16 %v860_v11, %v858_v10  ;;  %v862_v16 = vld [vmem:[%s620_s29 + $0x28] sm:$0xff]  ;;  %v864_v17 = vld [vmem:[%s620_s29 + $0x38] sm:$0xff] }
  0x27   : > { %5044 = vmatpush3.bf16.msra.mxu1 %v5041_v5  ;;  %v5075_v15 = vpack.c.bf16 %v859_v13, %v857_v12  ;;  %v861_v18 = vld [vmem:[%s620_s29 + $0x20] sm:$0xff]  ;;  %v5077_v20 = vpack.c.bf16 %v864_v17, %v862_v16  ;;  %v863_v21 = vld [vmem:[%s620_s29 + $0x30] sm:$0xff]  ;;  %v637_v23 = vld [vmem:[%s615_s24 + $0x38] sm:$0xff] }
  0x28   : > { %5046 = vmatprep.subr.bf16.mxu1 %v5045_v7  ;;  %v636_v22 = vld [vmem:[%s615_s24 + $0x30] sm:$0xff]  ;;  %5074 = vmatprep.subr.bf16.mxu0 %v5073_v14  ;;  %v5079_v24 = vpack.c.bf16 %v863_v21, %v861_v18  ;;  %s7932_s24 = smov 1  }
  0x29   : > { %5076 = vmatpush1.bf16.msra.mxu0 %v5075_v15  ;;  %v5053_v25 = vpack.c.bf16 %v637_v23, %v636_v22  ;;  %v737_v26 = vld [vmem:[%s7949_s3 + $0x8] sm:$0xff]  ;;  %v739_v27 = vld [vmem:[%s7949_s3 + $0x18] sm:$0xff]  ;;  %v736_v30 = vld [vmem:[%s7949_s3] sm:$0xff]  ;;  %v7916_v22 = vmov 0  }
  0x2a   : > { %5078 = vmatprep.subr.bf16.mxu0 %v5077_v20  ;;  %v5057_v29 = vpack.c.bf16 %v739_v27, %v737_v26  ;;  %v738_v31 = vld [vmem:[%s7949_s3 + $0x10] sm:$0xff]  ;;  %v741_v32 = vld [vmem:[%s7949_s3 + $0x28] sm:$0xff]  ;;  %v743_v33 = vld [vmem:[%s7949_s3 + $0x38] sm:$0xff]  ;;  %5490 = vset.pattern.permute.xlu1 %v7916_v22 }
  0x2b   : > { %5048 = vmatpush3.bf16.msra.mxu1 %v5045_v7  ;;  %v5059_v36 = vpack.c.bf16 %v738_v31, %v736_v30  ;;  %v5061_v38 = vpack.c.bf16 %v743_v33, %v741_v32  ;;  %v740_v39 = vld [vmem:[%s7949_s3 + $0x20] sm:$0xff]  ;;  %v742_v40 = vld [vmem:[%s7949_s3 + $0x30] sm:$0xff]  ;;  %v745_v41 = vld [vmem:[%s7949_s3 + $0x48] sm:$0xff]  ;;  %5489 = vset.pattern.permute.xlu0 %v7916_v22 }
  0x2c   : > { %5050 = vmatprep.subr.bf16.mxu1 %v5049_v19  ;;  %v747_v42 = vld [vmem:[%s7949_s3 + $0x58] sm:$0xff]  ;;  %v5063_v45 = vpack.c.bf16 %v742_v40, %v740_v39  ;;  %v744_v47 = vld [vmem:[%s7949_s3 + $0x40] sm:$0xff]  ;;  %v746_v48 = vld [vmem:[%s7949_s3 + $0x50] sm:$0xff] }
  0x2d   : > { %5080 = vmatpush1.bf16.msra.mxu0 %v5079_v24  ;;  %v5065_v46 = vpack.c.bf16 %v747_v42, %v745_v41  ;;  %v749_v49 = vld [vmem:[%s7949_s3 + $0x68] sm:$0xff]  ;;  %v751_v50 = vld [vmem:[%s7949_s3 + $0x78] sm:$0xff]  ;;  %v5067_v52 = vpack.c.bf16 %v746_v48, %v744_v47  ;;  %v748_v54 = vld [vmem:[%s7949_s3 + $0x60] sm:$0xff] }
  0x2e   : > { %v5069_v53 = vpack.c.bf16 %v751_v50, %v749_v49  ;;  %v750_v55 = vld [vmem:[%s7949_s3 + $0x70] sm:$0xff]  ;;  %v1104_v47 = vld [vmem:[%s7897_s9] sm:$0xff]  ;;  %s7930_s3 = smov 109  }
  0x2f   : > { %5052 = vmatpush3.bf16.msra.mxu1 %v5049_v19  ;;  %v5071_v56 = vpack.c.bf16 %v750_v55, %v748_v54  ;;  %v971_v48 = vld [vmem:[%s7896_s8] sm:$0xff]  ;;  %v1105_v54 = vld [vmem:[%s7897_s9 + $0x8] sm:$0xff]  ;;  %v1107_v55 = vld [vmem:[%s7897_s9 + $0x18] sm:$0xff] }
  0x30   : > { %5054 = vmatprep.subr.bf16.mxu1 %v5053_v25  ;;  %4754 = vmatmul.mubr.msk.f32.vlgmr.msra.gmra.mrb[0].mxu0 %vm865_vm1, %v853_v28  ;;  %v967_v49 = vld [vmem:[%s7895_s7] sm:$0xff] }
  0x31   : > { %948 = vmatprep.mubr.f32.mxu0 %v7918_v1  ;;  %v1108_v50 = vld [vmem:[%s7898_s10] sm:$0xff] }
  0x33   : > { %5056 = vmatpush3.bf16.msra.mxu1 %v5053_v25 }
  0x34   : > { %5058 = vmatprep.subr.bf16.mxu1 %v5057_v29  ;;  %4755 = vmatmul.mubr.msk.f32.gmra.mrb[2].mxu0 %vm865_vm1, %v854_v34 }
  0x35   : > { %954 = vmatprep.mubr.f32.mxu0 %v7918_v1 }
  0x36   : > { %4980 = vmatmul.mubr.msk.f32.vlgmr.msra.gmra.mrb[0].mxu1 %vm638_vm0, %v627_v35 }
  0x37   : > { %4982 = vmatprep.mubr.msk.f32.mxu1 %vm638_vm0, %v628_v37  ;;  %5060 = vmatpush1.bf16.msra.mxu1 %v5059_v36 }
  0x38   : > { %5062 = vmatprep.subr.bf16.mxu1 %v5061_v38  ;;  %4756 = vmatmul.mubr.msk.f32.gmra.mrb[4].mxu0 %vm865_vm1, %v855_v43 }
  0x39   : > { %960 = vmatprep.mubr.f32.mxu0 %v7918_v1 }
  0x3a   : > { %4983 = vmatmul.mubr.msk.f32.gmra.mrb[2].mxu1 %vm638_vm0, %v629_v44 }
  0x3b   : > { %5064 = vmatpush1.bf16.msra.mxu1 %v5063_v45  ;;  %828 = vmatprep.mubr.f32.mxu1 %v7918_v1 }
  0x3c   : > { %5066 = vmatprep.subr.bf16.mxu1 %v5065_v46  ;;  %4757 = vmatmul.mubr.msk.f32.gmra.mrb[6].mxu0 %vm865_vm1, %v856_v51  ;;  %v1106_v51 = vld [vmem:[%s7897_s9 + $0x10] sm:$0xff] }
  0x3f   : > { %5068 = vmatpush1.bf16.msra.mxu1 %v5067_v52  ;;  %v968_v52 = vld [vmem:[%s7895_s7 + $0x8] sm:$0xff] }
  0x40   : > { %5070 = vmatprep.subr.bf16.mxu1 %v5069_v53  ;;  %v1110_v53 = vld [vmem:[%s7898_s10 + $0x10] sm:$0xff] }
  0x43   : > { %5072 = vmatpush1.bf16.msra.mxu1 %v5071_v56  ;;  %v1111_v56 = vld [vmem:[%s7898_s10 + $0x18] sm:$0xff] }
 0x103   : > { %v5844_v57 = vpop.f32.mrb[0].mxu0 }
 0x104   : > { %v5846_v58 = vpop.f32.mrb[1].mxu0  ;;  %v987_v13 = vmul.f32 %v5844_v57, %v5844_v57 }
 0x105   : > { %v975_v59 = vadd.f32 %v5846_v58, %v5844_v57  ;;  %v988_v14 = vmul.f32 %v5846_v58, %v5846_v58 }
 0x107   : > { %976 = vadd.xlane.f32.xlu0 %v975_v59  ;;  %v5850_v60 = vpop.f32.mrb[2].mxu0  ;;  %v995_v17 = vadd.f32 %v988_v14, %v987_v13  ;;  %v1250_v59 = vld [vmem:[%s7950_s26 + $0x8] sm:$0xff]  ;;  %v1265_v14 = vld [vmem:[%s7950_s26 + $0x80] sm:$0xff] }
 0x108   : > { %v5852_v62 = vpop.f32.mrb[3].mxu0  ;;  %v989_v63 = vmul.f32 %v5850_v60, %v5850_v60  ;;  %v1262_v13 = vld [vmem:[%s7950_s26 + $0x68] sm:$0xff] }
 0x109   : > { %v4981_v61 = vpop.f32.mrb[0].mxu1  ;;  %v978_v2 = vadd.f32 %v5852_v62, %v5850_v60  ;;  %v990_v3 = vmul.f32 %v5852_v62, %v5852_v62  ;;  %996 = vadd.xlane.f32.xlu1 %v995_v17  ;;  %v1261_v17 = vld [vmem:[%s7950_s26 + $0x60] sm:$0xff] }
 0x10a   : > { %v717_v0 = vpop.f32.mrb[1].mxu1 }
 0x10b   : > { %4750 = vmatmul.mubr.msk.f32.vlgmr.msra.gmra.mrb[4].mxu1 %vm638_vm0, %v717_v0  ;;  %979 = vadd.xlane.f32.xlu0 %v978_v2  ;;  %v998_v4 = vadd.f32 %v990_v3, %v989_v63  ;;  %v5862_v5 = vpop.f32.mrb[4].mxu0  ;;  %v1249_v63 = vld [vmem:[%s7950_s26] sm:$0xff]  ;;  %v1252_v2 = vld [vmem:[%s7950_s26 + $0x18] sm:$0xff] }
 0x10c   : > { %834 = vmatprep.mubr.f32.mxu1 %v7918_v1  ;;  %v5864_v7 = vpop.f32.mrb[5].mxu0  ;;  %v991_v15 = vmul.f32 %v5862_v5, %v5862_v5  ;;  %v1256_v3 = vld [vmem:[%s7950_s26 + $0x38] sm:$0xff] }
 0x10d   : > { %v4984_v6 = vpop.f32.mrb[2].mxu1  ;;  %v981_v9 = vadd.f32 %v5864_v7, %v5862_v5  ;;  %v992_v16 = vmul.f32 %v5864_v7, %v5864_v7 }
 0x10e   : > { %v727_v8 = vpop.f32.mrb[3].mxu1 }
 0x10f   : > { %4751 = vmatmul.mubr.msk.f32.gmra.mrb[6].mxu1 %vm638_vm0, %v4981_v61  ;;  %999 = vadd.xlane.f32.xlu0 %v998_v4  ;;  %v5870_v10 = vpop.f32.mrb[6].mxu0  ;;  %v1001_v18 = vadd.f32 %v992_v16, %v991_v15  ;;  %v1253_v61 = vld [vmem:[%s7950_s26 + $0x20] sm:$0xff]  ;;  %v1259_v4 = vld [vmem:[%s7950_s26 + $0x50] sm:$0xff]  ;;  %v5089_v16 = vpack.c.bf16 %v1265_v14, %v1262_v13  ;;  %v1300_v13 = vld [vmem:[%s7950_s26 + $0x198] sm:$0xff] }
 0x110   : > { %840 = vmatprep.mubr.f32.mxu1 %v7918_v1  ;;  %v5872_v11 = vpop.f32.mrb[7].mxu0  ;;  %v993_v19 = vmul.f32 %v5870_v10, %v5870_v10  ;;  %v5081_v0 = vpack.c.bf16 %v1253_v61, %v1250_v59  ;;  %v1291_v61 = vld [vmem:[%s7950_s26 + $0x150] sm:$0xff] }
 0x111   : > { %v984_v12 = vadd.f32 %v5872_v11, %v5870_v10  ;;  %1002 = vadd.xlane.f32.xlu1 %v1001_v18  ;;  %v994_v20 = vmul.f32 %v5872_v11, %v5872_v11  ;;  %v1264_v18 = vld [vmem:[%s7950_s26 + $0x78] sm:$0xff] }
 0x112   : > { %5082 = vmatprep.subr.bf16.mxu1 %v5081_v0 }
 0x113   : > { %4752 = vmatmul.mubr.msk.f32.gmra.mrb[8].mxu1 %vm638_vm0, %v727_v8  ;;  %982 = vadd.xlane.f32.xlu0 %v981_v9  ;;  %v1004_v21 = vadd.f32 %v994_v20, %v993_v19  ;;  %v5085_v8 = vpack.c.bf16 %v1259_v4, %v1256_v3  ;;  %v1255_v9 = vld [vmem:[%s7950_s26 + $0x30] sm:$0xff]  ;;  %v1268_v19 = vld [vmem:[%s7950_s26 + $0x98] sm:$0xff]  ;;  %v1298_v3 = vld [vmem:[%s7950_s26 + $0x188] sm:$0xff] }
 0x114   : > { %846 = vmatprep.mubr.f32.mxu1 %v7918_v1  ;;  %v1271_v20 = vld [vmem:[%s7950_s26 + $0xb0] sm:$0xff]  ;;  %v1301_v4 = vld [vmem:[%s7950_s26 + $0x1a0] sm:$0xff] }
 0x117   : > { %4753 = vmatmul.mubr.msk.f32.gmra.mrb[10].mxu1 %vm638_vm0, %v4984_v6  ;;  %985 = vadd.xlane.f32.xlu0 %v984_v12  ;;  %v5083_v6 = vpack.c.bf16 %v1252_v2, %v1249_v63  ;;  %v1258_v12 = vld [vmem:[%s7950_s26 + $0x48] sm:$0xff]  ;;  %v969_v2 = vld [vmem:[%s7895_s7 + $0x10] sm:$0xff]  ;;  %vm3134_vm0 = vcmask 711680  }
 0x118   : > { %v5087_v15 = vpack.c.bf16 %v1258_v12, %v1255_v9  ;;  %v1294_v63 = vld [vmem:[%s7950_s26 + $0x168] sm:$0xff]  ;;  %v1297_v12 = vld [vmem:[%s7950_s26 + $0x180] sm:$0xff] }
 0x119   : > { %5084 = vmatpush1.bf16.msra.mxu1 %v5083_v6  ;;  %v5111_v0 = vpack.c.bf16 %v1294_v63, %v1291_v61  ;;  %v1299_v6 = vld [vmem:[%s7950_s26 + $0x190] sm:$0xff]  ;;  %v1302_v9 = vld [vmem:[%s7950_s26 + $0x1a8] sm:$0xff]  ;;  %v1320_v63 = vld [vmem:[%s7950_s26 + $0x238] sm:$0xff] }
 0x11a   : > { %5086 = vmatprep.subr.bf16.mxu1 %v5085_v8  ;;  %v5113_v8 = vpack.c.bf16 %v1301_v4, %v1298_v3  ;;  %v5145_v14 = vpack.c.bf16 %v1302_v9, %v1299_v6  ;;  %v1269_v6 = vld [vmem:[%s7950_s26 + $0xa0] sm:$0xff] }
 0x11c   : > { %5146 = vmatprep.subr.bf16.mxu0 %v5145_v14  ;;  %v1323_v14 = vld [vmem:[%s7950_s26 + $0x250] sm:$0xff] }
 0x11d   : > { %5088 = vmatpush1.bf16.msra.mxu1 %v5087_v15  ;;  %v5115_v15 = vpack.c.bf16 %v1300_v13, %v1297_v12  ;;  %v1322_v12 = vld [vmem:[%s7950_s26 + $0x248] sm:$0xff]  ;;  %v1325_v13 = vld [vmem:[%s7950_s26 + $0x260] sm:$0xff] }
 0x11e   : > { %5090 = vmatprep.subr.bf16.mxu1 %v5089_v16  ;;  %v1251_v16 = vld [vmem:[%s7950_s26 + $0x10] sm:$0xff] }
 0x1de   : > { %v5893_v23 = vpop.f32.mrb[4].mxu1 }
 0x1df   : > { %v5895_v24 = vpop.f32.mrb[5].mxu1  ;;  %v1124_v25 = vmul.f32 %v5893_v23, %v5893_v23 }
 0x1e0   : > { %v1112_v26 = vadd.f32 %v5895_v24, %v5893_v23  ;;  %v1125_v27 = vmul.f32 %v5895_v24, %v5895_v24 }
 0x1e2   : > { %1113 = vadd.xlane.f32.xlu1 %v1112_v26  ;;  %v5903_v28 = vpop.f32.mrb[6].mxu1  ;;  %v1132_v29 = vadd.f32 %v1125_v27, %v1124_v25  ;;  %v5093_v25 = vpack.c.bf16 %v1271_v20, %v1268_v19  ;;  %v1267_v26 = vld [vmem:[%s7950_s26 + $0x90] sm:$0xff]  ;;  %v1270_v27 = vld [vmem:[%s7950_s26 + $0xa8] sm:$0xff]  ;;  %v1304_v20 = vld [vmem:[%s7950_s26 + $0x1b8] sm:$0xff] }
 0x1e3   : > { %v5905_v30 = vpop.f32.mrb[7].mxu1  ;;  %v1126_v31 = vmul.f32 %v5903_v28, %v5903_v28  ;;  %v973_v19 = vld [vmem:[%s7896_s8 + $0x10] sm:$0xff] }
 0x1e4   : > { %1133 = vadd.xlane.f32.xlu0 %v1132_v29  ;;  %v1115_v32 = vadd.f32 %v5905_v30, %v5903_v28  ;;  %v1127_v33 = vmul.f32 %v5905_v30, %v5905_v30  ;;  %v1274_v29 = vld [vmem:[%s7950_s26 + $0xc8] sm:$0xff] }
 0x1e6   : > { %1116 = vadd.xlane.f32.xlu1 %v1115_v32  ;;  %v5913_v34 = vpop.f32.mrb[8].mxu1  ;;  %v1135_v35 = vadd.f32 %v1127_v33, %v1126_v31  ;;  %v1277_v31 = vld [vmem:[%s7950_s26 + $0xe0] sm:$0xff]  ;;  %v5095_v32 = vpack.c.bf16 %v1270_v27, %v1267_v26  ;;  %v1308_v27 = vld [vmem:[%s7950_s26 + $0x1d8] sm:$0xff] }
 0x1e7   : > { %v5915_v36 = vpop.f32.mrb[9].mxu1  ;;  %v1128_v37 = vmul.f32 %v5913_v34, %v5913_v34  ;;  %v5097_v33 = vpack.c.bf16 %v1277_v31, %v1274_v29  ;;  %v1303_v29 = vld [vmem:[%s7950_s26 + $0x1b0] sm:$0xff]  ;;  %v1306_v31 = vld [vmem:[%s7950_s26 + $0x1c8] sm:$0xff] }
 0x1e8   : > { %v1118_v38 = vadd.f32 %v5915_v36, %v5913_v34  ;;  %v1129_v39 = vmul.f32 %v5915_v36, %v5915_v36 }
 0x1ea   : > { %1136 = vadd.xlane.f32.xlu1 %v1135_v35  ;;  %v5923_v40 = vpop.f32.mrb[10].mxu1  ;;  %v1138_v41 = vadd.f32 %v1129_v39, %v1128_v37  ;;  %v1273_v35 = vld [vmem:[%s7950_s26 + $0xc0] sm:$0xff]  ;;  %v1276_v37 = vld [vmem:[%s7950_s26 + $0xd8] sm:$0xff]  ;;  %v1283_v39 = vld [vmem:[%s7950_s26 + $0x110] sm:$0xff] }
 0x1eb   : > { %v5925_v42 = vpop.f32.mrb[11].mxu1  ;;  %v1130_v43 = vmul.f32 %v5923_v40, %v5923_v40 }
 0x1ec   : > { %v1121_v44 = vadd.f32 %v5925_v42, %v5923_v40  ;;  %v1131_v45 = vmul.f32 %v5925_v42, %v5925_v42 }
 0x1ee   : > { %1119 = vadd.xlane.f32.xlu1 %v1118_v38  ;;  %1122 = vadd.xlane.f32.xlu0 %v1121_v44  ;;  %v5933_v46 = vadd.f32 %v1131_v45, %v1130_v43  ;;  %v1280_v38 = vld [vmem:[%s7950_s26 + $0xf8] sm:$0xff]  ;;  %v1279_v44 = vld [vmem:[%s7950_s26 + $0xf0] sm:$0xff]  ;;  %v1282_v45 = vld [vmem:[%s7950_s26 + $0x108] sm:$0xff] }
 0x1ef   : > { %v5101_v43 = vpack.c.bf16 %v1283_v39, %v1280_v38  ;;  %v970_v38 = vld [vmem:[%s7895_s7 + $0x18] sm:$0xff] }
 0x1f2   : > { %1139 = vadd.xlane.f32.xlu1 %v1138_v41  ;;  %1005 = vadd.xlane.f32.xlu0 %v1004_v21  ;;  %v5091_v21 = vpack.c.bf16 %v1264_v18, %v1261_v17  ;;  %v5099_v41 = vpack.c.bf16 %v1276_v37, %v1273_v35  ;;  %v1254_v17 = vld [vmem:[%s7950_s26 + $0x28] sm:$0xff]  ;;  %v1257_v35 = vld [vmem:[%s7950_s26 + $0x40] sm:$0xff]  ;;  %v1260_v37 = vld [vmem:[%s7950_s26 + $0x58] sm:$0xff] }
 0x1f3   : > { %v5147_v18 = vpack.c.bf16 %v1254_v17, %v1251_v16  ;;  %v5151_v39 = vpack.c.bf16 %v1260_v37, %v1257_v35  ;;  %v1326_v16 = vld [vmem:[%s7950_s26 + $0x268] sm:$0xff]  ;;  %v1321_v17 = vld [vmem:[%s7950_s26 + $0x240] sm:$0xff]  ;;  %v1327_v35 = vld [vmem:[%s7950_s26 + $0x270] sm:$0xff] }
 0x1f4   : > { %5092 = vmatpush1.bf16.msra.mxu1 %v5091_v21  ;;  %v1307_v21 = vld [vmem:[%s7950_s26 + $0x1d0] sm:$0xff]  ;;  %v1330_v37 = vld [vmem:[%s7950_s26 + $0x288] sm:$0xff] }
 0x1f5   : > { %5094 = vmatprep.subr.bf16.mxu1 %v5093_v25  ;;  %5148 = vmatpush3.bf16.msra.mxu0 %v5147_v18  ;;  %v1305_v25 = vld [vmem:[%s7950_s26 + $0x1c0] sm:$0xff]  ;;  %v5117_v26 = vpack.c.bf16 %v1307_v21, %v1304_v20  ;;  %v1324_v18 = vld [vmem:[%s7950_s26 + $0x258] sm:$0xff]  ;;  %v1275_v21 = vld [vmem:[%s7950_s26 + $0xd0] sm:$0xff] }
 0x1f6   : > { %v5131_v20 = vpack.c.bf16 %v1324_v18, %v1321_v17 }
 0x1f8   : > { %5096 = vmatpush1.bf16.msra.mxu1 %v5095_v32  ;;  %v5149_v32 = vpack.c.bf16 %v1308_v27, %v1305_v25  ;;  %v1278_v25 = vld [vmem:[%s7950_s26 + $0xe8] sm:$0xff]  ;;  %v1328_v27 = vld [vmem:[%s7950_s26 + $0x278] sm:$0xff] }
 0x1f9   : > { %5098 = vmatprep.subr.bf16.mxu1 %v5097_v33  ;;  %v5119_v33 = vpack.c.bf16 %v1306_v31, %v1303_v29  ;;  %v1331_v29 = vld [vmem:[%s7950_s26 + $0x290] sm:$0xff]  ;;  %v1329_v31 = vld [vmem:[%s7950_s26 + $0x280] sm:$0xff] }
 0x1fa   : > { %5150 = vmatprep.subr.bf16.mxu0 %v5149_v32  ;;  %v5133_v32 = vpack.c.bf16 %v1331_v29, %v1328_v27 }
 0x1fb   : > { %5152 = vmatpush3.bf16.msra.mxu0 %v5151_v39  ;;  %v5135_v39 = vpack.c.bf16 %v1330_v37, %v1327_v35 }
 0x1fc   : > { %5100 = vmatpush1.bf16.msra.mxu1 %v5099_v41  ;;  %v1310_v41 = vld [vmem:[%s7950_s26 + $0x1e8] sm:$0xff] }
 0x1fd   : > { %5102 = vmatprep.subr.bf16.mxu1 %v5101_v43  ;;  %v1313_v43 = vld [vmem:[%s7950_s26 + $0x200] sm:$0xff] }
 0x203   : > { %1187 = vperm.xlu1 %5490, %v1104_v47   ;;  %v5103_v47 = vpack.c.bf16 %v1282_v45, %v1279_v44  ;;  %v1311_v44 = vld [vmem:[%s7950_s26 + $0x1f0] sm:$0xff]  ;;  %v5121_v45 = vpack.c.bf16 %v1313_v43, %v1310_v41  ;;  %v1281_v41 = vld [vmem:[%s7950_s26 + $0x100] sm:$0xff]  ;;  %v1284_v43 = vld [vmem:[%s7950_s26 + $0x118] sm:$0xff] }
 0x205   : > { %5104 = vmatpush1.bf16.msra.mxu1 %v5103_v47  ;;  %v1314_v47 = vld [vmem:[%s7950_s26 + $0x208] sm:$0xff] }
 0x207   : > { %1078 = vperm.xlu1 %5490, %v971_v48   ;;  %v1286_v48 = vld [vmem:[%s7950_s26 + $0x128] sm:$0xff] }
 0x208   : > { %1050 = vperm.xlu0 %5489, %v967_v49   ;;  %v1289_v49 = vld [vmem:[%s7950_s26 + $0x140] sm:$0xff] }
 0x20b   : > { %1215 = vperm.xlu1 %5490, %v1108_v50   ;;  %v972_v50 = vld [vmem:[%s7896_s8 + $0x8] sm:$0xff] }
 0x20c   : > { %1197 = vperm.xlu0 %5489, %v1106_v51   ;;  %v5105_v51 = vpack.c.bf16 %v1289_v49, %v1286_v48  ;;  %v1309_v48 = vld [vmem:[%s7950_s26 + $0x1e0] sm:$0xff]  ;;  %v1312_v49 = vld [vmem:[%s7950_s26 + $0x1f8] sm:$0xff] }
 0x20e   : > { %5106 = vmatprep.subr.bf16.mxu1 %v5105_v51  ;;  %v5123_v51 = vpack.c.bf16 %v1312_v49, %v1309_v48  ;;  %v1335_v48 = vld [vmem:[%s7950_s26 + $0x2b0] sm:$0xff] }
 0x20f   : > { %1055 = vperm.xlu1 %5490, %v968_v52   ;;  %v1288_v52 = vld [vmem:[%s7950_s26 + $0x138] sm:$0xff] }
 0x210   : > { %1225 = vperm.xlu0 %5489, %v1110_v53  }
 0x213   : > { %1192 = vperm.xlu1 %5490, %v1105_v54   ;;  %v1292_v54 = vld [vmem:[%s7950_s26 + $0x158] sm:$0xff] }
 0x214   : > { %1202 = vperm.xlu0 %5489, %v1107_v55   ;;  %v1295_v55 = vld [vmem:[%s7950_s26 + $0x170] sm:$0xff] }
 0x215   : > { %v5109_v59 = vpack.c.bf16 %v1295_v55, %v1292_v54  ;;  %v1316_v55 = vld [vmem:[%s7950_s26 + $0x218] sm:$0xff] }
 0x218   : > { %1230 = vperm.xlu0 %5489, %v1111_v56   ;;  %v1109_v56 = vld [vmem:[%s7898_s10 + $0x8] sm:$0xff] }
 0x237   : > { %1142 = vadd.xlane.f32.xlu1 %v5933_v46  ;;  %v1285_v46 = vld [vmem:[%s7950_s26 + $0x120] sm:$0xff] }
 0x238   : > { %v5107_v53 = vpack.c.bf16 %v1288_v52, %v1285_v46  ;;  %v1263_v46 = vld [vmem:[%s7950_s26 + $0x70] sm:$0xff]  ;;  %v1266_v52 = vld [vmem:[%s7950_s26 + $0x88] sm:$0xff] }
 0x239   : > { %v5155_v54 = vpack.c.bf16 %v1266_v52, %v1263_v46  ;;  %v1336_v46 = vld [vmem:[%s7950_s26 + $0x2b8] sm:$0xff] }
 0x23a   : > { %5108 = vmatpush1.bf16.msra.mxu1 %v5107_v53  ;;  %v974_v53 = vld [vmem:[%s7896_s8 + $0x18] sm:$0xff] }
 0x23b   : > { %5110 = vmatprep.subr.bf16.mxu1 %v5109_v59  ;;  %v1317_v59 = vld [vmem:[%s7950_s26 + $0x220] sm:$0xff] }
 0x23c   : > { %v5157_v3 = vpack.c.bf16 %v1320_v63, %v1317_v59  ;;  %v1340_v59 = vld [vmem:[%s7950_s26 + $0x2d8] sm:$0xff]  ;;  %v1341_v63 = vld [vmem:[%s7950_s26 + $0x2e0] sm:$0xff] }
 0x23e   : > { %5112 = vmatpush1.bf16.msra.mxu1 %v5111_v0  ;;  %v1315_v0 = vld [vmem:[%s7950_s26 + $0x210] sm:$0xff] }
 0x23f   : > { %5114 = vmatprep.subr.bf16.mxu1 %v5113_v8  ;;  %v1272_v8 = vld [vmem:[%s7950_s26 + $0xb8] sm:$0xff] }
 0x240   : > { %v5159_v9 = vpack.c.bf16 %v1272_v8, %v1269_v6 }
 0x242   : > { %5116 = vmatpush1.bf16.msra.mxu1 %v5115_v15  ;;  %v5129_v15 = vpack.c.bf16 %v1325_v13, %v1322_v12  ;;  %v1296_v12 = vld [vmem:[%s7950_s26 + $0x178] sm:$0xff] }
 0x243   : > { %5118 = vmatprep.subr.bf16.mxu1 %v5117_v26  ;;  %v5163_v26 = vpack.c.bf16 %v1278_v25, %v1275_v21 }
 0x246   : > { %5120 = vmatpush1.bf16.msra.mxu1 %v5119_v33  ;;  %v1332_v33 = vld [vmem:[%s7950_s26 + $0x298] sm:$0xff] }
 0x247   : > { %5122 = vmatprep.subr.bf16.mxu1 %v5121_v45  ;;  %v1334_v45 = vld [vmem:[%s7950_s26 + $0x2a8] sm:$0xff] }
 0x248   : > { %1083 = vperm.xlu1 %5490, %v972_v50   ;;  %v5153_v50 = vpack.c.bf16 %v1314_v47, %v1311_v44  ;;  %v5167_v44 = vpack.c.bf16 %v1284_v43, %v1281_v41  ;;  %v1337_v47 = vld [vmem:[%s7950_s26 + $0x2c0] sm:$0xff] }
 0x249   : > { %v5137_v49 = vpack.c.bf16 %v1337_v47, %v1334_v45 }
 0x24a   : > { %5154 = vmatprep.subr.bf16.mxu0 %v5153_v50  ;;  %5124 = vmatpush1.bf16.msra.mxu1 %v5123_v51  ;;  %v1338_v50 = vld [vmem:[%s7950_s26 + $0x2c8] sm:$0xff]  ;;  %v1333_v51 = vld [vmem:[%s7950_s26 + $0x2a0] sm:$0xff] }
 0x24b   : > { %5156 = vmatpush3.bf16.msra.mxu0 %v5155_v54  ;;  %v5169_v52 = vpack.c.bf16 %v1338_v50, %v1335_v48  ;;  %v1287_v54 = vld [vmem:[%s7950_s26 + $0x130] sm:$0xff] }
 0x24c   : > { %1220 = vperm.xlu1 %5490, %v1109_v56   ;;  %v1319_v56 = vld [vmem:[%s7950_s26 + $0x230] sm:$0xff]  ;;  %5158 = vmatprep.subr.bf16.mxu0 %v5157_v3 }
 0x24d   : > { %v5125_v61 = vpack.c.bf16 %v1319_v56, %v1316_v55  ;;  %v1290_v55 = vld [vmem:[%s7950_s26 + $0x148] sm:$0xff]  ;;  %v1339_v3 = vld [vmem:[%s7950_s26 + $0x2d0] sm:$0xff] }
 0x24e   : > { %v5171_v56 = vpack.c.bf16 %v1290_v55, %v1287_v54 }
 0x24f   : > { %5126 = vmatprep.subr.bf16.mxu1 %v5125_v61  ;;  %5160 = vmatpush3.bf16.msra.mxu0 %v5159_v9  ;;  %v1343_v61 = vld [vmem:[%s7950_s26 + $0x2f0] sm:$0xff]  ;;  %v1293_v9 = vld [vmem:[%s7950_s26 + $0x160] sm:$0xff] }
 0x250   : > { %1060 = vperm.xlu1 %5490, %v969_v2   ;;  %v1318_v2 = vld [vmem:[%s7950_s26 + $0x228] sm:$0xff]  ;;  %v5175_v13 = vpack.c.bf16 %v1296_v12, %v1293_v9 }
 0x251   : > { %v5127_v4 = vpack.c.bf16 %v1318_v2, %v1315_v0  ;;  %v5141_v0 = vpack.c.bf16 %v1343_v61, %v1340_v59  ;;  %v1344_v2 = vld [vmem:[%s7950_s26 + $0x2f8] sm:$0xff] }
 0x252   : > { %v5173_v6 = vpack.c.bf16 %v1344_v2, %v1341_v63 }
 0x253   : > { %5128 = vmatpush1.bf16.msra.mxu1 %v5127_v4  ;;  %v1342_v4 = vld [vmem:[%s7950_s26 + $0x2e8] sm:$0xff] }
 0x254   : > { %1088 = vperm.xlu1 %5490, %v973_v19   ;;  %v5161_v19 = vpack.c.bf16 %v1326_v16, %v1323_v14  ;;  %5130 = vmatprep.subr.bf16.mxu1 %v5129_v15  ;;  %v5143_v8 = vpack.c.bf16 %v1342_v4, %v1339_v3  ;;  %v977_v14 = vpop.xlane.xlu0 %976  ;;  %v997_v16 = vpop.xlane.xlu1 %996 }
 0x256   : > { %5162 = vmatprep.subr.bf16.mxu0 %v5161_v19 }
 0x257   : > { %5132 = vmatpush1.bf16.msra.mxu1 %v5131_v20  ;;  %5164 = vmatpush3.bf16.msra.mxu0 %v5163_v26 }
 0x258   : > { %1065 = vperm.xlu1 %5490, %v970_v38   ;;  %v5165_v38 = vpack.c.bf16 %v1332_v33, %v1329_v31  ;;  %5134 = vmatprep.subr.bf16.mxu1 %v5133_v32  ;;  %v980_v15 = vpop.xlane.xlu0 %979  ;;  %v1003_v18 = vpop.xlane.xlu1 %1002 }
 0x259   : > { %v1007_v31 = vadd.f32 %v980_v15, %v977_v14 }
 0x25a   : > { %5166 = vmatprep.subr.bf16.mxu0 %v5165_v38 }
 0x25b   : > { %5136 = vmatpush1.bf16.msra.mxu1 %v5135_v39  ;;  %5168 = vmatpush3.bf16.msra.mxu0 %v5167_v44 }
 0x25c   : > { %1093 = vperm.xlu1 %5490, %v974_v53   ;;  %v5139_v53 = vpack.c.bf16 %v1336_v46, %v1333_v51  ;;  %5138 = vmatprep.subr.bf16.mxu1 %v5137_v49  ;;  %v1000_v17 = vpop.xlane.xlu0 %999 }
 0x25d   : > { %5170 = vmatprep.subr.bf16.mxu0 %v5169_v52  ;;  %v1017_v33 = vadd.f32 %v1000_v17, %v997_v16 }
 0x25f   : > { %5140 = vmatpush1.bf16.msra.mxu1 %v5139_v53  ;;  %5172 = vmatpush3.bf16.msra.mxu0 %v5171_v56  ;;  %v1018_v38 = vadd.f32 %v1017_v33, %v1003_v18 }
 0x260   : > { %5142 = vmatprep.subr.bf16.mxu1 %v5141_v0  ;;  %5174 = vmatprep.subr.bf16.mxu0 %v5173_v6  ;;  %v983_v20 = vpop.xlane.xlu0 %982 }
 0x261   : > { %v1008_v35 = vadd.f32 %v1007_v31, %v983_v20 }
 0x263   : > { %5144 = vmatpush1.bf16.msra.mxu1 %v5143_v8  ;;  %5176 = vmatpush3.bf16.msra.mxu0 %v5175_v13 }
 0x264   : > { %v986_v25 = vpop.xlane.xlu0 %985 }
 0x265   : > { %v1009_v41 = vadd.f32 %v1008_v35, %v986_v25 }
 0x267   : > { %v1010_v44 = vrot.slane %v1009_v41, 4 }
 0x269   : > { %v1011_v48 = vadd.f32 %v1010_v44, %v1009_v41 }
 0x26b   : > { %v1012_v46 = vrot.slane %v1011_v48, 2 }
 0x26d   : > { %v1013_v54 = vadd.f32 %v1012_v46, %v1011_v48 }
 0x26f   : > { %v1114_v19 = vpop.xlane.xlu1 %1113  ;;  %v1014_v61 = vrot.slane %v1013_v54, 1 }
 0x271   : > { %v1134_v26 = vpop.xlane.xlu0 %1133  ;;  %v1015_v3 = vadd.f32 %v1014_v61, %v1013_v54 }
 0x273   : > { %v1117_v21 = vpop.xlane.xlu1 %1116  ;;  %v1016_v8 = vmul.f32 0.00012207031, %v1015_v3 }
 0x274   : > { %v1144_v50 = vadd.f32 %v1117_v21, %v1114_v19 }
 0x275   : > { %v1027_v15 = vmul.f32 %v1016_v8, %v1016_v8  ;;  %v1032_v61 = vsub.f32 %v5850_v60, %v1016_v8 }
 0x277   : > { %v1137_v27 = vpop.xlane.xlu1 %1136 }
 0x278   : > { %v1154_v14 = vadd.f32 %v1137_v27, %v1134_v26 }
 0x27b   : > { %v1123_v29 = vpop.xlane.xlu0 %1122  ;;  %v1120_v32 = vpop.xlane.xlu1 %1119 }
 0x27c   : > { %v1145_v52 = vadd.f32 %v1144_v50, %v1120_v32 }
 0x27e   : > { %v1146_v55 = vadd.f32 %v1145_v52, %v1123_v29 }
 0x27f   : > { %v1006_v37 = vpop.xlane.xlu0 %1005  ;;  %v1140_v39 = vpop.xlane.xlu1 %1139 }
 0x280   : > { %v1019_v43 = vadd.f32 %v1018_v38, %v1006_v37  ;;  %v1147_v63 = vrot.slane %v1146_v55, 4  ;;  %v1155_v17 = vadd.f32 %v1154_v14, %v1140_v39 }
 0x282   : > { %v1020_v45 = vrot.slane %v1019_v43, 4  ;;  %v1148_v4 = vadd.f32 %v1147_v63, %v1146_v55  ;;  %v1030_v55 = vsub.f32 %v5844_v57, %v1016_v8  ;;  %v1033_v63 = vsub.f32 %v5852_v62, %v1016_v8 }
 0x283   : > { %v6272_v47 = vpop.permute.xlu1 %1187  ;;  %v1037_v57 = vsub.f32 %v5872_v11, %v1016_v8 }
 0x284   : > { %v1021_v49 = vadd.f32 %v1020_v45, %v1019_v43  ;;  %v1149_v9 = vrot.slane %v1148_v4, 2 }
 0x286   : > { %v1022_v53 = vrot.slane %v1021_v49, 2  ;;  %v1150_v16 = vadd.f32 %v1149_v9, %v1148_v4  ;;  %v1035_v9 = vsub.f32 %v5864_v7, %v1016_v8 }
 0x287   : > { %v6274_v51 = vpop.permute.xlu1 %1078  ;;  %v1051_v48 = vpop.permute.xlu0 %1050 }
 0x288   : > { %v1023_v56 = vadd.f32 %v1022_v53, %v1021_v49  ;;  %v1151_v21 = vrot.slane %v1150_v16, 1 }
 0x28a   : > { %v1024_v0 = vrot.slane %v1023_v56, 1  ;;  %v1152_v33 = vadd.f32 %v1151_v21, %v1150_v16 }
 0x28b   : > { %v6276_v59 = vpop.permute.xlu1 %1215  ;;  %v1198_v52 = vpop.permute.xlu0 %1197 }
 0x28c   : > { %v1025_v6 = vadd.f32 %v1024_v0, %v1023_v56  ;;  %v6284_v43 = vmul.f32 0.00012207031, %v1152_v33  ;;  %v1031_v56 = vsub.f32 %v5846_v58, %v1016_v8 }
 0x28e   : > { %v1026_v12 = vmul.f32 0.00012207031, %v1025_v6  ;;  %v1164_v45 = vmul.f32 %v6284_v43, %v6284_v43  ;;  %v1034_v6 = vsub.f32 %v5862_v5, %v1016_v8  ;;  %v1169_v58 = vsub.f32 %v5903_v28, %v6284_v43 }
 0x28f   : > { %v6278_v2 = vpop.permute.xlu1 %1055  ;;  %v1226_v16 = vpop.permute.xlu0 %1225  ;;  %v1170_v60 = vsub.f32 %v5905_v30, %v6284_v43  ;;  %v1171_v62 = vsub.f32 %v5913_v34, %v6284_v43  ;;  %v1172_v5 = vsub.f32 %v5915_v36, %v6284_v43  ;;  %v1174_v11 = vsub.f32 %v5925_v42, %v6284_v43 }
 0x290   : > { %v1028_v18 = vsub.f32 %v1026_v12, %v1027_v15  ;;  %v1036_v15 = vsub.f32 %v5870_v10, %v1016_v8  ;;  %v1173_v10 = vsub.f32 %v5923_v40, %v6284_v43  ;;  %v1168_v36 = vsub.f32 %v5895_v24, %v6284_v43 }
 0x291   : > { %v1167_v21 = vsub.f32 %v5893_v23, %v6284_v43 }
 0x292   : > { %v1029_v25 = vmax.f32 %v1028_v18, 0.0 }
 0x293   : > { %v6280_v13 = vpop.permute.xlu1 %1192 }
 0x294   : > { %v1038_v35 = vadd.f32 1e-05, %v1029_v25 }
 0x296   : > { %5499 = vrsqrt.f32 %v1038_v35 }
 0x2a0   : > { %v5500_v53 = vpop.eup %5499 }
 0x2a1   : > { %v1040_v0 = vmul.f32 %v5500_v53, %v1030_v55  ;;  %v1041_v3 = vmul.f32 %v5500_v53, %v1031_v56  ;;  %v1042_v12 = vmul.f32 %v5500_v53, %v1032_v61  ;;  %v1043_v14 = vmul.f32 %v5500_v53, %v1033_v63 }
 0x2a2   : > { %v1044_v8 = vmul.f32 %v5500_v53, %v1034_v6  ;;  %v1045_v18 = vmul.f32 %v5500_v53, %v1035_v9  ;;  %v1046_v28 = vmul.f32 %v5500_v53, %v1036_v15 }
 0x2a3   : > { %v1068_v7 = vmul.f32 %v1051_v48, %v1040_v0  ;;  %v1070_v30 = vmul.f32 %v6278_v2, %v1042_v12 }
 0x2a5   : > { %v1096_v42 = vadd.f32 %v6274_v51, %v1068_v7 }
 0x2c4   : > { %v1143_v19 = vpop.xlane.xlu1 %1142 }
 0x2c5   : > { %v1156_v20 = vadd.f32 %v1155_v17, %v1143_v19  ;;  %v1069_v17 = vmul.f32 %v1051_v48, %v1041_v3  ;;  %v1047_v19 = vmul.f32 %v5500_v53, %v1037_v57 }
 0x2c7   : > { %v1157_v29 = vrot.slane %v1156_v20, 4  ;;  %v1097_v33 = vadd.f32 %v6274_v51, %v1069_v17 }
 0x2c8   : > { %v1084_v31 = vpop.permute.xlu1 %1083 }
 0x2c9   : > { %v1158_v32 = vadd.f32 %v1157_v29, %v1156_v20  ;;  %v1071_v20 = vmul.f32 %v6278_v2, %v1043_v14  ;;  %v1098_v35 = vadd.f32 %v1084_v31, %v1070_v30 }
 0x2cb   : > { %v1159_v37 = vrot.slane %v1158_v32, 2 }
 0x2cc   : > { %v6282_v38 = vpop.permute.xlu1 %1220 }
 0x2cd   : > { %v1160_v41 = vadd.f32 %v1159_v37, %v1158_v32  ;;  %v1099_v37 = vadd.f32 %v1084_v31, %v1071_v20 }
 0x2cf   : > { %v1161_v26 = vrot.slane %v1160_v41, 1 }
 0x2d0   : > { %v1061_v27 = vpop.permute.xlu1 %1060 }
 0x2d1   : > { %v1162_v39 = vadd.f32 %v1161_v26, %v1160_v41  ;;  %v1072_v25 = vmul.f32 %v1061_v27, %v1044_v8  ;;  %v1073_v40 = vmul.f32 %v1061_v27, %v1045_v18  ;;  %v1203_v41 = vpop.permute.xlu0 %1202 }
 0x2d3   : > { %v1163_v44 = vmul.f32 0.00012207031, %v1162_v39 }
 0x2d4   : > { %v1089_v50 = vpop.permute.xlu1 %1088 }
 0x2d5   : > { %v1165_v49 = vsub.f32 %v1163_v44, %v1164_v45  ;;  %v1100_v2 = vadd.f32 %v1089_v50, %v1072_v25  ;;  %v1101_v39 = vadd.f32 %v1089_v50, %v1073_v40  ;;  %v1231_v9 = vpop.permute.xlu0 %1230 }
 0x2d7   : > { %v1166_v46 = vmax.f32 %v1165_v49, 0.0 }
 0x2d8   : > { %v1066_v4 = vpop.permute.xlu1 %1065 }
 0x2d9   : > { %v1175_v54 = vadd.f32 1e-05, %v1166_v46  ;;  %v1074_v29 = vmul.f32 %v1066_v4, %v1046_v28  ;;  %v1075_v32 = vmul.f32 %v1066_v4, %v1047_v19 }
 0x2db   : > { %5501 = vrsqrt.f32 %v1175_v54 }
 0x2dc   : > { %v1094_v34 = vpop.permute.xlu1 %1093 }
 0x2dd   : > { %v1102_v44 = vadd.f32 %v1094_v34, %v1074_v29  ;;  %v1103_v45 = vadd.f32 %v1094_v34, %v1075_v32 }
 0x2e5   : > { %v5502_v26 = vpop.eup %5501 }
 0x2e6   : > { %v1179_v24 = vmul.f32 %v5502_v26, %v1169_v58  ;;  %v1180_v48 = vmul.f32 %v5502_v26, %v1170_v60  ;;  %v1181_v49 = vmul.f32 %v5502_v26, %v1171_v62  ;;  %v1182_v23 = vmul.f32 %v5502_v26, %v1172_v5 }
 0x2e7   : > { %v1183_v43 = vmul.f32 %v5502_v26, %v1173_v10  ;;  %v1184_v27 = vmul.f32 %v5502_v26, %v1174_v11  ;;  %v1178_v46 = vmul.f32 %v5502_v26, %v1168_v36  ;;  %v1177_v53 = vmul.f32 %v5502_v26, %v1167_v21 }
 0x2e8   : > { %v1207_v54 = vmul.f32 %v6280_v13, %v1179_v24  ;;  %v1208_v51 = vmul.f32 %v6280_v13, %v1180_v48  ;;  %v1209_v55 = vmul.f32 %v1198_v52, %v1181_v49  ;;  %v1210_v31 = vmul.f32 %v1198_v52, %v1182_v23 }
 0x2e9   : > { %v1211_v56 = vmul.f32 %v1203_v41, %v1183_v43  ;;  %v1212_v61 = vmul.f32 %v1203_v41, %v1184_v27  ;;  %v1206_v50 = vmul.f32 %v6272_v47, %v1178_v46  ;;  %v1205_v63 = vmul.f32 %v6272_v47, %v1177_v53 }
 0x2ea   : > { %v1235_v0 = vadd.f32 %v6282_v38, %v1207_v54  ;;  %v1236_v3 = vadd.f32 %v6282_v38, %v1208_v51  ;;  %v1237_v4 = vadd.f32 %v1226_v16, %v1209_v55  ;;  %v1238_v6 = vadd.f32 %v1226_v16, %v1210_v31 }
 0x2eb   : > { %v1239_v12 = vadd.f32 %v1231_v9, %v1211_v56  ;;  %v1240_v14 = vadd.f32 %v1231_v9, %v1212_v61  ;;  %v1234_v15 = vadd.f32 %v6276_v59, %v1206_v50  ;;  %v1233_v13 = vadd.f32 %v6276_v59, %v1205_v63 }
 0x2ec   : > { %v1244_v52 = vadd.f32 %v1236_v3, %v1099_v37  ;;  %v1243_v57 = vadd.f32 %v1235_v0, %v1098_v35  ;;  %v1246_v58 = vadd.f32 %v1238_v6, %v1101_v39  ;;  %v1245_v60 = vadd.f32 %v1237_v4, %v1100_v2 }
 0x2ed   : > { %v1242_v62 = vadd.f32 %v1234_v15, %v1097_v33  ;;  %v1241_v5 = vadd.f32 %v1233_v13, %v1096_v42  ;;  %v1248_v47 = vadd.f32 %v1240_v14, %v1103_v45  ;;  %v1247_v7 = vadd.f32 %v1239_v12, %v1102_v44 }
 0x2ef   : > { %1409 = vmatprep.mubr.f32.mxu1 %v1242_v62  ;;  %1498 = vmatprep.mubr.f32.mxu0 %v1242_v62 }
 0x2f0   : > { %1410 = vmatmul.mubr.f32.vlgmr.msra.gmra.mrb[12].mxu1 %v1241_v5  ;;  %1499 = vmatmul.mubr.f32.vlgmr.msra.gmra.mrb[8].mxu0 %v1241_v5 }
 0x2f1   : > { %1415 = vmatprep.mubr.f32.mxu1 %v1244_v52  ;;  %1503 = vmatprep.mubr.f32.mxu0 %v1244_v52 }
 0x2f4   : > { %1416 = vmatmul.mubr.f32.gmra.mrb[14].mxu1 %v1243_v57  ;;  %1504 = vmatmul.mubr.f32.gmra.mrb[10].mxu0 %v1243_v57 }
 0x2f5   : > { %1421 = vmatprep.mubr.f32.mxu1 %v1246_v58  ;;  %1508 = vmatprep.mubr.f32.mxu0 %v1246_v58 }
 0x2f8   : > { %1422 = vmatmul.mubr.f32.gmra.mrb[16].mxu1 %v1245_v60  ;;  %1509 = vmatmul.mubr.f32.gmra.mrb[12].mxu0 %v1245_v60 }
 0x2f9   : > { %1427 = vmatprep.mubr.f32.mxu1 %v1248_v47  ;;  %1513 = vmatprep.mubr.f32.mxu0 %v1248_v47 }
 0x2fc   : > { %1428 = vmatmul.mubr.f32.gmra.mrb[18].mxu1 %v1247_v7  ;;  %1514 = vmatmul.mubr.f32.gmra.mrb[14].mxu0 %v1247_v7 }
 0x3c3   : > { %v6324_v59 = vpop.f32.mrb[12].mxu1  ;;  %v4831_v38 = vpop.f32.mrb[8].mxu0 }
 0x3c4   : > { %v6326_v16 = vpop.f32.mrb[13].mxu1  ;;  %v4832_v17 = vpop.f32.mrb[9].mxu0  ;;  %1611 = vrot.lane.b32.xlu1 %v6324_v59, %s5589_s28 }
 0x3c5   : > { %v4833_v10 = vadd.f32 %v4832_v17, %v4831_v38  ;;  %v1543_v38 = vld [vmem:[%s7900_s12 + $0x8] sm:$0xff] }
 0x3c6   : > { %2597 = vmatprep.mubr.f32.mxu1 %v1543_v38  ;;  %2419 = vmatprep.mubr.f32.mxu0 %v1543_v38 }
 0x3c7   : > { %1522 = vst.msk [vmem:[#allocation2 + $0x10] sm:$0xff] %vm1521_vm2, %v4833_v10  ;;  %v6331_v11 = vpop.f32.mrb[14].mxu1  ;;  %v4834_v8 = vpop.f32.mrb[10].mxu0 }
 0x3c8   : > { %v6333_v18 = vpop.f32.mrb[15].mxu1  ;;  %v4835_v28 = vpop.f32.mrb[11].mxu0  ;;  %1692 = vrot.lane.b32.xlu1 %v6324_v59, %s5590_s1  ;;  %v5179_v19 = vpack.c.bf16 %v6331_v11, %v6324_v59 }
 0x3c9   : > { %v4836_v30 = vadd.f32 %v4835_v28, %v4834_v8  ;;  %v5177_v20 = vpack.c.bf16 %v6333_v18, %v6326_v16 }
 0x3cb   : > { %1525 = vst.msk [vmem:[#allocation2 + $0x28] sm:$0xff] %vm1521_vm2, %v4836_v30  ;;  %v6342_v34 = vpop.f32.mrb[16].mxu1  ;;  %v4837_v36 = vpop.f32.mrb[12].mxu0  ;;  %5178 = vmatprep.subr.bf16.mxu0 %v5177_v20 }
 0x3cc   : > { %v6344_v21 = vpop.f32.mrb[17].mxu1  ;;  %v4838_v25 = vpop.f32.mrb[13].mxu0  ;;  %1773 = vrot.lane.b32.xlu1 %v6324_v59, %s5591_s2  ;;  %5180 = vmatpush1.bf16.msra.mxu0 %v5179_v19 }
 0x3cd   : > { %v4839_v40 = vadd.f32 %v4838_v25, %v4837_v36 }
 0x3ce   : > { %v6348_v29 = vld [vmem:[#allocation2 + $0x10] sm:$0xff] }
 0x3cf   : > { %1577 = vst.msk [vmem:[#allocation4 + $0x10] sm:$0xff] %vm1576_vm3, %v6348_v29  ;;  %1615 = vrot.lane.b32.xlu0 %v6348_v29, %s5589_s28  ;;  %v6355_v32 = vpop.f32.mrb[18].mxu1  ;;  %v4840_v42 = vpop.f32.mrb[14].mxu0 }
 0x3d0   : > { %1528 = vst.msk [vmem:[#allocation2 + $0x40] sm:$0xff] %vm1521_vm2, %v4839_v40  ;;  %v6357_v33 = vpop.f32.mrb[19].mxu1  ;;  %v4841_v35 = vpop.f32.mrb[15].mxu0  ;;  %1854 = vrot.lane.b32.xlu1 %v6324_v59, %s7930_s3  ;;  %v5183_v37 = vpack.c.bf16 %v6355_v32, %v6342_v34 }
 0x3d1   : > { %v4842_v41 = vadd.f32 %v4841_v35, %v4840_v42  ;;  %v5181_v26 = vpack.c.bf16 %v6357_v33, %v6344_v21 }
 0x3d2   : > { %v6365_v2 = vld [vmem:[#allocation2 + $0x28] sm:$0xff] }
 0x3d3   : > { %1580 = vst.msk [vmem:[#allocation4 + $0x28] sm:$0xff] %vm1576_vm3, %v6365_v2  ;;  %1696 = vrot.lane.b32.xlu0 %v6348_v29, %s5590_s1  ;;  %5182 = vmatprep.subr.bf16.mxu0 %v5181_v26 }
 0x3d4   : > { %1531 = vst.msk [vmem:[#allocation2 + $0x58] sm:$0xff] %vm1521_vm2, %v4842_v41  ;;  %1935 = vrot.lane.b32.xlu1 %v6324_v59, %s7928_s23  ;;  %5184 = vmatpush1.bf16.msra.mxu0 %v5183_v37 }
 0x3d7   : > { %v6374_v39 = vld [vmem:[#allocation2 + $0x40] sm:$0xff]  ;;  %1777 = vrot.lane.b32.xlu0 %v6348_v29, %s5591_s2 }
 0x3d8   : > { %1583 = vst.msk [vmem:[#allocation4 + $0x40] sm:$0xff] %vm1576_vm3, %v6374_v39  ;;  %2016 = vrot.lane.b32.xlu1 %v6324_v59, %s7926_s30 }
 0x3da   : > { %v2240_v20 = vld [vmem:[#allocation4 + $0x28] sm:$0xff] }
 0x3db   : > { %v6382_v44 = vld [vmem:[#allocation2 + $0x58] sm:$0xff]  ;;  %1858 = vrot.lane.b32.xlu0 %v6348_v29, %s7930_s3 }
 0x3dc   : > { %1586 = vst.msk [vmem:[#allocation4 + $0x58] sm:$0xff] %vm1576_vm3, %v6382_v44  ;;  %1613 = vrot.lane.b32.xlu1 %v6326_v16, %s5589_s28 }
 0x3df   : > { %1939 = vrot.lane.b32.xlu0 %v6348_v29, %s7928_s23 }
 0x3e0   : > { %1694 = vrot.lane.b32.xlu1 %v6326_v16, %s5590_s1 }
 0x3e3   : > { %2020 = vrot.lane.b32.xlu0 %v6348_v29, %s7926_s30 }
 0x3e4   : > { %1775 = vrot.lane.b32.xlu1 %v6326_v16, %s5591_s2 }
 0x3e7   : > { %1617 = vrot.lane.b32.xlu0 %v6331_v11, %s5589_s28 }
 0x3e8   : > { %1856 = vrot.lane.b32.xlu1 %v6326_v16, %s7930_s3 }
 0x3eb   : > { %1698 = vrot.lane.b32.xlu0 %v6331_v11, %s5590_s1 }
 0x3ec   : > { %1937 = vrot.lane.b32.xlu1 %v6326_v16, %s7928_s23 }
 0x3ef   : > { %1779 = vrot.lane.b32.xlu0 %v6331_v11, %s5591_s2 }
 0x3f0   : > { %2018 = vrot.lane.b32.xlu1 %v6326_v16, %s7926_s30 }
 0x3f3   : > { %1860 = vrot.lane.b32.xlu0 %v6331_v11, %s7930_s3 }
 0x3f4   : > { %1619 = vrot.lane.b32.xlu1 %v6333_v18, %s5589_s28 }
 0x3f7   : > { %1941 = vrot.lane.b32.xlu0 %v6331_v11, %s7928_s23 }
 0x3f8   : > { %1700 = vrot.lane.b32.xlu1 %v6333_v18, %s5590_s1 }
 0x3fb   : > { %2022 = vrot.lane.b32.xlu0 %v6331_v11, %s7926_s30 }
 0x3fc   : > { %1781 = vrot.lane.b32.xlu1 %v6333_v18, %s5591_s2 }
 0x3ff   : > { %1621 = vrot.lane.b32.xlu0 %v6365_v2, %s5589_s28 }
 0x400   : > { %1862 = vrot.lane.b32.xlu1 %v6333_v18, %s7930_s3 }
 0x403   : > { %1702 = vrot.lane.b32.xlu0 %v6365_v2, %s5590_s1 }
 0x404   : > { %1943 = vrot.lane.b32.xlu1 %v6333_v18, %s7928_s23 }
 0x407   : > { %1783 = vrot.lane.b32.xlu0 %v6365_v2, %s5591_s2 }
 0x408   : > { %2024 = vrot.lane.b32.xlu1 %v6333_v18, %s7926_s30 }
 0x40b   : > { %1864 = vrot.lane.b32.xlu0 %v6365_v2, %s7930_s3 }
 0x40c   : > { %1623 = vrot.lane.b32.xlu1 %v6342_v34, %s5589_s28 }
 0x40f   : > { %1945 = vrot.lane.b32.xlu0 %v6365_v2, %s7928_s23 }
 0x410   : > { %1704 = vrot.lane.b32.xlu1 %v6342_v34, %s5590_s1 }
 0x413   : > { %2026 = vrot.lane.b32.xlu0 %v6365_v2, %s7926_s30 }
 0x414   : > { %1785 = vrot.lane.b32.xlu1 %v6342_v34, %s5591_s2 }
 0x417   : > { %1627 = vrot.lane.b32.xlu0 %v6374_v39, %s5589_s28 }
 0x418   : > { %1866 = vrot.lane.b32.xlu1 %v6342_v34, %s7930_s3 }
 0x41b   : > { %1708 = vrot.lane.b32.xlu0 %v6374_v39, %s5590_s1 }
 0x41c   : > { %1947 = vrot.lane.b32.xlu1 %v6342_v34, %s7928_s23 }
 0x41f   : > { %1789 = vrot.lane.b32.xlu0 %v6374_v39, %s5591_s2 }
 0x420   : > { %2028 = vrot.lane.b32.xlu1 %v6342_v34, %s7926_s30 }
 0x423   : > { %1870 = vrot.lane.b32.xlu0 %v6374_v39, %s7930_s3 }
 0x424   : > { %1625 = vrot.lane.b32.xlu1 %v6344_v21, %s5589_s28 }
 0x427   : > { %1951 = vrot.lane.b32.xlu0 %v6374_v39, %s7928_s23 }
 0x428   : > { %1706 = vrot.lane.b32.xlu1 %v6344_v21, %s5590_s1 }
 0x42b   : > { %2032 = vrot.lane.b32.xlu0 %v6374_v39, %s7926_s30 }
 0x42c   : > { %1787 = vrot.lane.b32.xlu1 %v6344_v21, %s5591_s2 }
 0x42f   : > { %1629 = vrot.lane.b32.xlu0 %v6355_v32, %s5589_s28 }
 0x430   : > { %1868 = vrot.lane.b32.xlu1 %v6344_v21, %s7930_s3 }
 0x433   : > { %1710 = vrot.lane.b32.xlu0 %v6355_v32, %s5590_s1 }
 0x434   : > { %1949 = vrot.lane.b32.xlu1 %v6344_v21, %s7928_s23 }
 0x436   : > { %v6478_v45 = vpop.permute.xlu1 %1611 }
 0x437   : > { %1791 = vrot.lane.b32.xlu0 %v6355_v32, %s5591_s2 }
 0x438   : > { %2030 = vrot.lane.b32.xlu1 %v6344_v21, %s7926_s30 }
 0x43a   : > { %v6484_v24 = vpop.permute.xlu1 %1692 }
 0x43b   : > { %1872 = vrot.lane.b32.xlu0 %v6355_v32, %s7930_s3 }
 0x43c   : > { %1631 = vrot.lane.b32.xlu1 %v6357_v33, %s5589_s28 }
 0x43e   : > { %v6490_v48 = vpop.permute.xlu1 %1773 }
 0x43f   : > { %1953 = vrot.lane.b32.xlu0 %v6355_v32, %s7928_s23 }
 0x440   : > { %2099 = vrot.lane.b32.xlu1 %v6326_v16, %s7924_s22 }
 0x441   : > { %v1616_v49 = vpop.permute.xlu0 %1615 }
 0x442   : > { %1658 = vst.msk [vmem:[#allocation4 + $0x70] sm:$0xff] %vm1576_vm3, %v1616_v49  ;;  %v6497_v23 = vpop.permute.xlu1 %1854 }
 0x443   : > { %2034 = vrot.lane.b32.xlu0 %v6355_v32, %s7926_s30 }
 0x444   : > { %1712 = vrot.lane.b32.xlu1 %v6357_v33, %s5590_s1 }
 0x445   : > { %v6503_v43 = vpop.permute.xlu0 %1696 }
 0x446   : > { %1739 = vst.msk [vmem:[#allocation4 + $0xd0] sm:$0xff] %vm1576_vm3, %v6503_v43  ;;  %v6507_v27 = vpop.permute.xlu1 %1935 }
 0x447   : > { %1633 = vrot.lane.b32.xlu0 %v6382_v44, %s5589_s28 }
 0x448   : > { %1793 = vrot.lane.b32.xlu1 %v6357_v33, %s5591_s2 }
 0x449   : > { %v6513_v46 = vpop.permute.xlu0 %1777 }
 0x44a   : > { %1820 = vst.msk [vmem:[#allocation4 + $0x130] sm:$0xff] %vm1576_vm3, %v6513_v46  ;;  %v6517_v53 = vpop.permute.xlu1 %2016 }
 0x44b   : > { %2101 = vrot.lane.b32.xlu0 %v6348_v29, %s7924_s22 }
 0x44c   : > { %1874 = vrot.lane.b32.xlu1 %v6357_v33, %s7930_s3 }
 0x44d   : > { %v6523_v54 = vpop.permute.xlu0 %1858 }
 0x44e   : > { %1901 = vst.msk [vmem:[#allocation4 + $0x190] sm:$0xff] %vm1576_vm3, %v6523_v54  ;;  %v1614_v51 = vpop.permute.xlu1 %1613 }
 0x44f   : > { %1714 = vrot.lane.b32.xlu0 %v6382_v44, %s5590_s1  ;;  %v1637_v60 = vsel %vm1635_vm4, %v1614_v51, %v1616_v49  ;;  %v1636_v47 = vsel %vm1635_vm4, %v6478_v45, %v1614_v51 }
 0x450   : > { %1955 = vrot.lane.b32.xlu1 %v6357_v33, %s7928_s23 }
 0x451   : > { %v6531_v55 = vpop.permute.xlu0 %1939 }
 0x452   : > { %1982 = vst.msk [vmem:[#allocation4 + $0x1f0] sm:$0xff] %vm1576_vm3, %v6531_v55  ;;  %v6535_v31 = vpop.permute.xlu1 %1694 }
 0x453   : > { %2107 = vrot.lane.b32.xlu0 %v6365_v2, %s7924_s22 }
 0x454   : > { %2036 = vrot.lane.b32.xlu1 %v6357_v33, %s7926_s30 }
 0x455   : > { %v6541_v56 = vpop.permute.xlu0 %2020 }
 0x456   : > { %2063 = vst.msk [vmem:[#allocation4 + $0x250] sm:$0xff] %vm1576_vm3, %v6541_v56  ;;  %v6545_v61 = vpop.permute.xlu1 %1775 }
 0x457   : > { %1795 = vrot.lane.b32.xlu0 %v6382_v44, %s5591_s2 }
 0x458   : > { %2105 = vrot.lane.b32.xlu1 %v6333_v18, %s7924_s22 }
 0x459   : > { %v1618_v50 = vpop.permute.xlu0 %1617 }
 0x45a   : > { %v6551_v63 = vpop.permute.xlu1 %1856 }
 0x45b   : > { %2103 = vrot.lane.b32.xlu0 %v6331_v11, %s7924_s22 }
 0x45c   : > { %2097 = vrot.lane.b32.xlu1 %v6324_v59, %s7924_s22 }
 0x45d   : > { %v6557_v0 = vpop.permute.xlu0 %1698 }
 0x45e   : > { %v6559_v3 = vpop.permute.xlu1 %1937 }
 0x45f   : > { %1876 = vrot.lane.b32.xlu0 %v6382_v44, %s7930_s3  ;;  %s5600_s3 = smov [#allocation5]  }
 0x460   : > { %2111 = vrot.lane.b32.xlu1 %v6344_v21, %s7924_s22 }
 0x461   : > { %v6565_v4 = vpop.permute.xlu0 %1779 }
 0x462   : > { %v6567_v6 = vpop.permute.xlu1 %2018 }
 0x463   : > { %2113 = vrot.lane.b32.xlu0 %v6374_v39, %s7924_s22 }
 0x464   : > { %2117 = vrot.lane.b32.xlu1 %v6357_v33, %s7924_s22 }
 0x465   : > { %v6573_v9 = vpop.permute.xlu0 %1860 }
 0x466   : > { %v1620_v12 = vpop.permute.xlu1 %1619 }
 0x467   : > { %1957 = vrot.lane.b32.xlu0 %v6382_v44, %s7928_s23  ;;  %v1638_v57 = vsel %vm1635_vm4, %v1618_v50, %v1620_v12  ;;  %s7962_s23 = smov 91  }
 0x468   : > { %2109 = vrot.lane.b32.xlu1 %v6342_v34, %s7924_s22 }
 0x469   : > { %v6579_v14 = vpop.permute.xlu0 %1941 }
 0x46a   : > { %v6581_v15 = vpop.permute.xlu1 %1700 }
 0x46b   : > { %2115 = vrot.lane.b32.xlu0 %v6355_v32, %s7924_s22 }
 0x46c   : > { %2180 = vrot.lane.b32.xlu1 %v6326_v16, %s7922_s11  ;;  %v5187_v16 = vpack.c.bf16 %v1638_v57, %v1636_v47 }
 0x46d   : > { %v6587_v13 = vpop.permute.xlu0 %2022 }
 0x46e   : > { %v6589_v52 = vpop.permute.xlu1 %1781 }
 0x46f   : > { %2038 = vrot.lane.b32.xlu0 %v6382_v44, %s7926_s30  ;;  %s7959_s30 = smov 109  }
 0x470   : > { %2186 = vrot.lane.b32.xlu1 %v6333_v18, %s7922_s11 }
 0x471   : > { %v1622_v58 = vpop.permute.xlu0 %1621 }
 0x472   : > { %v1639_v62 = vsel %vm1635_vm4, %v1620_v12, %v1622_v58  ;;  %1661 = vst.msk [vmem:[#allocation4 + $0x88] sm:$0xff] %vm1576_vm3, %v1622_v58  ;;  %v6599_v5 = vpop.permute.xlu1 %1862 }
 0x473   : > { %2182 = vrot.lane.b32.xlu0 %v6348_v29, %s7922_s11  ;;  %v5185_v7 = vpack.c.bf16 %v1639_v62, %v1637_v60 }
 0x474   : > { %2178 = vrot.lane.b32.xlu1 %v6324_v59, %s7922_s11 }
 0x475   : > { %v6610_v17 = vpop.permute.xlu0 %1702  ;;  %5186 = vmatprep.subr.bf16.mxu0 %v5185_v7 }
 0x476   : > { %1742 = vst.msk [vmem:[#allocation4 + $0xe8] sm:$0xff] %vm1576_vm3, %v6610_v17  ;;  %v6614_v10 = vpop.permute.xlu1 %1943  ;;  %5188 = vmatpush1.bf16.msra.mxu0 %v5187_v16 }
 0x477   : > { %2119 = vrot.lane.b32.xlu0 %v6382_v44, %s7924_s22  ;;  %s7961_s22 = smov 92  }
 0x478   : > { %2192 = vrot.lane.b32.xlu1 %v6344_v21, %s7922_s11  ;;  %v2285_v21 = vld [vmem:[#allocation4 + $0x190] sm:$0xff] }
 0x479   : > { %v6620_v8 = vpop.permute.xlu0 %1783 }
 0x47a   : > { %1823 = vst.msk [vmem:[#allocation4 + $0x148] sm:$0xff] %vm1576_vm3, %v6620_v8  ;;  %v6624_v59 = vpop.permute.xlu1 %2024 }
 0x47b   : > { %2188 = vrot.lane.b32.xlu0 %v6365_v2, %s7922_s11 }
 0x47c   : > { %2198 = vrot.lane.b32.xlu1 %v6357_v33, %s7922_s11 }
 0x47d   : > { %v6630_v18 = vpop.permute.xlu0 %1864 }
 0x47e   : > { %1904 = vst.msk [vmem:[#allocation4 + $0x1a8] sm:$0xff] %vm1576_vm3, %v6630_v18  ;;  %v1624_v28 = vpop.permute.xlu1 %1623 }
 0x47f   : > { %2184 = vrot.lane.b32.xlu0 %v6331_v11, %s7922_s11 }
 0x480   : > { %2190 = vrot.lane.b32.xlu1 %v6342_v34, %s7922_s11  ;;  %v2237_v34 = vld [vmem:[#allocation4 + $0x10] sm:$0xff] }
 0x481   : > { %v6638_v19 = vpop.permute.xlu0 %1945  ;;  %v5251_v29 = vpack.c.bf16 %v2240_v20, %v2237_v34 }
 0x482   : > { %1985 = vst.msk [vmem:[#allocation4 + $0x208] sm:$0xff] %vm1576_vm3, %v6638_v19  ;;  %v6642_v30 = vpop.permute.xlu1 %1704 }
 0x483   : > { %2194 = vrot.lane.b32.xlu0 %v6374_v39, %s7922_s11 }
 0x485   : > { %v6646_v36 = vpop.permute.xlu0 %2026  ;;  %v2288_v25 = vld [vmem:[#allocation4 + $0x1a8] sm:$0xff] }
 0x486   : > { %2066 = vst.msk [vmem:[#allocation4 + $0x268] sm:$0xff] %vm1576_vm3, %v6646_v36  ;;  %v5249_v11 = vpack.c.bf16 %v2288_v25, %v2285_v21  ;;  %v6650_v40 = vpop.permute.xlu1 %1785 }
 0x487   : > { %2200 = vrot.lane.b32.xlu0 %v6382_v44, %s7922_s11 }
 0x488   : > { %5250 = vmatprep.subr.bf16.mxu1 %v5249_v11  ;;  %v1720_v11 = vsel %vm1716_vm5, %v6581_v15, %v6610_v17 }
 0x489   : > { %5252 = vmatpush3.bf16.msra.mxu1 %v5251_v29  ;;  %v1628_v42 = vpop.permute.xlu0 %1627 }
 0x48a   : > { %1664 = vst.msk [vmem:[#allocation4 + $0xa0] sm:$0xff] %vm1576_vm3, %v1628_v42  ;;  %v6655_v33 = vpop.permute.xlu1 %1866 }
 0x48b   : > { %2196 = vrot.lane.b32.xlu0 %v6355_v32, %s7922_s11  ;;  %s7960_s11 = smov 108  }
 0x48d   : > { %v1709_v35 = vpop.permute.xlu0 %1708 }
 0x48e   : > { %1745 = vst.msk [vmem:[#allocation4 + $0x100] sm:$0xff] %vm1576_vm3, %v1709_v35  ;;  %v6660_v37 = vpop.permute.xlu1 %1947 }
 0x491   : > { %v6662_v41 = vpop.permute.xlu0 %1789 }
 0x492   : > { %1826 = vst.msk [vmem:[#allocation4 + $0x160] sm:$0xff] %vm1576_vm3, %v6662_v41  ;;  %v6666_v26 = vpop.permute.xlu1 %2028 }
 0x493   : > { %7951 = vst [vmem:[#allocation13_spill] sm:$0xff] %v6666_v26  ;;  %v1718_v26 = vsel %vm1716_vm5, %v6535_v31, %v6503_v43 }
 0x495   : > { %v6668_v2 = vpop.permute.xlu0 %1870 }
 0x496   : > { %1907 = vst.msk [vmem:[#allocation4 + $0x1c0] sm:$0xff] %vm1576_vm3, %v6668_v2  ;;  %v1626_v39 = vpop.permute.xlu1 %1625 }
 0x497   : > { %v1641_v34 = vsel %vm1635_vm4, %v1626_v39, %v1628_v42  ;;  %v1640_v1 = vsel %vm1635_vm4, %v1624_v28, %v1626_v39  ;;  %v5193_v42 = vpack.c.bf16 %v1720_v11, %v1718_v26  ;;  %v1717_v28 = vsel %vm1716_vm5, %v6484_v24, %v6535_v31 }
 0x499   : > { %v6672_v44 = vpop.permute.xlu0 %1951 }
 0x49a   : > { %1988 = vst.msk [vmem:[#allocation4 + $0x220] sm:$0xff] %vm1576_vm3, %v6672_v44  ;;  %v1707_v32 = vpop.permute.xlu1 %1706 }
 0x49b   : > { %v1721_v24 = vsel %vm1716_vm5, %v6642_v30, %v1707_v32  ;;  %v1798_v30 = vsel %vm1797_vm6, %v6490_v48, %v6545_v61 }
 0x49d   : > { %v6676_v45 = vpop.permute.xlu0 %2032 }
 0x49e   : > { %2069 = vst.msk [vmem:[#allocation4 + $0x280] sm:$0xff] %vm1576_vm3, %v6676_v45  ;;  %v6680_v49 = vpop.permute.xlu1 %1787 }
 0x49f   : > { %v1802_v48 = vsel %vm1797_vm6, %v6650_v40, %v6680_v49  ;;  %v1879_v40 = vsel %vm1878_vm7, %v6497_v23, %v6551_v63 }
 0x4a1   : > { %v1630_v51 = vpop.permute.xlu0 %1629 }
 0x4a2   : > { %v6682_v50 = vpop.permute.xlu1 %1868 }
 0x4a5   : > { %v1711_v12 = vpop.permute.xlu0 %1710 }
 0x4a6   : > { %v6684_v57 = vpop.permute.xlu1 %1949 }
 0x4a9   : > { %v1792_v58 = vpop.permute.xlu0 %1791 }
 0x4aa   : > { %v6686_v60 = vpop.permute.xlu1 %2030 }
 0x4ab   : > { %7952 = vst [vmem:[#allocation14_spill] sm:$0xff] %v6686_v60  ;;  %v1719_v60 = vsel %vm1716_vm5, %v6557_v0, %v6581_v15  ;;  %v1801_v0 = vsel %vm1797_vm6, %v6589_v52, %v6620_v8  ;;  %v1722_v15 = vsel %vm1716_vm5, %v1707_v32, %v1709_v35  ;;  %v1800_v8 = vsel %vm1797_vm6, %v6565_v4, %v6589_v52 }
 0x4ac   : > { %v5195_v43 = vpack.c.bf16 %v1719_v60, %v1717_v28  ;;  %v1882_v52 = vsel %vm1878_vm7, %v6599_v5, %v6630_v18  ;;  %v1880_v18 = vsel %vm1878_vm7, %v6551_v63, %v6523_v54  ;;  %v1883_v63 = vsel %vm1878_vm7, %v6655_v33, %v6682_v50 }
 0x4ad   : > { %v6688_v62 = vpop.permute.xlu0 %1872  ;;  %v1960_v33 = vsel %vm1959_vm8, %v6507_v27, %v6559_v3  ;;  %v1965_v27 = vsel %vm1959_vm8, %v6684_v57, %v6672_v44  ;;  %v2042_v44 = vsel %vm2040_vm9, %v6567_v6, %v6541_v56  ;;  %v2041_v56 = vsel %vm2040_vm9, %v6517_v53, %v6567_v6 }
 0x4ae   : > { %v1632_v47 = vpop.permute.xlu1 %1631 }
 0x4af   : > { %v1642_v21 = vsel %vm1635_vm4, %v1630_v51, %v1632_v47 }
 0x4b0   : > { %v5191_v51 = vpack.c.bf16 %v1642_v21, %v1640_v1 }
 0x4b1   : > { %v6690_v7 = vpop.permute.xlu0 %1953 }
 0x4b2   : > { %v6692_v38 = vpop.permute.xlu1 %2099 }
 0x4b3   : > { %7953 = vst [vmem:[#allocation15_spill] sm:$0xff] %v6692_v38 }
 0x4b5   : > { %v6694_v16 = vpop.permute.xlu0 %2034 }
 0x4b6   : > { %v1713_v20 = vpop.permute.xlu1 %1712 }
 0x4b7   : > { %v1723_v1 = vsel %vm1716_vm5, %v1711_v12, %v1713_v20  ;;  %v1799_v12 = vsel %vm1797_vm6, %v6545_v61, %v6513_v46  ;;  %v5203_v46 = vpack.c.bf16 %v1800_v8, %v1798_v30  ;;  %v2252_v30 = vld [vmem:[#allocation4 + $0x88] sm:$0xff] }
 0x4b8   : > { %v5199_v60 = vpack.c.bf16 %v1723_v1, %v1721_v24  ;;  %v2044_v24 = vsel %vm2040_vm9, %v6624_v59, %v6646_v36  ;;  %v2297_v36 = vld [vmem:[#allocation4 + $0x1f0] sm:$0xff] }
 0x4b9   : > { %v1634_v25 = vpop.permute.xlu0 %1633 }
 0x4ba   : > { %v1643_v29 = vsel %vm1635_vm4, %v1632_v47, %v1634_v25  ;;  %1667 = vst.msk [vmem:[#allocation4 + $0xb8] sm:$0xff] %vm1576_vm3, %v1634_v25  ;;  %v1794_v22 = vpop.permute.xlu1 %1793  ;;  %v1803_v25 = vsel %vm1797_vm6, %v6680_v49, %v6662_v41  ;;  %v1881_v41 = vsel %vm1878_vm7, %v6573_v9, %v6599_v5  ;;  %v1963_v9 = vsel %vm1959_vm8, %v6614_v10, %v6638_v19 }
 0x4bb   : > { %v5189_v38 = vpack.c.bf16 %v1643_v29, %v1641_v34  ;;  %v1804_v32 = vsel %vm1797_vm6, %v1792_v58, %v1794_v22  ;;  %v5209_v29 = vpack.c.bf16 %v1882_v52, %v1880_v18  ;;  %v5211_v49 = vpack.c.bf16 %v1881_v41, %v1879_v40  ;;  %v7954_v41 = vld [vmem:[#allocation14_spill] sm:$0xff] }
 0x4bc   : > { %v5207_v58 = vpack.c.bf16 %v1804_v32, %v1802_v48  ;;  %v1884_v5 = vsel %vm1878_vm7, %v6682_v50, %v6668_v2  ;;  %v1961_v19 = vsel %vm1959_vm8, %v6559_v3, %v6531_v55  ;;  %v1962_v2 = vsel %vm1959_vm8, %v6579_v14, %v6614_v10  ;;  %v2246_v55 = vld [vmem:[#allocation4 + $0x58] sm:$0xff] }
 0x4bd   : > { %v6710_v17 = vpop.permute.xlu0 %2101  ;;  %5190 = vmatprep.subr.bf16.mxu0 %v5189_v38  ;;  %v5217_v1 = vpack.c.bf16 %v1963_v9, %v1961_v19  ;;  %v5219_v50 = vpack.c.bf16 %v1962_v2, %v1960_v33  ;;  %v2043_v32 = vsel %vm2040_vm9, %v6587_v13, %v6624_v59  ;;  %v5225_v52 = vpack.c.bf16 %v2044_v24, %v2042_v44  ;;  %v2309_v9 = vld [vmem:[#allocation4 + $0x250] sm:$0xff] }
 0x4be   : > { %2144 = vst.msk [vmem:[#allocation4 + $0x2b0] sm:$0xff] %vm1576_vm3, %v6710_v17  ;;  %v1875_v47 = vpop.permute.xlu1 %1874  ;;  %5192 = vmatpush1.bf16.msra.mxu0 %v5191_v51  ;;  %v5227_v48 = vpack.c.bf16 %v2043_v32, %v2041_v56 }
 0x4bf   : > { %5194 = vmatprep.subr.bf16.mxu0 %v5193_v42  ;;  %v1885_v54 = vsel %vm1878_vm7, %v6688_v62, %v1875_v47 }
 0x4c1   : > { %v1715_v39 = vpop.permute.xlu0 %1714 }
 0x4c2   : > { %v1724_v26 = vsel %vm1716_vm5, %v1713_v20, %v1715_v39  ;;  %1748 = vst.msk [vmem:[#allocation4 + $0x118] sm:$0xff] %vm1576_vm3, %v1715_v39  ;;  %v6724_v38 = vpop.permute.xlu1 %1955  ;;  %5196 = vmatpush1.bf16.msra.mxu0 %v5195_v43  ;;  %v5201_v20 = vpack.c.bf16 %v1801_v0, %v1799_v12  ;;  %v5215_v43 = vpack.c.bf16 %v1885_v54, %v1883_v63  ;;  %v2291_v0 = vld [vmem:[#allocation4 + $0x1c0] sm:$0xff]  ;;  %v2264_v63 = vld [vmem:[#allocation4 + $0xe8] sm:$0xff] }
 0x4c3   : > { %v5197_v31 = vpack.c.bf16 %v1724_v26, %v1722_v15  ;;  %v1966_v14 = vsel %vm1959_vm8, %v6690_v7, %v6724_v38  ;;  %v2300_v26 = vld [vmem:[#allocation4 + $0x208] sm:$0xff]  ;;  %v2243_v12 = vld [vmem:[#allocation4 + $0x40] sm:$0xff] }
 0x4c4   : > { %v5255_v8 = vpack.c.bf16 %v2246_v55, %v2243_v12 }
 0x4c5   : > { %v6734_v35 = vpop.permute.xlu0 %2107  ;;  %5198 = vmatprep.subr.bf16.mxu0 %v5197_v31  ;;  %v2321_v12 = vld [vmem:[#allocation4 + $0x2b0] sm:$0xff] }
 0x4c6   : > { %2147 = vst.msk [vmem:[#allocation4 + $0x2c8] sm:$0xff] %vm1576_vm3, %v6734_v35  ;;  %v6738_v21 = vpop.permute.xlu1 %2036  ;;  %5200 = vmatpush1.bf16.msra.mxu0 %v5199_v60  ;;  %v1964_v60 = vsel %vm1959_vm8, %v6660_v37, %v6684_v57  ;;  %v2249_v37 = vld [vmem:[#allocation4 + $0x70] sm:$0xff] }
 0x4c7   : > { %5202 = vmatprep.subr.bf16.mxu0 %v5201_v20  ;;  %v2047_v13 = vsel %vm2040_vm9, %v6694_v16, %v6738_v21  ;;  %v2255_v16 = vld [vmem:[#allocation4 + $0xa0] sm:$0xff] }
 0x4c9   : > { %v1796_v4 = vpop.permute.xlu0 %1795  ;;  %v2270_v55 = vld [vmem:[#allocation4 + $0x118] sm:$0xff] }
 0x4ca   : > { %v1805_v11 = vsel %vm1797_vm6, %v1794_v22, %v1796_v4  ;;  %1829 = vst.msk [vmem:[#allocation4 + $0x178] sm:$0xff] %vm1576_vm3, %v1796_v4  ;;  %v6752_v34 = vpop.permute.xlu1 %2105  ;;  %5204 = vmatpush1.bf16.msra.mxu0 %v5203_v46  ;;  %v5223_v46 = vpack.c.bf16 %v1966_v14, %v1964_v60  ;;  %v2315_v14 = vld [vmem:[#allocation4 + $0x280] sm:$0xff] }
 0x4cb   : > { %v5205_v61 = vpack.c.bf16 %v1805_v11, %v1803_v25  ;;  %v5259_v25 = vpack.c.bf16 %v2252_v30, %v2249_v37  ;;  %v2258_v11 = vld [vmem:[#allocation4 + $0xb8] sm:$0xff]  ;;  %v2125_v53 = vsel %vm2121_vm10, %v6752_v34, %v6734_v35  ;;  %v1542_v30 = vld [vmem:[%s7900_s12] sm:$0xff] }
 0x4cd   : > { %v6763_v22 = vpop.permute.xlu0 %2103  ;;  %5206 = vmatprep.subr.bf16.mxu0 %v5205_v61  ;;  %v2303_v61 = vld [vmem:[#allocation4 + $0x220] sm:$0xff] }
 0x4ce   : > { %v6765_v51 = vpop.permute.xlu1 %2097  ;;  %5208 = vmatpush1.bf16.msra.mxu0 %v5207_v58  ;;  %v2312_v58 = vld [vmem:[#allocation4 + $0x268] sm:$0xff]  ;;  %v2124_v19 = vsel %vm2121_vm10, %v6763_v22, %v6752_v34 }
 0x4cf   : > { %5210 = vmatprep.subr.bf16.mxu0 %v5209_v29  ;;  %v2046_v29 = vsel %vm2040_vm9, %v7954_v41, %v6676_v45 }
 0x4d1   : > { %v1877_v42 = vpop.permute.xlu0 %1876  ;;  %v2282_v32 = vld [vmem:[#allocation4 + $0x178] sm:$0xff] }
 0x4d2   : > { %v1886_v28 = vsel %vm1878_vm7, %v1875_v47, %v1877_v42  ;;  %1910 = vst.msk [vmem:[#allocation4 + $0x1d8] sm:$0xff] %vm1576_vm3, %v1877_v42  ;;  %v6780_v23 = vpop.permute.xlu1 %2111  ;;  %5212 = vmatpush1.bf16.msra.mxu0 %v5211_v49  ;;  %v7955_v49 = vld [vmem:[#allocation13_spill] sm:$0xff]  ;;  %v5263_v42 = vpack.c.bf16 %v2258_v11, %v2255_v16  ;;  %v1552_v16 = vld [vmem:[%s7900_s12 + $0x50] sm:$0xff] }
 0x4d3   : > { %v5213_v62 = vpack.c.bf16 %v1886_v28, %v1884_v5  ;;  %v2045_v54 = vsel %vm2040_vm9, %v7955_v49, %v7954_v41  ;;  %v7956_v28 = vld [vmem:[#allocation15_spill] sm:$0xff] }
 0x4d4   : > { %v2123_v35 = vsel %vm2121_vm10, %v7956_v28, %v6710_v17  ;;  %v2261_v17 = vld [vmem:[#allocation4 + $0xd0] sm:$0xff] }
 0x4d5   : > { %v6791_v47 = vpop.permute.xlu0 %2113  ;;  %5214 = vmatprep.subr.bf16.mxu0 %v5213_v62  ;;  %v5231_v62 = vpack.c.bf16 %v2047_v13, %v2045_v54  ;;  %v5267_v33 = vpack.c.bf16 %v2264_v63, %v2261_v17  ;;  %v2279_v13 = vld [vmem:[#allocation4 + $0x160] sm:$0xff]  ;;  %v1547_v17 = vld [vmem:[%s7900_s12 + $0x28] sm:$0xff] }
 0x4d6   : > { %2150 = vst.msk [vmem:[#allocation4 + $0x2e0] sm:$0xff] %vm1576_vm3, %v6791_v47  ;;  %v6795_v39 = vpop.permute.xlu1 %2117  ;;  %5216 = vmatpush1.bf16.msra.mxu0 %v5215_v43  ;;  %v2122_v43 = vsel %vm2121_vm10, %v6765_v51, %v7956_v28 }
 0x4d7   : > { %5218 = vmatprep.subr.bf16.mxu0 %v5217_v1  ;;  %v5233_v1 = vpack.c.bf16 %v2125_v53, %v2123_v35 }
 0x4d9   : > { %v1958_v10 = vpop.permute.xlu0 %1957  ;;  %v2294_v15 = vld [vmem:[#allocation4 + $0x1d8] sm:$0xff] }
 0x4da   : > { %v1967_v3 = vsel %vm1959_vm8, %v6724_v38, %v1958_v10  ;;  %1991 = vst.msk [vmem:[#allocation4 + $0x238] sm:$0xff] %vm1576_vm3, %v1958_v10  ;;  %v5253_v31 = vpack.c.bf16 %v2294_v15, %v2291_v0  ;;  %v6812_v7 = vpop.permute.xlu1 %2109  ;;  %5220 = vmatpush1.bf16.msra.mxu0 %v5219_v50  ;;  %v5257_v38 = vpack.c.bf16 %v2300_v26, %v2297_v36  ;;  %v2324_v0 = vld [vmem:[#allocation4 + $0x2c8] sm:$0xff] }
 0x4db   : > { %v5221_v20 = vpack.c.bf16 %v1967_v3, %v1965_v27  ;;  %v5235_v50 = vpack.c.bf16 %v2124_v19, %v2122_v43  ;;  %v2127_v15 = vsel %vm2121_vm10, %v6780_v23, %v6791_v47  ;;  %v2267_v27 = vld [vmem:[#allocation4 + $0x100] sm:$0xff]  ;;  %v2126_v3 = vsel %vm2121_vm10, %v6812_v7, %v6780_v23  ;;  %v2276_v36 = vld [vmem:[#allocation4 + $0x148] sm:$0xff]  ;;  %v2273_v23 = vld [vmem:[#allocation4 + $0x130] sm:$0xff] }
 0x4dc   : > { %5254 = vmatprep.subr.bf16.mxu1 %v5253_v31  ;;  %v5271_v31 = vpack.c.bf16 %v2270_v55, %v2267_v27  ;;  %v5275_v7 = vpack.c.bf16 %v2276_v36, %v2273_v23  ;;  %v1553_v55 = vld [vmem:[%s7900_s12 + $0x58] sm:$0xff]  ;;  %v621_v27 = vld [vmem:[%s7892_s4] sm:$0x7] }
 0x4dd   : > { %5256 = vmatpush3.bf16.msra.mxu1 %v5255_v8  ;;  %v2116_v4 = vpop.permute.xlu0 %2115  ;;  %5222 = vmatprep.subr.bf16.mxu0 %v5221_v20  ;;  %v5273_v8 = vpack.c.bf16 %v2324_v0, %v2321_v12  ;;  %v2327_v37 = vld [vmem:[#allocation4 + $0x2e0] sm:$0xff] }
 0x4de   : > { %5258 = vmatprep.subr.bf16.mxu1 %v5257_v38  ;;  %v6823_v57 = vpop.permute.xlu1 %2180  ;;  %5224 = vmatpush1.bf16.msra.mxu0 %v5223_v46  ;;  %v2128_v34 = vsel %vm2121_vm10, %v2116_v4, %v6795_v39  ;;  %v1546_v4 = vld [vmem:[%s7900_s12 + $0x20] sm:$0xff] }
 0x4df   : > { %5226 = vmatprep.subr.bf16.mxu0 %v5225_v52  ;;  %v5239_v47 = vpack.c.bf16 %v2128_v34, %v2126_v3 }
 0x4e1   : > { %5260 = vmatpush3.bf16.msra.mxu1 %v5259_v25  ;;  %v2039_v59 = vpop.permute.xlu0 %2038  ;;  %v2306_v18 = vld [vmem:[#allocation4 + $0x238] sm:$0xff] }
 0x4e2   : > { %v2048_v6 = vsel %vm2040_vm9, %v6738_v21, %v2039_v59  ;;  %2072 = vst.msk [vmem:[#allocation4 + $0x298] sm:$0xff] %vm1576_vm3, %v2039_v59  ;;  %v5261_v40 = vpack.c.bf16 %v2306_v18, %v2303_v61  ;;  %5228 = vmatpush1.bf16.msra.mxu0 %v5227_v48  ;;  %v6843_v5 = vpop.permute.xlu1 %2186  ;;  %v5265_v21 = vpack.c.bf16 %v2312_v58, %v2309_v9  ;;  %v1545_v61 = vld [vmem:[%s7900_s12 + $0x18] sm:$0xff] }
 0x4e3   : > { %v5229_v45 = vpack.c.bf16 %v2048_v6, %v2046_v29  ;;  %v5279_v59 = vpack.c.bf16 %v2282_v32, %v2279_v13  ;;  %v1549_v58 = vld [vmem:[%s7900_s12 + $0x38] sm:$0xff] }
 0x4e4   : > { %5262 = vmatprep.subr.bf16.mxu1 %v5261_v40  ;;  %v1548_v40 = vld [vmem:[%s7900_s12 + $0x30] sm:$0xff] }
 0x4e5   : > { %5264 = vmatpush3.bf16.msra.mxu1 %v5263_v42  ;;  %v2183_v2 = vpop.permute.xlu0 %2182  ;;  %5230 = vmatprep.subr.bf16.mxu0 %v5229_v45 }
 0x4e6   : > { %2225 = vst.msk [vmem:[#allocation4 + $0x310] sm:$0xff] %vm1576_vm3, %v2183_v2  ;;  %5266 = vmatprep.subr.bf16.mxu1 %v5265_v21  ;;  %5232 = vmatpush1.bf16.msra.mxu0 %v5231_v62  ;;  %v2179_v10 = vpop.permute.xlu1 %2178  ;;  %v7957_v62 = vmov 0.0  }
 0x4e7   : > { %5234 = vmatprep.subr.bf16.mxu0 %v5233_v1  ;;  %v2203_v25 = vsel %vm2202_vm11, %v2179_v10, %v6823_v57  ;;  %v1544_v1 = vld [vmem:[%s7900_s12 + $0x10] sm:$0xff]  ;;  %1534 = vst.msk [vmem:[#allocation3 + $0x18] sm:$0xff] %vm1532_vm13, %v7957_v62  ;;  %1533 = vst.msk [vmem:[#allocation3] sm:$0xff] %vm1532_vm13, %v7957_v62 }
 0x4e8   : > { %1535 = vst.msk [vmem:[#allocation3 + $0x30] sm:$0xff] %vm1532_vm13, %v7957_v62  ;;  %1536 = vst.msk [vmem:[#allocation3 + $0x48] sm:$0xff] %vm1532_vm13, %v7957_v62 }
 0x4e9   : > { %5268 = vmatpush3.bf16.msra.mxu1 %v5267_v33  ;;  %v2120_v22 = vpop.permute.xlu0 %2119  ;;  %v2318_v51 = vld [vmem:[#allocation4 + $0x298] sm:$0xff]  ;;  %v1550_v33 = vld [vmem:[%s7900_s12 + $0x40] sm:$0xff]  ;;  %1539 = vst.msk [vmem:[#allocation3 + $0x28] sm:$0xff] %vm1537_vm14, %v7957_v62  ;;  %1538 = vst.msk [vmem:[#allocation3 + $0x10] sm:$0xff] %vm1537_vm14, %v7957_v62 }
 0x4ea   : > { %v2129_v26 = vsel %vm2121_vm10, %v6795_v39, %v2120_v22  ;;  %2153 = vst.msk [vmem:[#allocation4 + $0x2f8] sm:$0xff] %vm1576_vm3, %v2120_v22  ;;  %v5269_v24 = vpack.c.bf16 %v2318_v51, %v2315_v14  ;;  %5236 = vmatpush1.bf16.msra.mxu0 %v5235_v50  ;;  %v2204_v39 = vsel %vm2202_vm11, %v6823_v57, %v2183_v2  ;;  %v2193_v38 = vpop.permute.xlu1 %2192  ;;  %v2704_v50 = vlaneseq }
 0x4eb   : > { %v5237_v60 = vpack.c.bf16 %v2129_v26, %v2127_v15  ;;  %1540 = vst.msk [vmem:[#allocation3 + $0x40] sm:$0xff] %vm1537_vm14, %v7957_v62  ;;  %1541 = vst.msk [vmem:[#allocation3 + $0x58] sm:$0xff] %vm1537_vm14, %v7957_v62 }
 0x4ec   : > { %5270 = vmatprep.subr.bf16.mxu1 %v5269_v24  ;;  %v2705_v51 = vshrl.u32 %v2704_v50, 7 }
 0x4ed   : > { %5272 = vmatpush3.bf16.msra.mxu1 %v5271_v31  ;;  %v2189_v20 = vpop.permute.xlu0 %2188  ;;  %5238 = vmatprep.subr.bf16.mxu0 %v5237_v60  ;;  %v2333_v29 = vld [vmem:[#allocation4 + $0x310] sm:$0xff] }
 0x4ee   : > { %v2206_v44 = vsel %vm2202_vm11, %v6843_v5, %v2189_v20  ;;  %2228 = vst.msk [vmem:[#allocation4 + $0x328] sm:$0xff] %vm1576_vm3, %v2189_v20  ;;  %5274 = vmatprep.subr.bf16.mxu1 %v5273_v8  ;;  %5240 = vmatpush1.bf16.msra.mxu0 %v5239_v47  ;;  %v2199_v41 = vpop.permute.xlu1 %2198  ;;  %v2706_v26 = vsub.s32 0, %v2705_v51  ;;  %v2710_v3 = vsub.s32 1, %v2705_v51  ;;  %v2714_v60 = vsub.s32 2, %v2705_v51 }
 0x4ef   : > { %v5241_v46 = vpack.c.bf16 %v2206_v44, %v2204_v39 }
 0x4f0   : > { %v6930_v8 = vrot.slane %v621_v27, %v2706_v26  ;;  %v6932_v47 = vrot.slane %v621_v27, %v2710_v3  ;;  %v6936_v23 = vrot.slane %v621_v27, %v2714_v60 }
 0x4f1   : > { %5276 = vmatpush3.bf16.msra.mxu1 %v5275_v7  ;;  %v2185_v52 = vpop.permute.xlu0 %2184  ;;  %v2330_v56 = vld [vmem:[#allocation4 + $0x2f8] sm:$0xff]  ;;  %5242 = vmatprep.subr.bf16.mxu0 %v5241_v46 }
 0x4f2   : > { %v2205_v11 = vsel %vm2202_vm11, %v2185_v52, %v6843_v5  ;;  %v5277_v48 = vpack.c.bf16 %v2330_v56, %v2327_v37  ;;  %2420 = vmatmul.mubr.f32.vlgmr.msra.gmra.mrb[16].mxu0 %v1542_v30  ;;  %v2191_v9 = vpop.permute.xlu1 %2190  ;;  %v1551_v5 = vld [vmem:[%s7900_s12 + $0x48] sm:$0xff] }
 0x4f3   : > { %v5243_v18 = vpack.c.bf16 %v2205_v11, %v2203_v25  ;;  %2425 = vmatprep.mubr.f32.mxu0 %v1546_v4  ;;  %v2207_v35 = vsel %vm2202_vm11, %v2191_v9, %v2193_v38 }
 0x4f4   : > { %5278 = vmatprep.subr.bf16.mxu1 %v5277_v48 }
 0x4f5   : > { %5280 = vmatpush3.bf16.msra.mxu1 %v5279_v59  ;;  %v2195_v57 = vpop.permute.xlu0 %2194  ;;  %v2336_v53 = vld [vmem:[#allocation4 + $0x328] sm:$0xff]  ;;  %5244 = vmatpush1.bf16.msra.mxu0 %v5243_v18 }
 0x4f6   : > { %2231 = vst.msk [vmem:[#allocation4 + $0x340] sm:$0xff] %vm1576_vm3, %v2195_v57  ;;  %v5281_v6 = vpack.c.bf16 %v2336_v53, %v2333_v29  ;;  %2426 = vmatmul.mubr.f32.gmra.mrb[18].mxu0 %v1545_v61  ;;  %v2208_v54 = vsel %vm2202_vm11, %v2193_v38, %v2195_v57 }
 0x4f7   : > { %2431 = vmatprep.mubr.f32.mxu0 %v1549_v58 }
 0x4f8   : > { %2598 = vmatmul.mubr.f32.vlgmr.msra.gmra.mrb[20].mxu1 %v1542_v30  ;;  %5282 = vmatprep.subr.bf16.mxu1 %v5281_v6 }
 0x4f9   : > { %5284 = vmatpush3.bf16.msra.mxu1 %v5281_v6  ;;  %v2201_v49 = vpop.permute.xlu0 %2200  ;;  %2602 = vmatprep.mubr.f32.mxu1 %v1546_v4 }
 0x4fa   : > { %v2210_v42 = vsel %vm2202_vm11, %v2199_v41, %v2201_v49  ;;  %2234 = vst.msk [vmem:[#allocation4 + $0x358] sm:$0xff] %vm1576_vm3, %v2201_v49  ;;  %2432 = vmatmul.mubr.f32.gmra.mrb[20].mxu0 %v1548_v40 }
 0x4fb   : > { %v5245_v45 = vpack.c.bf16 %v2210_v42, %v2208_v54  ;;  %2437 = vmatprep.mubr.f32.mxu0 %v1552_v16 }
 0x4fc   : > { %2603 = vmatmul.mubr.f32.gmra.mrb[22].mxu1 %v1545_v61 }
 0x4fd   : > { %v2197_v28 = vpop.permute.xlu0 %2196  ;;  %2607 = vmatprep.mubr.f32.mxu1 %v1549_v58  ;;  %5246 = vmatprep.subr.bf16.mxu0 %v5245_v45  ;;  %v2339_v19 = vld [vmem:[#allocation4 + $0x340] sm:$0xff] }
 0x4fe   : > { %v2209_v21 = vsel %vm2202_vm11, %v2197_v28, %v2199_v41  ;;  %2438 = vmatmul.mubr.f32.gmra.mrb[22].mxu0 %v1551_v5 }
 0x4ff   : > { %v5247_v63 = vpack.c.bf16 %v2209_v21, %v2207_v35  ;;  %2508 = vmatprep.mubr.f32.mxu0 %v7957_v62 }
 0x500   : > { %2608 = vmatmul.mubr.f32.gmra.mrb[24].mxu1 %v1548_v40 }
 0x501   : > { %2612 = vmatprep.mubr.f32.mxu1 %v1552_v16  ;;  %v2342_v43 = vld [vmem:[#allocation4 + $0x358] sm:$0xff]  ;;  %5248 = vmatpush1.bf16.msra.mxu0 %v5247_v63 }
 0x502   : > { %v5285_v2 = vpack.c.bf16 %v2342_v43, %v2339_v19 }
 0x504   : > { %2613 = vmatmul.mubr.f32.gmra.mrb[26].mxu1 %v1551_v5  ;;  %5286 = vmatprep.subr.bf16.mxu1 %v5285_v2 }
 0x505   : > { %5288 = vmatpush3.bf16.msra.mxu1 %v5285_v2  ;;  %4993 = vmatprep.mubr.msk.f32.mxu1 %vm865_vm1, %v1544_v1 }
 0x506   : > { %4758 = vmatmul.mubr.msk.f32.vlgmr.msra.gmra.mrb[16].mxu0 %vm865_vm1, %v1544_v1 }
 0x507   : > { %2514 = vmatprep.mubr.f32.mxu0 %v7957_v62 }
 0x508   : > { %4994 = vmatmul.mubr.msk.f32.vlgmr.msra.gmra.mrb[28].mxu1 %vm865_vm1, %v1547_v17 }
 0x509   : > { %4996 = vmatprep.mubr.msk.f32.mxu1 %vm865_vm1, %v1550_v33 }
 0x50a   : > { %4759 = vmatmul.mubr.msk.f32.gmra.mrb[18].mxu0 %vm865_vm1, %v1547_v17 }
 0x50b   : > { %2520 = vmatprep.mubr.f32.mxu0 %v7957_v62 }
 0x50c   : > { %4997 = vmatmul.mubr.msk.f32.gmra.mrb[30].mxu1 %vm865_vm1, %v1553_v55 }
 0x50e   : > { %4760 = vmatmul.mubr.msk.f32.gmra.mrb[20].mxu0 %vm865_vm1, %v1550_v33 }
 0x50f   : > { %2526 = vmatprep.mubr.f32.mxu0 %v7957_v62 }
 0x512   : > { %4761 = vmatmul.mubr.msk.f32.gmra.mrb[22].mxu0 %vm865_vm1, %v1553_v55 }
 0x5cb   : > { %v4875_v34 = vpop.f32.mrb[20].mxu1 }
 0x5cc   : > { %v4876_v22 = vpop.f32.mrb[21].mxu1 }
 0x5cd   : > { %v4877_v14 = vadd.f32 %v4876_v22, %v4875_v34 }
 0x5cf   : > { %v4878_v10 = vpop.f32.mrb[22].mxu1 }
 0x5d0   : > { %v4879_v0 = vpop.f32.mrb[23].mxu1 }
 0x5d1   : > { %v4880_v15 = vadd.f32 %v4879_v0, %v4878_v10 }
 0x5d3   : > { %v4881_v24 = vpop.f32.mrb[24].mxu1 }
 0x5d4   : > { %v4882_v31 = vpop.f32.mrb[25].mxu1 }
 0x5d5   : > { %v4883_v12 = vadd.f32 %v4882_v31, %v4881_v24 }
 0x5d7   : > { %v4884_v36 = vpop.f32.mrb[26].mxu1 }
 0x5d8   : > { %v4885_v20 = vpop.f32.mrb[27].mxu1 }
 0x5d9   : > { %v4886_v39 = vadd.f32 %v4885_v20, %v4884_v36  ;;  %v6934_v44 = vpop.f32.mrb[16].mxu0 }
 0x5da   : > { %v2719_v7 = vmul.f32 %v6930_v8, %v6934_v44  ;;  %v6940_v38 = vpop.f32.mrb[17].mxu0 }
 0x5db   : > { %v4995_v30 = vpop.f32.mrb[28].mxu1  ;;  %v2720_v46 = vmul.f32 %v6932_v47, %v6940_v38 }
 0x5dc   : > { %v6944_v32 = vadd.f32 %v4995_v30, %v4880_v15  ;;  %v2684_v4 = vpop.f32.mrb[29].mxu1  ;;  %v2751_v52 = vmul.f32 %v2719_v7, %v2719_v7 }
 0x5dd   : > { %v6946_v37 = vadd.f32 %v4877_v14, %v2684_v4  ;;  %v2731_v56 = vadd.f32 %v2720_v46, %v2719_v7  ;;  %v2752_v25 = vmul.f32 %v2720_v46, %v2720_v46  ;;  %v6948_v11 = vpop.f32.mrb[18].mxu0 }
 0x5de   : > { %v2724_v48 = vmul.f32 %v6936_v23, %v6944_v32  ;;  %v2722_v13 = vmul.f32 %v6930_v8, %v6948_v11  ;;  %v6954_v59 = vpop.f32.mrb[19].mxu0 }
 0x5df   : > { %v2721_v61 = vmul.f32 %v6936_v23, %v6946_v37  ;;  %v4998_v18 = vpop.f32.mrb[30].mxu1  ;;  %v2763_v58 = vadd.f32 %v2752_v25, %v2751_v52  ;;  %v2723_v57 = vmul.f32 %v6932_v47, %v6954_v59 }
 0x5e0   : > { %v2756_v41 = vmul.f32 %v2724_v48, %v2724_v48  ;;  %v6960_v29 = vadd.f32 %v4998_v18, %v4886_v39  ;;  %v2694_v53 = vpop.f32.mrb[31].mxu1  ;;  %v2754_v6 = vmul.f32 %v2722_v13, %v2722_v13  ;;  %v2737_v51 = vsel %vm1576_vm3, %v2724_v48, 0.0 }
 0x5e1   : > { %v2732_v40 = vsel %vm1576_vm3, %v2721_v61, 0.0  ;;  %v2753_v16 = vmul.f32 %v2721_v61, %v2721_v61  ;;  %v6963_v49 = vadd.f32 %v4883_v12, %v2694_v53  ;;  %v2736_v54 = vadd.f32 %v2723_v57, %v2722_v13  ;;  %v6965_v42 = vpop.f32.mrb[20].mxu0 }
 0x5e2   : > { %v2755_v9 = vmul.f32 %v2723_v57, %v2723_v57  ;;  %v2733_v5 = vadd.f32 %v2732_v40, %v2731_v56  ;;  %v2725_v45 = vmul.f32 %v6930_v8, %v6965_v42  ;;  %v6969_v28 = vpop.f32.mrb[21].mxu0  ;;  %v2769_v63 = vsel %vm1576_vm3, %v2756_v41, 0.0  ;;  %v622_v56 = vld [vmem:[%s7906_s18] sm:$0xff] }
 0x5e3   : > { %v2726_v35 = vmul.f32 %v6932_v47, %v6969_v28  ;;  %v2764_v21 = vsel %vm1576_vm3, %v2753_v16, 0.0  ;;  %v2730_v33 = vmul.f32 %v6936_v23, %v6960_v29  ;;  %v2727_v10 = vmul.f32 %v6936_v23, %v6963_v49  ;;  %5007 = vmatprep.mubr.msk.f32.mxu1 %vm865_vm1, %v622_v56 }
 0x5e4   : > { %v2768_v19 = vadd.f32 %v2755_v9, %v2754_v6  ;;  %2734 = vadd.xlane.f32.xlu1 %v2733_v5  ;;  %v2757_v43 = vmul.f32 %v2725_v45, %v2725_v45  ;;  %v2765_v55 = vadd.f32 %v2764_v21, %v2763_v58  ;;  %v2738_v12 = vadd.f32 %v2737_v51, %v2736_v54  ;;  %v623_v5 = vld [vmem:[%s7906_s18 + $0x8] sm:$0xff]  ;;  %v1561_v51 = vld [vmem:[%s7902_s14 + $0x18] sm:$0xff] }
 0x5e5   : > { %v2741_v2 = vadd.f32 %v2726_v35, %v2725_v45  ;;  %v2758_v1 = vmul.f32 %v2726_v35, %v2726_v35  ;;  %v6975_v17 = vpop.f32.mrb[22].mxu0  ;;  %v2747_v3 = vsel %vm1576_vm3, %v2730_v33, 0.0  ;;  %v2762_v31 = vmul.f32 %v2730_v33, %v2730_v33  ;;  %v624_v45 = vld [vmem:[%s7906_s18 + $0x10] sm:$0xff]  ;;  %v625_v35 = vld [vmem:[%s7906_s18 + $0x18] sm:$0xff] }
 0x5e6   : > { %v2728_v34 = vmul.f32 %v6930_v8, %v6975_v17  ;;  %v6981_v22 = vpop.f32.mrb[23].mxu0  ;;  %v2770_v14 = vadd.f32 %v2769_v63, %v2768_v19  ;;  %2766 = vadd.xlane.f32.xlu0 %v2765_v55  ;;  %v2742_v60 = vsel %vm1576_vm3, %v2727_v10, 0.0  ;;  %v2759_v36 = vmul.f32 %v2727_v10, %v2727_v10  ;;  %v1555_v10 = vld [vmem:[%s7901_s13 + $0x8] sm:$0xff] }
 0x5e7   : > { %v2773_v0 = vadd.f32 %v2758_v1, %v2757_v43  ;;  %v2729_v15 = vmul.f32 %v6932_v47, %v6981_v22  ;;  %v2743_v7 = vadd.f32 %v2742_v60, %v2741_v2  ;;  %v2779_v30 = vsel %vm1576_vm3, %v2762_v31, 0.0 }
 0x5e8   : > { %v2760_v26 = vmul.f32 %v2728_v34, %v2728_v34  ;;  %2771 = vadd.xlane.f32.xlu1 %v2770_v14  ;;  %v2774_v46 = vsel %vm1576_vm3, %v2759_v36, 0.0  ;;  %v6997_v48 = vand.u32 127, %v2704_v50  ;;  %v1556_v14 = vld [vmem:[%s7901_s13 + $0x10] sm:$0xff] }
 0x5e9   : > { %v2746_v24 = vadd.f32 %v2729_v15, %v2728_v34  ;;  %v2761_v27 = vmul.f32 %v2729_v15, %v2729_v15  ;;  %v2775_v52 = vadd.f32 %v2774_v46, %v2773_v0  ;;  %v1554_v34 = vld [vmem:[%s7901_s13] sm:$0xff]  ;;  %v7934_v15 = vmov 1  }
 0x5ea   : > { %2739 = vadd.xlane.f32.xlu0 %v2738_v12  ;;  %vm2785_vm12 = vcmp.eq.s32.totalorder %v6997_v48, 0  ;;  %v1558_v0 = vld [vmem:[%s7902_s14] sm:$0xff]  ;;  %v5522_v48 = vld [vmem:[%s7906_s18 + $0x18] sm:$0xff] }
 0x5eb   : > { %v2778_v20 = vadd.f32 %v2761_v27, %v2760_v26  ;;  %v2748_v39 = vadd.f32 %v2747_v3, %v2746_v24  ;;  %v1559_v26 = vld [vmem:[%s7902_s14 + $0x8] sm:$0xff]  ;;  %v1557_v24 = vld [vmem:[%s7901_s13 + $0x18] sm:$0xff]  ;;  %v1560_v27 = vld [vmem:[%s7902_s14 + $0x10] sm:$0xff] }
 0x5ed   : > { %2749 = vadd.xlane.f32.xlu1 %v2748_v39  ;;  %v2780_v4 = vadd.f32 %v2779_v30, %v2778_v20 }
 0x5ee   : > { %2744 = vadd.xlane.f32.xlu0 %v2743_v7 }
 0x5f1   : > { %2781 = vadd.xlane.f32.xlu1 %v2780_v4 }
 0x5f2   : > { %2776 = vadd.xlane.f32.xlu0 %v2775_v52 }
 0x671   : > { %v2735_v25 = vpop.xlane.xlu1 %2734 }
 0x673   : > { %v2767_v13 = vpop.xlane.xlu0 %2766 }
 0x674   : > { %v2786_v58 = vsel %vm2785_vm12, %v2735_v25, %v2767_v13 }
 0x675   : > { %v2772_v61 = vpop.xlane.xlu1 %2771 }
 0x677   : > { %v2740_v18 = vpop.xlane.xlu0 %2739 }
 0x678   : > { %v2787_v57 = vsel %vm2785_vm12, %v2740_v18, %v2772_v61 }
 0x679   : > { %v5289_v53 = vpack.c.bf16 %v2787_v57, %v2786_v58 }
 0x67a   : > { %v2750_v41 = vpop.xlane.xlu1 %2749 }
 0x67b   : > { %5290 = vmatprep.subr.bf16.mxu1 %v5289_v53  ;;  %v2745_v6 = vpop.xlane.xlu0 %2744 }
 0x67c   : > { %5292 = vmatpush3.bf16.msra.mxu1 %v5289_v53  ;;  %v7958_v53 = vmov 0  }
 0x67e   : > { %v2782_v40 = vpop.xlane.xlu1 %2781 }
 0x67f   : > { %v2777_v16 = vpop.xlane.xlu0 %2776  ;;  %v2789_v54 = vsel %vm2785_vm12, %v2750_v41, %v2782_v40 }
 0x680   : > { %v2788_v50 = vsel %vm2785_vm12, %v2745_v6, %v2777_v16 }
 0x681   : > { %v5293_v9 = vpack.c.bf16 %v2789_v54, %v2788_v50 }
 0x683   : > { %5294 = vmatprep.subr.bf16.mxu1 %v5293_v9 }
 0x684   : > { %5296 = vmatpush3.bf16.msra.mxu1 %v5293_v9 }
 0x687   : > { %5008 = vmatmul.mubr.msk.f32.vlgmr.msra.gmra.mrb[32].mxu1 %vm865_vm1, %v623_v5 }
 0x688   : > { %5010 = vmatprep.mubr.msk.f32.mxu1 %vm865_vm1, %v624_v45 }
 0x68b   : > { %5011 = vmatmul.mubr.msk.f32.gmra.mrb[34].mxu1 %vm865_vm1, %v625_v35 }
 0x75a   : > { %v5009_v21 = vpop.f32.mrb[32].mxu1 }
 0x75b   : > { %v2888_v63 = vmul.f32 %v5009_v21, %v5009_v21  ;;  %v2868_v19 = vpop.f32.mrb[33].mxu1 }
 0x75c   : > { %v2887_v43 = vmul.f32 %v2868_v19, %v2868_v19 }
 0x75d   : > { %2897 = vrot.lane.b32.xlu1 %v2888_v63, %s7932_s24 }
 0x75e   : > { %2895 = vrot.lane.b32.xlu0 %v2887_v43, %s7932_s24  ;;  %v5012_v2 = vpop.f32.mrb[34].mxu1 }
 0x75f   : > { %v2890_v1 = vmul.f32 %v5012_v2, %v5012_v2  ;;  %v2878_v33 = vpop.f32.mrb[35].mxu1 }
 0x760   : > { %v2889_v55 = vmul.f32 %v2878_v33, %v2878_v33 }
 0x762   : > { %2901 = vrot.lane.b32.xlu0 %v2890_v1, %s7932_s24  ;;  %2899 = vrot.lane.b32.xlu1 %v2889_v55, %s7932_s24  ;;  %s5527_s24 = sshll.u32 %s5600_s3, 4  ;;  %s5528_s24 = int_to_ptr.vmem [resolvable:$false] %s5527_s24 }
 0x766   : > { %2922 = vperm.xlu0 %5489, %v5009_v21   ;;  %2917 = vperm.xlu1 %5490, %v2868_v19  }
 0x76a   : > { %2989 = vperm.xlu0 %5489, %v1554_v34   ;;  %2927 = vperm.xlu1 %5490, %v2878_v33  }
 0x76e   : > { %2999 = vperm.xlu0 %5489, %v1556_v14   ;;  %2932 = vperm.xlu1 %5490, %v5012_v2  }
 0x772   : > { %3036 = vperm.xlu0 %5489, %v1561_v51   ;;  %2994 = vperm.xlu1 %5490, %v1555_v10  }
 0x776   : > { %3021 = vperm.xlu1 %5490, %v1558_v0   ;;  %5491 = vset.pattern.permute.xlu0 %v7934_v15 }
 0x77a   : > { %3026 = vperm.xlu1 %5490, %v1559_v26  }
 0x77e   : > { %3004 = vperm.xlu1 %5490, %v1557_v24  }
 0x782   : > { %3031 = vperm.xlu1 %5490, %v1560_v27  }
 0x786   : > { %5492 = vset.pattern.permute.xlu1 %v7934_v15 }
 0x7cf   : > { %v2898_v3 = vpop.permute.xlu1 %2897 }
 0x7d0   : > { %v2908_v31 = vsub.f32 %v5009_v21, %v2898_v3  ;;  %v2896_v12 = vpop.permute.xlu0 %2895 }
 0x7d1   : > { %v2907_v60 = vsub.f32 %v2868_v19, %v2896_v12 }
 0x7d2   : > { %v2912_v36 = vmax.f32 %v2908_v31, 0.0 }
 0x7d3   : > { %v2911_v20 = vmax.f32 %v2907_v60, 0.0 }
 0x7d4   : > { %v2948_v39 = vadd.f32 1e-05, %v2912_v36  ;;  %v2902_v7 = vpop.permute.xlu0 %2901  ;;  %v2900_v30 = vpop.permute.xlu1 %2899 }
 0x7d5   : > { %v2947_v46 = vadd.f32 1e-05, %v2911_v20  ;;  %v2910_v4 = vsub.f32 %v5012_v2, %v2902_v7  ;;  %v2909_v52 = vsub.f32 %v2878_v33, %v2900_v30 }
 0x7d6   : > { %5503 = vrsqrt.f32 %v2948_v39 }
 0x7d7   : > { %5505 = vrsqrt.f32 %v2947_v46  ;;  %v2914_v56 = vmax.f32 %v2910_v4, 0.0  ;;  %v2913_v25 = vmax.f32 %v2909_v52, 0.0 }
 0x7d9   : > { %v2950_v13 = vadd.f32 1e-05, %v2914_v56  ;;  %v2949_v61 = vadd.f32 1e-05, %v2913_v25 }
 0x7db   : > { %5507 = vrsqrt.f32 %v2950_v13 }
 0x7dc   : > { %5509 = vrsqrt.f32 %v2949_v61 }
 0x7e0   : > { %v5504_v18 = vpop.eup %5503 }
 0x7e1   : > { %v5506_v58 = vpop.eup %5505  ;;  %2962 = vperm.xlu0 %5491, %v5504_v18  }
 0x7e2   : > { %2957 = vperm.xlu1 %5492, %v5506_v58  }
 0x7e5   : > { %v5508_v57 = vpop.eup %5507  ;;  %v2918_v6 = vpop.permute.xlu1 %2917 }
 0x7e6   : > { %v5510_v41 = vpop.eup %5509  ;;  %2972 = vperm.xlu0 %5491, %v5508_v57   ;;  %v2923_v54 = vpop.permute.xlu0 %2922  ;;  %v2935_v33 = vsub.f32 %v6934_v44, %v2918_v6  ;;  %v2936_v55 = vsub.f32 %v6940_v38, %v2918_v6  ;;  %v2937_v34 = vsub.f32 %v6946_v37, %v2918_v6 }
 0x7e7   : > { %2967 = vperm.xlu1 %5492, %v5510_v41   ;;  %v2938_v43 = vsub.f32 %v6948_v11, %v2923_v54  ;;  %v2939_v2 = vsub.f32 %v6954_v59, %v2923_v54  ;;  %v2940_v1 = vsub.f32 %v6944_v32, %v2923_v54 }
 0x7e9   : > { %v2928_v40 = vpop.permute.xlu1 %2927 }
 0x7ea   : > { %5494 = vset.pattern.permute.xlu0 %v7958_v53  ;;  %v2990_v5 = vpop.permute.xlu0 %2989  ;;  %v2941_v37 = vsub.f32 %v6965_v42, %v2928_v40  ;;  %v2942_v46 = vsub.f32 %v6969_v28, %v2928_v40  ;;  %v2943_v4 = vsub.f32 %v6963_v49, %v2928_v40 }
 0x7eb   : > { %5493 = vset.pattern.permute.xlu1 %v7958_v53 }
 0x7ed   : > { %v2933_v16 = vpop.permute.xlu1 %2932 }
 0x7ee   : > { %v7060_v35 = vpop.permute.xlu0 %2999  ;;  %v2944_v59 = vsub.f32 %v6975_v17, %v2933_v16  ;;  %v2945_v44 = vsub.f32 %v6981_v22, %v2933_v16  ;;  %v2946_v52 = vsub.f32 %v6960_v29, %v2933_v16 }
 0x7f1   : > { %v2995_v50 = vpop.permute.xlu1 %2994 }
 0x7f2   : > { %v7062_v63 = vpop.permute.xlu0 %3036 }
 0x7f5   : > { %v3022_v9 = vpop.permute.xlu1 %3021 }
 0x7f9   : > { %v3027_v45 = vpop.permute.xlu1 %3026 }
 0x7fd   : > { %v3005_v21 = vpop.permute.xlu1 %3004 }
 0x801   : > { %v7064_v19 = vpop.permute.xlu1 %3031 }
 0x860   : > { %v2963_v14 = vpop.permute.xlu0 %2962 }
 0x861   : > { %v2978_v51 = vmul.f32 %v2963_v14, %v2938_v43  ;;  %v2979_v10 = vmul.f32 %v2963_v14, %v2939_v2  ;;  %v2980_v0 = vmul.f32 %v2963_v14, %v2940_v1  ;;  %v2958_v26 = vpop.permute.xlu1 %2957 }
 0x862   : > { %v2975_v24 = vmul.f32 %v2958_v26, %v2935_v33  ;;  %v2976_v27 = vmul.f32 %v2958_v26, %v2936_v55  ;;  %v2977_v3 = vmul.f32 %v2958_v26, %v2937_v34 }
 0x863   : > { %v3010_v31 = vmul.f32 %v2995_v50, %v2978_v51  ;;  %v3011_v11 = vmul.f32 %v2995_v50, %v2979_v10  ;;  %v3012_v12 = vmul.f32 %v2995_v50, %v2980_v0 }
 0x864   : > { %v3007_v32 = vmul.f32 %v2990_v5, %v2975_v24  ;;  %v3008_v20 = vmul.f32 %v2990_v5, %v2976_v27  ;;  %v3009_v39 = vmul.f32 %v2990_v5, %v2977_v3 }
 0x865   : > { %v3042_v60 = vadd.f32 %v3027_v45, %v3010_v31  ;;  %v3043_v38 = vadd.f32 %v3027_v45, %v3011_v11  ;;  %v2973_v36 = vpop.permute.xlu0 %2972  ;;  %v3044_v56 = vadd.f32 %v3027_v45, %v3012_v12 }
 0x866   : > { %v2984_v7 = vmul.f32 %v2973_v36, %v2944_v59  ;;  %v2968_v30 = vpop.permute.xlu1 %2967  ;;  %v2985_v17 = vmul.f32 %v2973_v36, %v2945_v44  ;;  %v3039_v25 = vadd.f32 %v3022_v9, %v3007_v32  ;;  %v2986_v61 = vmul.f32 %v2973_v36, %v2946_v52 }
 0x867   : > { %v3055_v13 = vmax.f32 %v3043_v38, 0.0  ;;  %v3054_v22 = vmax.f32 %v3042_v60, 0.0  ;;  %v2981_v57 = vmul.f32 %v2968_v30, %v2941_v37  ;;  %v3040_v42 = vadd.f32 %v3022_v9, %v3008_v20 }
 0x868   : > { %v3016_v18 = vmul.f32 %v3005_v21, %v2984_v7  ;;  %v3017_v58 = vmul.f32 %v3005_v21, %v2985_v17  ;;  %v3041_v41 = vadd.f32 %v3022_v9, %v3009_v39  ;;  %v2982_v28 = vmul.f32 %v2968_v30, %v2942_v46 }
 0x869   : > { %v3067_v6 = vmul.f32 %v3055_v13, %v6932_v47  ;;  %v3066_v50 = vmul.f32 %v3054_v22, %v6930_v8  ;;  %v2983_v54 = vmul.f32 %v2968_v30, %v2943_v4  ;;  %v3056_v29 = vmax.f32 %v3044_v56, 0.0 }
 0x86a   : > { %v3051_v49 = vmax.f32 %v3039_v25, 0.0  ;;  %v3018_v40 = vmul.f32 %v3005_v21, %v2986_v61  ;;  %v3048_v16 = vadd.f32 %v7062_v63, %v3016_v18  ;;  %v3049_v5 = vadd.f32 %v7062_v63, %v3017_v58 }
 0x86b   : > { %3095 = vrot.lane.b32.xlu1 %v3067_v6, %s5599_s27  ;;  %3093 = vrot.lane.b32.xlu0 %v3066_v50, %s5599_s27  ;;  %v3013_v9 = vmul.f32 %v7060_v35, %v2981_v57  ;;  %v3068_v45 = vmul.f32 %v3056_v29, %v6936_v23  ;;  %v3052_v2 = vmax.f32 %v3040_v42, 0.0  ;;  %v3053_v1 = vmax.f32 %v3041_v41, 0.0 }
 0x86c   : > { %v3063_v43 = vmul.f32 %v3051_v49, %v6930_v8  ;;  %v3050_v33 = vadd.f32 %v7062_v63, %v3018_v40  ;;  %v3014_v21 = vmul.f32 %v7060_v35, %v2982_v28  ;;  %v3015_v55 = vmul.f32 %v7060_v35, %v2983_v54 }
 0x86d   : > { %v3045_v34 = vadd.f32 %v7064_v19, %v3013_v9  ;;  %v3064_v14 = vmul.f32 %v3052_v2, %v6932_v47  ;;  %v3065_v51 = vmul.f32 %v3053_v1, %v6936_v23  ;;  %v3060_v10 = vmax.f32 %v3048_v16, 0.0 }
 0x86e   : > { %v3061_v63 = vmax.f32 %v3049_v5, 0.0  ;;  %v3046_v35 = vadd.f32 %v7064_v19, %v3014_v21  ;;  %v3047_v0 = vadd.f32 %v7064_v19, %v3015_v55  ;;  %v3062_v27 = vmax.f32 %v3050_v33, 0.0 }
 0x86f   : > { %3097 = vrot.lane.b32.xlu0 %v3068_v45, %s5599_s27  ;;  %3087 = vrot.lane.b32.xlu1 %v3063_v43, %s5599_s27  ;;  %v3072_v26 = vmul.f32 %v3060_v10, %v6930_v8  ;;  %v3057_v3 = vmax.f32 %v3045_v34, 0.0 }
 0x870   : > { %v3073_v24 = vmul.f32 %v3061_v63, %v6932_v47  ;;  %v3074_v31 = vmul.f32 %v3062_v27, %v6936_v23  ;;  %v3058_v59 = vmax.f32 %v3046_v35, 0.0  ;;  %v3059_v12 = vmax.f32 %v3047_v0, 0.0 }
 0x871   : > { %v3069_v11 = vmul.f32 %v3057_v3, %v6930_v8 }
 0x872   : > { %v3070_v19 = vmul.f32 %v3058_v59, %v6932_v47  ;;  %v3071_v32 = vmul.f32 %v3059_v12, %v6936_v23 }
 0x873   : > { %3089 = vrot.lane.b32.xlu0 %v3064_v14, %s5599_s27  ;;  %3091 = vrot.lane.b32.xlu1 %v3065_v51, %s5599_s27 }
 0x877   : > { %3105 = vrot.lane.b32.xlu0 %v3072_v26, %s5599_s27  ;;  %3107 = vrot.lane.b32.xlu1 %v3073_v24, %s5599_s27 }
 0x87b   : > { %3109 = vrot.lane.b32.xlu0 %v3074_v31, %s5599_s27  ;;  %3099 = vrot.lane.b32.xlu1 %v3069_v11, %s5599_s27 }
 0x87f   : > { %3101 = vrot.lane.b32.xlu0 %v3070_v19, %s5599_s27  ;;  %3103 = vrot.lane.b32.xlu1 %v3071_v32, %s5599_s27  ;;  %s608_s27 = sand.u32 1, %s5577_s0  }
 0x8dd   : > { %v3094_v44 = vpop.permute.xlu0 %3093  ;;  %v3096_v60 = vpop.permute.xlu1 %3095 }
 0x8de   : > { %3136 = vst.msk [vmem:[#allocation3 + $0x18] sm:$0xff] %vm3131_vm15, %v3094_v44  ;;  %v7117_v38 = vsel %vm1532_vm13, %v3094_v44, %v3096_v60 }
 0x8df   : > { %3221 = vrot.lane.b32.xlu1 %v7117_v38, %s5589_s28 }
 0x8e1   : > { %v3098_v36 = vpop.permute.xlu0 %3097  ;;  %v3088_v37 = vpop.permute.xlu1 %3087 }
 0x8e2   : > { %v3114_v20 = vsel %vm1532_vm13, %v3096_v60, %v3098_v36  ;;  %3132 = vst.msk [vmem:[#allocation3] sm:$0xff] %vm3131_vm15, %v3088_v37 }
 0x8e3   : > { %3138 = vst.msk [vmem:[#allocation3 + $0x28] sm:$0xff] %vm3134_vm0, %v3114_v20 }
 0x8e5   : > { %v7124_v39 = vld [vmem:[#allocation3 + $0x18] sm:$0xff]  ;;  %v3090_v7 = vpop.permute.xlu0 %3089  ;;  %v3092_v30 = vpop.permute.xlu1 %3091 }
 0x8e6   : > { %v7127_v46 = vsel %vm1532_vm13, %v3088_v37, %v3090_v7  ;;  %v3112_v4 = vsel %vm1532_vm13, %v3090_v7, %v3092_v30  ;;  %3219 = vrot.lane.b32.xlu0 %v7124_v39, %s5589_s28 }
 0x8e7   : > { %3135 = vst.msk [vmem:[#allocation3 + $0x10] sm:$0xff] %vm3134_vm0, %v3112_v4  ;;  %v5297_v52 = vpack.c.bf16 %v7117_v38, %v7127_v46 }
 0x8e9   : > { %v7135_v17 = vld [vmem:[#allocation3] sm:$0xff]  ;;  %v3106_v56 = vpop.permute.xlu0 %3105  ;;  %v3108_v25 = vpop.permute.xlu1 %3107  ;;  %5298 = vmatprep.subr.bf16.mxu0 %v5297_v52 }
 0x8ea   : > { %v7137_v13 = vld [vmem:[#allocation3 + $0x28] sm:$0xff]  ;;  %3142 = vst.msk [vmem:[#allocation3 + $0x48] sm:$0xff] %vm3131_vm15, %v3106_v56  ;;  %v7141_v22 = vsel %vm1532_vm13, %v3106_v56, %v3108_v25  ;;  %3299 = vrot.lane.b32.xlu0 %v7124_v39, %s5590_s1  ;;  %3213 = vrot.lane.b32.xlu1 %v7135_v17, %s5589_s28  ;;  %v5299_v61 = vpack.c.bf16 %v7124_v39, %v7135_v17 }
 0x8eb   : > { %3182 = vst.msk [vmem:[#allocation4 + $0x28] sm:$0xff] %vm1576_vm3, %v7137_v13 }
 0x8ec   : > { %5300 = vmatpush1.bf16.msra.mxu0 %v5299_v61 }
 0x8ed   : > { %v3110_v18 = vpop.permute.xlu0 %3109  ;;  %v3100_v58 = vpop.permute.xlu1 %3099 }
 0x8ee   : > { %v7151_v57 = vld [vmem:[#allocation3 + $0x10] sm:$0xff]  ;;  %v3118_v42 = vsel %vm1532_vm13, %v3108_v25, %v3110_v18  ;;  %3139 = vst.msk [vmem:[#allocation3 + $0x30] sm:$0xff] %vm3131_vm15, %v3100_v58  ;;  %3379 = vrot.lane.b32.xlu0 %v7124_v39, %s5591_s2  ;;  %3301 = vrot.lane.b32.xlu1 %v7117_v38, %s5590_s1 }
 0x8ef   : > { %3179 = vst.msk [vmem:[#allocation4 + $0x10] sm:$0xff] %vm1576_vm3, %v7151_v57 }
 0x8f0   : > { %3144 = vst.msk [vmem:[#allocation3 + $0x58] sm:$0xff] %vm3134_vm0, %v3118_v42 }
 0x8f1   : > { %v7162_v41 = vld [vmem:[#allocation3 + $0x48] sm:$0xff]  ;;  %v3102_v6 = vpop.permute.xlu0 %3101  ;;  %v3104_v50 = vpop.permute.xlu1 %3103 }
 0x8f2   : > { %v7165_v28 = vsel %vm1532_vm13, %v3100_v58, %v3102_v6  ;;  %v3116_v54 = vsel %vm1532_vm13, %v3102_v6, %v3104_v50  ;;  %3459 = vrot.lane.b32.xlu0 %v7124_v39, %s7959_s30  ;;  %3293 = vrot.lane.b32.xlu1 %v7135_v17, %s5590_s1 }
 0x8f3   : > { %3141 = vst.msk [vmem:[#allocation3 + $0x40] sm:$0xff] %vm3134_vm0, %v3116_v54  ;;  %v5301_v29 = vpack.c.bf16 %v7141_v22, %v7165_v28 }
 0x8f5   : > { %v7175_v49 = vld [vmem:[#allocation3 + $0x30] sm:$0xff]  ;;  %5302 = vmatprep.subr.bf16.mxu0 %v5301_v29 }
 0x8f6   : > { %3539 = vrot.lane.b32.xlu0 %v7124_v39, %s7960_s11  ;;  %3381 = vrot.lane.b32.xlu1 %v7117_v38, %s5591_s2  ;;  %v5303_v16 = vpack.c.bf16 %v7162_v41, %v7175_v49 }
 0x8f7   : > { %v7177_v40 = vld [vmem:[#allocation3 + $0x58] sm:$0xff] }
 0x8f8   : > { %3188 = vst.msk [vmem:[#allocation4 + $0x58] sm:$0xff] %vm1576_vm3, %v7177_v40  ;;  %5304 = vmatpush1.bf16.msra.mxu0 %v5303_v16 }
 0x8fa   : > { %v7187_v5 = vld [vmem:[#allocation3 + $0x40] sm:$0xff]  ;;  %3619 = vrot.lane.b32.xlu0 %v7124_v39, %s7961_s22  ;;  %3373 = vrot.lane.b32.xlu1 %v7135_v17, %s5591_s2 }
 0x8fb   : > { %3185 = vst.msk [vmem:[#allocation4 + $0x40] sm:$0xff] %vm1576_vm3, %v7187_v5 }
 0x8fe   : > { %3223 = vrot.lane.b32.xlu0 %v7137_v13, %s5589_s28  ;;  %3461 = vrot.lane.b32.xlu1 %v7117_v38, %s7959_s30 }
 0x902   : > { %3303 = vrot.lane.b32.xlu0 %v7137_v13, %s5590_s1  ;;  %3453 = vrot.lane.b32.xlu1 %v7135_v17, %s7959_s30 }
 0x906   : > { %3383 = vrot.lane.b32.xlu0 %v7137_v13, %s5591_s2  ;;  %3541 = vrot.lane.b32.xlu1 %v7117_v38, %s7960_s11 }
 0x90a   : > { %3463 = vrot.lane.b32.xlu0 %v7137_v13, %s7959_s30  ;;  %3533 = vrot.lane.b32.xlu1 %v7135_v17, %s7960_s11 }
 0x90e   : > { %3543 = vrot.lane.b32.xlu0 %v7137_v13, %s7960_s11  ;;  %3621 = vrot.lane.b32.xlu1 %v7117_v38, %s7961_s22 }
 0x912   : > { %3623 = vrot.lane.b32.xlu0 %v7137_v13, %s7961_s22  ;;  %3613 = vrot.lane.b32.xlu1 %v7135_v17, %s7961_s22 }
 0x916   : > { %3217 = vrot.lane.b32.xlu0 %v7151_v57, %s5589_s28  ;;  %3215 = vrot.lane.b32.xlu1 %v7127_v46, %s5589_s28 }
 0x91a   : > { %3297 = vrot.lane.b32.xlu0 %v7151_v57, %s5590_s1  ;;  %3295 = vrot.lane.b32.xlu1 %v7127_v46, %s5590_s1 }
 0x91e   : > { %3377 = vrot.lane.b32.xlu0 %v7151_v57, %s5591_s2  ;;  %3375 = vrot.lane.b32.xlu1 %v7127_v46, %s5591_s2 }
 0x922   : > { %3457 = vrot.lane.b32.xlu0 %v7151_v57, %s7959_s30  ;;  %3455 = vrot.lane.b32.xlu1 %v7127_v46, %s7959_s30 }
 0x926   : > { %3537 = vrot.lane.b32.xlu0 %v7151_v57, %s7960_s11  ;;  %3535 = vrot.lane.b32.xlu1 %v7127_v46, %s7960_s11 }
 0x92a   : > { %3617 = vrot.lane.b32.xlu0 %v7151_v57, %s7961_s22  ;;  %3615 = vrot.lane.b32.xlu1 %v7127_v46, %s7961_s22 }
 0x92e   : > { %3231 = vrot.lane.b32.xlu0 %v7162_v41, %s5589_s28  ;;  %3233 = vrot.lane.b32.xlu1 %v7141_v22, %s5589_s28 }
 0x932   : > { %3311 = vrot.lane.b32.xlu0 %v7162_v41, %s5590_s1  ;;  %3225 = vrot.lane.b32.xlu1 %v7175_v49, %s5589_s28 }
 0x936   : > { %3391 = vrot.lane.b32.xlu0 %v7162_v41, %s5591_s2  ;;  %3313 = vrot.lane.b32.xlu1 %v7141_v22, %s5590_s1 }
 0x93a   : > { %3471 = vrot.lane.b32.xlu0 %v7162_v41, %s7959_s30  ;;  %3305 = vrot.lane.b32.xlu1 %v7175_v49, %s5590_s1 }
 0x93e   : > { %3551 = vrot.lane.b32.xlu0 %v7162_v41, %s7960_s11  ;;  %3393 = vrot.lane.b32.xlu1 %v7141_v22, %s5591_s2 }
 0x942   : > { %3631 = vrot.lane.b32.xlu0 %v7162_v41, %s7961_s22  ;;  %3385 = vrot.lane.b32.xlu1 %v7175_v49, %s5591_s2 }
 0x946   : > { %3235 = vrot.lane.b32.xlu0 %v7177_v40, %s5589_s28  ;;  %3473 = vrot.lane.b32.xlu1 %v7141_v22, %s7959_s30 }
 0x94a   : > { %3315 = vrot.lane.b32.xlu0 %v7177_v40, %s5590_s1  ;;  %3465 = vrot.lane.b32.xlu1 %v7175_v49, %s7959_s30 }
 0x94e   : > { %3395 = vrot.lane.b32.xlu0 %v7177_v40, %s5591_s2  ;;  %3553 = vrot.lane.b32.xlu1 %v7141_v22, %s7960_s11 }
 0x951   : > { %v3222_v45 = vpop.permute.xlu1 %3221 }
 0x952   : > { %3475 = vrot.lane.b32.xlu0 %v7177_v40, %s7959_s30  ;;  %3545 = vrot.lane.b32.xlu1 %v7175_v49, %s7960_s11 }
 0x956   : > { %3555 = vrot.lane.b32.xlu0 %v7177_v40, %s7960_s11  ;;  %3633 = vrot.lane.b32.xlu1 %v7141_v22, %s7961_s22 }
 0x958   : > { %v3220_v9 = vpop.permute.xlu0 %3219 }
 0x959   : > { %v7288_v43 = vsel %vm1635_vm4, %v3220_v9, %v3222_v45 }
 0x95a   : > { %3635 = vrot.lane.b32.xlu0 %v7177_v40, %s7961_s22  ;;  %3625 = vrot.lane.b32.xlu1 %v7175_v49, %s7961_s22 }
 0x95c   : > { %v3300_v2 = vpop.permute.xlu0 %3299  ;;  %v7294_v1 = vpop.permute.xlu1 %3213 }
 0x95e   : > { %3229 = vrot.lane.b32.xlu0 %v7187_v5, %s5589_s28  ;;  %3227 = vrot.lane.b32.xlu1 %v7165_v28, %s5589_s28  ;;  %s7963_s28 = smov 90  }
 0x960   : > { %v3380_v33 = vpop.permute.xlu0 %3379  ;;  %v3302_v21 = vpop.permute.xlu1 %3301 }
 0x961   : > { %v7301_v55 = vsel %vm1716_vm5, %v3300_v2, %v3302_v21 }
 0x962   : > { %3697 = vrot.lane.b32.xlu0 %v7151_v57, %s7962_s23  ;;  %3695 = vrot.lane.b32.xlu1 %v7127_v46, %s7962_s23 }
 0x964   : > { %v3460_v34 = vpop.permute.xlu0 %3459  ;;  %v7307_v14 = vpop.permute.xlu1 %3293 }
 0x966   : > { %3309 = vrot.lane.b32.xlu0 %v7187_v5, %s5590_s1  ;;  %3307 = vrot.lane.b32.xlu1 %v7165_v28, %s5590_s1 }
 0x968   : > { %v3540_v51 = vpop.permute.xlu0 %3539  ;;  %v3382_v10 = vpop.permute.xlu1 %3381 }
 0x969   : > { %v7314_v63 = vsel %vm1797_vm6, %v3380_v33, %v3382_v10 }
 0x96a   : > { %3703 = vrot.lane.b32.xlu0 %v7137_v13, %s7962_s23  ;;  %3701 = vrot.lane.b32.xlu1 %v7117_v38, %s7962_s23 }
 0x96c   : > { %v3620_v35 = vpop.permute.xlu0 %3619  ;;  %v7320_v0 = vpop.permute.xlu1 %3373 }
 0x96e   : > { %3389 = vrot.lane.b32.xlu0 %v7187_v5, %s5591_s2  ;;  %3387 = vrot.lane.b32.xlu1 %v7165_v28, %s5591_s2  ;;  %s7847_s2 = scalar_lea.sflag [#allocation6], %s608_s27 }
 0x970   : > { %v3224_v26 = vpop.permute.xlu0 %3223  ;;  %v3462_v24 = vpop.permute.xlu1 %3461 }
 0x971   : > { %v3240_v27 = vsel %vm1635_vm4, %v3222_v45, %v3224_v26  ;;  %3262 = vst.msk [vmem:[#allocation4 + $0x88] sm:$0xff] %vm1576_vm3, %v3224_v26  ;;  %v7329_v3 = vsel %vm1878_vm7, %v3460_v34, %v3462_v24 }
 0x972   : > { %3699 = vrot.lane.b32.xlu0 %v7124_v39, %s7962_s23  ;;  %3693 = vrot.lane.b32.xlu1 %v7135_v17, %s7962_s23 }
 0x974   : > { %v3304_v31 = vpop.permute.xlu0 %3303  ;;  %v7335_v11 = vpop.permute.xlu1 %3453 }
 0x975   : > { %v7338_v59 = vsel %vm1716_vm5, %v3302_v21, %v3304_v31  ;;  %3342 = vst.msk [vmem:[#allocation4 + $0xe8] sm:$0xff] %vm1576_vm3, %v3304_v31  ;;  %v3831_v31 = vld [vmem:[#allocation4 + $0x10] sm:$0xff] }
 0x976   : > { %3469 = vrot.lane.b32.xlu0 %v7187_v5, %s7959_s30  ;;  %3467 = vrot.lane.b32.xlu1 %v7165_v28, %s7959_s30  ;;  %s7798_s30 = smul.u32 96, %s608_s27 }
 0x978   : > { %v3384_v12 = vpop.permute.xlu0 %3383  ;;  %v3542_v19 = vpop.permute.xlu1 %3541 }
 0x979   : > { %v7346_v32 = vsel %vm1797_vm6, %v3382_v10, %v3384_v12  ;;  %3422 = vst.msk [vmem:[#allocation4 + $0x148] sm:$0xff] %vm1576_vm3, %v3384_v12  ;;  %v7350_v44 = vsel %vm1959_vm8, %v3540_v51, %v3542_v19 }
 0x97a   : > { %3715 = vrot.lane.b32.xlu0 %v7177_v40, %s7962_s23  ;;  %3713 = vrot.lane.b32.xlu1 %v7141_v22, %s7962_s23 }
 0x97c   : > { %v3464_v60 = vpop.permute.xlu0 %3463  ;;  %v7356_v36 = vpop.permute.xlu1 %3533 }
 0x97d   : > { %v7359_v37 = vsel %vm1878_vm7, %v3462_v24, %v3464_v60  ;;  %3502 = vst.msk [vmem:[#allocation4 + $0x1a8] sm:$0xff] %vm1576_vm3, %v3464_v60 }
 0x97e   : > { %3549 = vrot.lane.b32.xlu0 %v7187_v5, %s7960_s11  ;;  %3547 = vrot.lane.b32.xlu1 %v7165_v28, %s7960_s11  ;;  %s7809_s11 = scalar_lea.vmem [#allocation5], %s7798_s30  ;;  %s5529_s30 = scalar_lea.vmem %s5528_s24, 3072 }
 0x980   : > { %v3544_v20 = vpop.permute.xlu0 %3543  ;;  %v3622_v7 = vpop.permute.xlu1 %3621 }
 0x981   : > { %v7367_v30 = vsel %vm1959_vm8, %v3542_v19, %v3544_v20  ;;  %3582 = vst.msk [vmem:[#allocation4 + $0x208] sm:$0xff] %vm1576_vm3, %v3544_v20  ;;  %v7371_v4 = vsel %vm2040_vm9, %v3620_v35, %v3622_v7  ;;  %v3834_v20 = vld [vmem:[#allocation4 + $0x28] sm:$0xff] }
 0x982   : > { %3711 = vrot.lane.b32.xlu0 %v7162_v41, %s7962_s23  ;;  %3705 = vrot.lane.b32.xlu1 %v7175_v49, %s7962_s23 }
 0x984   : > { %v3624_v52 = vpop.permute.xlu0 %3623  ;;  %v3614_v56 = vpop.permute.xlu1 %3613  ;;  %v3882_v60 = vld [vmem:[#allocation4 + $0x1a8] sm:$0xff] }
 0x985   : > { %v7378_v25 = vsel %vm2040_vm9, %v3622_v7, %v3624_v52  ;;  %3662 = vst.msk [vmem:[#allocation4 + $0x268] sm:$0xff] %vm1576_vm3, %v3624_v52  ;;  %v5371_v7 = vpack.c.bf16 %v3834_v20, %v3831_v31 }
 0x986   : > { %3629 = vrot.lane.b32.xlu0 %v7187_v5, %s7961_s22  ;;  %3627 = vrot.lane.b32.xlu1 %v7165_v28, %s7961_s22  ;;  %s5434_s22 = smul.u32 1536, %s5724_s21 }
 0x988   : > { %v3218_v61 = vpop.permute.xlu0 %3217  ;;  %v3216_v18 = vpop.permute.xlu1 %3215  ;;  %s7839_s1 = scalar_lea.hbm %s7907_s19, %s5434_s22 }
 0x989   : > { %3259 = vst.msk [vmem:[#allocation4 + $0x70] sm:$0xff] %vm1576_vm3, %v3218_v61  ;;  %v3237_v58 = vsel %vm1635_vm4, %v7294_v1, %v3216_v18  ;;  %v3238_v42 = vsel %vm1635_vm4, %v3216_v18, %v3218_v61 }
 0x98a   : > { %3777 = vrot.lane.b32.xlu0 %v7151_v57, %s7963_s28  ;;  %3775 = vrot.lane.b32.xlu1 %v7127_v46, %s7963_s28  ;;  %v5305_v6 = vpack.c.bf16 %v3240_v27, %v3238_v42  ;;  %v5307_v50 = vpack.c.bf16 %v7288_v43, %v3237_v58  ;;  %v3146_v46 = vld [vmem:[%s7903_s15 + $0x8] sm:$0xff] }
 0x98b   : > { %4191 = vmatprep.mubr.f32.mxu1 %v3146_v46  ;;  %4013 = vmatprep.mubr.f32.mxu0 %v3146_v46 }
 0x98c   : > { %v3298_v54 = vpop.permute.xlu0 %3297  ;;  %v3296_v29 = vpop.permute.xlu1 %3295  ;;  %5306 = vmatprep.subr.bf16.mxu0 %v5305_v6 }
 0x98d   : > { %3339 = vst.msk [vmem:[#allocation4 + $0xd0] sm:$0xff] %vm1576_vm3, %v3298_v54  ;;  %v7397_v16 = vsel %vm1716_vm5, %v7307_v14, %v3296_v29  ;;  %v7400_v9 = vsel %vm1716_vm5, %v3296_v29, %v3298_v54  ;;  %5308 = vmatpush1.bf16.msra.mxu0 %v5307_v50 }
 0x98e   : > { %3709 = vrot.lane.b32.xlu0 %v7187_v5, %s7962_s23  ;;  %3707 = vrot.lane.b32.xlu1 %v7165_v28, %s7962_s23  ;;  %v5313_v57 = vpack.c.bf16 %v7338_v59, %v7400_v9  ;;  %v5315_v45 = vpack.c.bf16 %v7301_v55, %v7397_v16  ;;  %s4664_s23 = sshll.u32 %s7809_s11, 4  ;;  %s7833_s23 = int_to_ptr.vmem [resolvable:$true] %s4664_s23 }
 0x98f   : > { %s5523_s29 = scalar_lea.vmem %s7833_s23, 1536  ;;  %p5530_p0 = scmp.lt.s32.totalorder %s7833_s23, %s5528_s24 }
 0x990   : > { %v3378_v43 = vpop.permute.xlu0 %3377  ;;  %v3376_v2 = vpop.permute.xlu1 %3375  ;;  %p5524_p11 = scmp.ne.s32.totalorder %s7833_s23, %s5523_s29  ;;  %p5531_p1 = scmp.lt.s32.totalorder %s5529_s30, %s5523_s29 }
 0x991   : > { %3419 = vst.msk [vmem:[#allocation4 + $0x130] sm:$0xff] %vm1576_vm3, %v3378_v43  ;;  %v7416_v1 = vsel %vm1797_vm6, %v7320_v0, %v3376_v2  ;;  %v7419_v33 = vsel %vm1797_vm6, %v3376_v2, %v3378_v43 }
 0x992   : > { %3783 = vrot.lane.b32.xlu0 %v7137_v13, %s7963_s28  ;;  %3781 = vrot.lane.b32.xlu1 %v7117_v38, %s7963_s28  ;;  %v5321_v21 = vpack.c.bf16 %v7346_v32, %v7419_v33  ;;  %v5323_v34 = vpack.c.bf16 %v7314_v63, %v7416_v1  ;;  %p5525_p12 = pnand %p5524_p11, %p5741_p5  ;;  %p5532_p2 = por %p5531_p1, %p5530_p0 }
 0x994   : > { %v3458_v14 = vpop.permute.xlu0 %3457  ;;  %v3456_v51 = vpop.permute.xlu1 %3455  ;;  %p5526_p13 = pneg %p5525_p12 }
 0x995   : > { %3499 = vst.msk [vmem:[#allocation4 + $0x190] sm:$0xff] %vm1576_vm3, %v3458_v14  ;;  %v7432_v10 = vsel %vm1878_vm7, %v7335_v11, %v3456_v51  ;;  %v7435_v35 = vsel %vm1878_vm7, %v3456_v51, %v3458_v14 }
 0x996   : > { %3779 = vrot.lane.b32.xlu0 %v7124_v39, %s7963_s28  ;;  %3773 = vrot.lane.b32.xlu1 %v7135_v17, %s7963_s28  ;;  %v5329_v38 = vpack.c.bf16 %v7359_v37, %v7435_v35  ;;  %v5331_v13 = vpack.c.bf16 %v7329_v3, %v7432_v10  ;;  %p5533_p3 = pnand %p5532_p2, %p5526_p13 }
 0x998   : > { %v3538_v0 = vpop.permute.xlu0 %3537  ;;  %v3536_v26 = vpop.permute.xlu1 %3535 }
 0x999   : > { %3579 = vst.msk [vmem:[#allocation4 + $0x1f0] sm:$0xff] %vm1576_vm3, %v3538_v0  ;;  %v7448_v24 = vsel %vm1959_vm8, %v7356_v36, %v3536_v26  ;;  %v7451_v27 = vsel %vm1959_vm8, %v3536_v26, %v3538_v0 }
 0x99a   : > { %3795 = vrot.lane.b32.xlu0 %v7177_v40, %s7963_s28  ;;  %3793 = vrot.lane.b32.xlu1 %v7141_v22, %s7963_s28  ;;  %v5337_v39 = vpack.c.bf16 %v7367_v30, %v7451_v27  ;;  %v5339_v17 = vpack.c.bf16 %v7350_v44, %v7448_v24  ;;  %v3894_v27 = vld [vmem:[#allocation4 + $0x208] sm:$0xff] }
 0x99c   : > { %v3618_v11 = vpop.permute.xlu0 %3617  ;;  %v3616_v12 = vpop.permute.xlu1 %3615  ;;  %v3879_v19 = vld [vmem:[#allocation4 + $0x190] sm:$0xff] }
 0x99d   : > { %3659 = vst.msk [vmem:[#allocation4 + $0x250] sm:$0xff] %vm1576_vm3, %v3618_v11  ;;  %v7463_v36 = vsel %vm2040_vm9, %v3614_v56, %v3616_v12  ;;  %v7466_v40 = vsel %vm2040_vm9, %v3616_v12, %v3618_v11  ;;  %v5369_v22 = vpack.c.bf16 %v3882_v60, %v3879_v19 }
 0x99e   : > { %3789 = vrot.lane.b32.xlu0 %v7187_v5, %s7963_s28  ;;  %3787 = vrot.lane.b32.xlu1 %v7165_v28, %s7963_s28  ;;  %v5345_v52 = vpack.c.bf16 %v7378_v25, %v7466_v40  ;;  %v7964_v25 = vpack.c.bf16 %v7371_v4, %v7463_v36  ;;  %v3858_v36 = vld [vmem:[#allocation4 + $0xe8] sm:$0xff] }
 0x99f   : > { %5370 = vmatprep.subr.bf16.mxu1 %v5369_v22 }
 0x9a0   : > { %v3232_v56 = vpop.permute.xlu0 %3231  ;;  %5372 = vmatpush3.bf16.msra.mxu1 %v5371_v7  ;;  %v3234_v18 = vpop.permute.xlu1 %3233 }
 0x9a1   : > { %v3243_v58 = vsel %vm1635_vm4, %v3232_v56, %v3234_v18 }
 0x9a2   : > { %3791 = vrot.lane.b32.xlu0 %v7162_v41, %s7963_s28  ;;  %3785 = vrot.lane.b32.xlu1 %v7175_v49, %s7963_s28  ;;  %s7965_s28 = smov 1  }
 0x9a4   : > { %v3312_v28 = vpop.permute.xlu0 %3311  ;;  %v3226_v5 = vpop.permute.xlu1 %3225 }
 0x9a8   : > { %v3392_v42 = vpop.permute.xlu0 %3391  ;;  %v3314_v6 = vpop.permute.xlu1 %3313 }
 0x9a9   : > { %v7482_v50 = vsel %vm1716_vm5, %v3312_v28, %v3314_v6 }
 0x9ac   : > { %v3472_v54 = vpop.permute.xlu0 %3471  ;;  %v3306_v29 = vpop.permute.xlu1 %3305 }
 0x9b0   : > { %v3552_v46 = vpop.permute.xlu0 %3551  ;;  %v3394_v43 = vpop.permute.xlu1 %3393 }
 0x9b1   : > { %v7485_v2 = vsel %vm1797_vm6, %v3392_v42, %v3394_v43 }
 0x9b4   : > { %v3632_v14 = vpop.permute.xlu0 %3631  ;;  %v3386_v51 = vpop.permute.xlu1 %3385 }
 0x9b8   : > { %v3236_v41 = vpop.permute.xlu0 %3235  ;;  %v3474_v0 = vpop.permute.xlu1 %3473 }
 0x9b9   : > { %v3244_v49 = vsel %vm1635_vm4, %v3234_v18, %v3236_v41  ;;  %3268 = vst.msk [vmem:[#allocation4 + $0xb8] sm:$0xff] %vm1576_vm3, %v3236_v41  ;;  %v7490_v26 = vsel %vm1878_vm7, %v3472_v54, %v3474_v0 }
 0x9bc   : > { %v3316_v31 = vpop.permute.xlu0 %3315  ;;  %v7492_v11 = vpop.permute.xlu1 %3465 }
 0x9bd   : > { %v3324_v12 = vsel %vm1716_vm5, %v3314_v6, %v3316_v31  ;;  %3348 = vst.msk [vmem:[#allocation4 + $0x118] sm:$0xff] %vm1576_vm3, %v3316_v31 }
 0x9c0   : > { %v3396_v19 = vpop.permute.xlu0 %3395  ;;  %v3554_v60 = vpop.permute.xlu1 %3553 }
 0x9c1   : > { %v3404_v22 = vsel %vm1797_vm6, %v3394_v43, %v3396_v19  ;;  %3428 = vst.msk [vmem:[#allocation4 + $0x178] sm:$0xff] %vm1576_vm3, %v3396_v19  ;;  %v7499_v20 = vsel %vm1959_vm8, %v3552_v46, %v3554_v60 }
 0x9c4   : > { %v3476_v7 = vpop.permute.xlu0 %3475  ;;  %v7501_v56 = vpop.permute.xlu1 %3545 }
 0x9c5   : > { %v7504_v18 = vsel %vm1878_vm7, %v3474_v0, %v3476_v7  ;;  %3508 = vst.msk [vmem:[#allocation4 + $0x1d8] sm:$0xff] %vm1576_vm3, %v3476_v7 }
 0x9c8   : > { %v3556_v28 = vpop.permute.xlu0 %3555  ;;  %v3634_v42 = vpop.permute.xlu1 %3633 }
 0x9c9   : > { %v7508_v6 = vsel %vm1959_vm8, %v3554_v60, %v3556_v28  ;;  %3588 = vst.msk [vmem:[#allocation4 + $0x238] sm:$0xff] %vm1576_vm3, %v3556_v28  ;;  %v7512_v54 = vsel %vm2040_vm9, %v3632_v14, %v3634_v42 }
 0x9cc   : > { %v3636_v46 = vpop.permute.xlu0 %3635  ;;  %v7514_v43 = vpop.permute.xlu1 %3625 }
 0x9cd   : > { %v7517_v41 = vsel %vm2040_vm9, %v3634_v42, %v3636_v46  ;;  %3668 = vst.msk [vmem:[#allocation4 + $0x298] sm:$0xff] %vm1576_vm3, %v3636_v46 }
 0x9d0   : > { %v3230_v0 = vpop.permute.xlu0 %3229  ;;  %v3228_v31 = vpop.permute.xlu1 %3227 }
 0x9d1   : > { %3265 = vst.msk [vmem:[#allocation4 + $0xa0] sm:$0xff] %vm1576_vm3, %v3230_v0  ;;  %v3241_v19 = vsel %vm1635_vm4, %v3226_v5, %v3228_v31  ;;  %v3242_v60 = vsel %vm1635_vm4, %v3228_v31, %v3230_v0 }
 0x9d2   : > { %v5309_v7 = vpack.c.bf16 %v3244_v49, %v3242_v60  ;;  %v5311_v28 = vpack.c.bf16 %v3243_v58, %v3241_v19  ;;  %v3840_v60 = vld [vmem:[#allocation4 + $0x58] sm:$0xff] }
 0x9d4   : > { %v3698_v14 = vpop.permute.xlu0 %3697  ;;  %v3696_v15 = vpop.permute.xlu1 %3695  ;;  %5310 = vmatprep.subr.bf16.mxu0 %v5309_v7 }
 0x9d5   : > { %3739 = vst.msk [vmem:[#allocation4 + $0x2b0] sm:$0xff] %vm1576_vm3, %v3698_v14  ;;  %v7525_v42 = vsel %vm2121_vm10, %v3696_v15, %v3698_v14  ;;  %5312 = vmatpush1.bf16.msra.mxu0 %v5311_v28  ;;  %v3843_v14 = vld [vmem:[#allocation4 + $0x70] sm:$0xff] }
 0x9d6   : > { %5314 = vmatprep.subr.bf16.mxu0 %v5313_v57 }
 0x9d8   : > { %v3310_v46 = vpop.permute.xlu0 %3309  ;;  %v3308_v61 = vpop.permute.xlu1 %3307  ;;  %v3849_v24 = vld [vmem:[#allocation4 + $0xa0] sm:$0xff] }
 0x9d9   : > { %3345 = vst.msk [vmem:[#allocation4 + $0x100] sm:$0xff] %vm1576_vm3, %v3310_v46  ;;  %v3321_v5 = vsel %vm1716_vm5, %v3306_v29, %v3308_v61  ;;  %v3322_v58 = vsel %vm1716_vm5, %v3308_v61, %v3310_v46  ;;  %5316 = vmatpush1.bf16.msra.mxu0 %v5315_v45 }
 0x9da   : > { %v5317_v49 = vpack.c.bf16 %v3324_v12, %v3322_v58  ;;  %v5319_v0 = vpack.c.bf16 %v7482_v50, %v3321_v5  ;;  %v3891_v12 = vld [vmem:[#allocation4 + $0x1f0] sm:$0xff]  ;;  %v3846_v58 = vld [vmem:[#allocation4 + $0x88] sm:$0xff] }
 0x9db   : > { %v5377_v28 = vpack.c.bf16 %v3894_v27, %v3891_v12  ;;  %v5379_v44 = vpack.c.bf16 %v3846_v58, %v3843_v14  ;;  %v3149_v27 = vld [vmem:[%s7903_s15 + $0x20] sm:$0xff]  ;;  %v3876_v58 = vld [vmem:[#allocation4 + $0x178] sm:$0xff] }
 0x9dc   : > { %v3704_v31 = vpop.permute.xlu0 %3703  ;;  %v3702_v19 = vpop.permute.xlu1 %3701  ;;  %5318 = vmatprep.subr.bf16.mxu0 %v5317_v49  ;;  %v3900_v49 = vld [vmem:[#allocation4 + $0x238] sm:$0xff] }
 0x9dd   : > { %3742 = vst.msk [vmem:[#allocation4 + $0x2c8] sm:$0xff] %vm1576_vm3, %v3704_v31  ;;  %v7539_v59 = vsel %vm2121_vm10, %v3702_v19, %v3704_v31  ;;  %5320 = vmatpush1.bf16.msra.mxu0 %v5319_v0  ;;  %v3903_v0 = vld [vmem:[#allocation4 + $0x250] sm:$0xff] }
 0x9de   : > { %5322 = vmatprep.subr.bf16.mxu0 %v5321_v21 }
 0x9e0   : > { %v3390_v9 = vpop.permute.xlu0 %3389  ;;  %v3388_v57 = vpop.permute.xlu1 %3387 }
 0x9e1   : > { %3425 = vst.msk [vmem:[#allocation4 + $0x160] sm:$0xff] %vm1576_vm3, %v3390_v9  ;;  %v3401_v55 = vsel %vm1797_vm6, %v3386_v51, %v3388_v57  ;;  %v3402_v16 = vsel %vm1797_vm6, %v3388_v57, %v3390_v9  ;;  %5324 = vmatpush1.bf16.msra.mxu0 %v5323_v34  ;;  %v3852_v57 = vld [vmem:[#allocation4 + $0xb8] sm:$0xff] }
 0x9e2   : > { %v5325_v45 = vpack.c.bf16 %v3404_v22, %v3402_v16  ;;  %v5327_v61 = vpack.c.bf16 %v7485_v2, %v3401_v55  ;;  %v5383_v40 = vpack.c.bf16 %v3852_v57, %v3849_v24  ;;  %v3148_v24 = vld [vmem:[%s7903_s15 + $0x18] sm:$0xff]  ;;  %v3151_v57 = vld [vmem:[%s7903_s15 + $0x30] sm:$0xff] }
 0x9e4   : > { %v3700_v50 = vpop.permute.xlu0 %3699  ;;  %v3694_v29 = vpop.permute.xlu1 %3693  ;;  %5326 = vmatprep.subr.bf16.mxu0 %v5325_v45 }
 0x9e5   : > { %v7552_v32 = vsel %vm2121_vm10, %v3700_v50, %v3702_v19  ;;  %v7555_v33 = vsel %vm2121_vm10, %v3694_v29, %v3696_v15  ;;  %5328 = vmatpush1.bf16.msra.mxu0 %v5327_v61  ;;  %v3855_v61 = vld [vmem:[#allocation4 + $0xd0] sm:$0xff]  ;;  %v5353_v29 = vpack.c.bf16 %v7539_v59, %v7525_v42 }
 0x9e6   : > { %5330 = vmatprep.subr.bf16.mxu0 %v5329_v38  ;;  %v3837_v38 = vld [vmem:[#allocation4 + $0x40] sm:$0xff] }
 0x9e7   : > { %v5375_v30 = vpack.c.bf16 %v3840_v60, %v3837_v38 }
 0x9e8   : > { %v3470_v21 = vpop.permute.xlu0 %3469  ;;  %v3468_v63 = vpop.permute.xlu1 %3467 }
 0x9e9   : > { %3505 = vst.msk [vmem:[#allocation4 + $0x1c0] sm:$0xff] %vm1576_vm3, %v3470_v21  ;;  %v3481_v1 = vsel %vm1878_vm7, %v7492_v11, %v3468_v63  ;;  %v3482_v34 = vsel %vm1878_vm7, %v3468_v63, %v3470_v21  ;;  %5332 = vmatpush1.bf16.msra.mxu0 %v5331_v13  ;;  %v3888_v11 = vld [vmem:[#allocation4 + $0x1d8] sm:$0xff]  ;;  %v5355_v21 = vpack.c.bf16 %v7552_v32, %v7555_v33 }
 0x9ea   : > { %v5333_v15 = vpack.c.bf16 %v7504_v18, %v3482_v34  ;;  %v5335_v2 = vpack.c.bf16 %v7490_v26, %v3481_v1 }
 0x9ec   : > { %v3716_v51 = vpop.permute.xlu0 %3715  ;;  %v3714_v37 = vpop.permute.xlu1 %3713  ;;  %5334 = vmatprep.subr.bf16.mxu0 %v5333_v15  ;;  %v3912_v15 = vld [vmem:[#allocation4 + $0x298] sm:$0xff] }
 0x9ed   : > { %3748 = vst.msk [vmem:[#allocation4 + $0x2f8] sm:$0xff] %vm1576_vm3, %v3716_v51  ;;  %v7571_v35 = vsel %vm2121_vm10, %v3714_v37, %v3716_v51  ;;  %5336 = vmatpush1.bf16.msra.mxu0 %v5335_v2  ;;  %v3918_v2 = vld [vmem:[#allocation4 + $0x2c8] sm:$0xff] }
 0x9ee   : > { %5338 = vmatprep.subr.bf16.mxu0 %v5337_v39 }
 0x9f0   : > { %v3550_v3 = vpop.permute.xlu0 %3549  ;;  %v3548_v10 = vpop.permute.xlu1 %3547  ;;  %v3885_v13 = vld [vmem:[#allocation4 + $0x1c0] sm:$0xff] }
 0x9f1   : > { %3585 = vst.msk [vmem:[#allocation4 + $0x220] sm:$0xff] %vm1576_vm3, %v3550_v3  ;;  %v3561_v26 = vsel %vm1959_vm8, %v7501_v56, %v3548_v10  ;;  %v3562_v22 = vsel %vm1959_vm8, %v3548_v10, %v3550_v3  ;;  %v5373_v18 = vpack.c.bf16 %v3888_v11, %v3885_v13  ;;  %5340 = vmatpush1.bf16.msra.mxu0 %v5339_v17  ;;  %v3915_v3 = vld [vmem:[#allocation4 + $0x2b0] sm:$0xff] }
 0x9f2   : > { %v5341_v39 = vpack.c.bf16 %v7508_v6, %v3562_v22  ;;  %v5343_v7 = vpack.c.bf16 %v7499_v20, %v3561_v26  ;;  %v5393_v33 = vpack.c.bf16 %v3918_v2, %v3915_v3  ;;  %v3867_v13 = vld [vmem:[#allocation4 + $0x130] sm:$0xff]  ;;  %v3870_v22 = vld [vmem:[#allocation4 + $0x148] sm:$0xff] }
 0x9f3   : > { %5374 = vmatprep.subr.bf16.mxu1 %v5373_v18  ;;  %v5395_v18 = vpack.c.bf16 %v3870_v22, %v3867_v13 }
 0x9f4   : > { %v3712_v46 = vpop.permute.xlu0 %3711  ;;  %5376 = vmatpush3.bf16.msra.mxu1 %v5375_v30  ;;  %v3706_v56 = vpop.permute.xlu1 %3705  ;;  %5342 = vmatprep.subr.bf16.mxu0 %v5341_v39  ;;  %v3873_v30 = vld [vmem:[#allocation4 + $0x160] sm:$0xff]  ;;  %v3924_v14 = vld [vmem:[#allocation4 + $0x2f8] sm:$0xff] }
 0x9f5   : > { %v7586_v5 = vsel %vm2121_vm10, %v3712_v46, %v3714_v37  ;;  %5378 = vmatprep.subr.bf16.mxu1 %v5377_v28  ;;  %5344 = vmatpush1.bf16.msra.mxu0 %v5343_v7  ;;  %v3864_v37 = vld [vmem:[#allocation4 + $0x118] sm:$0xff] }
 0x9f6   : > { %5346 = vmatprep.subr.bf16.mxu0 %v5345_v52  ;;  %v3906_v52 = vld [vmem:[#allocation4 + $0x268] sm:$0xff] }
 0x9f7   : > { %v5385_v45 = vpack.c.bf16 %v3906_v52, %v3903_v0 }
 0x9f8   : > { %v3630_v17 = vpop.permute.xlu0 %3629  ;;  %5380 = vmatpush3.bf16.msra.mxu1 %v5379_v44  ;;  %v3628_v20 = vpop.permute.xlu1 %3627  ;;  %v3897_v6 = vld [vmem:[#allocation4 + $0x220] sm:$0xff]  ;;  %v5399_v44 = vpack.c.bf16 %v3876_v58, %v3873_v30 }
 0x9f9   : > { %3665 = vst.msk [vmem:[#allocation4 + $0x280] sm:$0xff] %vm1576_vm3, %v3630_v17  ;;  %v3641_v31 = vsel %vm2040_vm9, %v7514_v43, %v3628_v20  ;;  %v3642_v19 = vsel %vm2040_vm9, %v3628_v20, %v3630_v17  ;;  %v5381_v9 = vpack.c.bf16 %v3900_v49, %v3897_v6  ;;  %5348 = vmatpush1.bf16.msra.mxu0 %v7964_v25  ;;  %v3152_v20 = vld [vmem:[%s7903_s15 + $0x38] sm:$0xff]  ;;  %v3155_v25 = vld [vmem:[%s7903_s15 + $0x50] sm:$0xff] }
 0x9fa   : > { %v5349_v55 = vpack.c.bf16 %v7517_v41, %v3642_v19  ;;  %v5351_v16 = vpack.c.bf16 %v7512_v54, %v3641_v31  ;;  %v5387_v41 = vpack.c.bf16 %v3858_v36, %v3855_v61  ;;  %v3861_v54 = vld [vmem:[#allocation4 + $0x100] sm:$0xff] }
 0x9fb   : > { %5382 = vmatprep.subr.bf16.mxu1 %v5381_v9  ;;  %v5391_v38 = vpack.c.bf16 %v3864_v37, %v3861_v54 }
 0x9fc   : > { %v3778_v50 = vpop.permute.xlu0 %3777  ;;  %5384 = vmatpush3.bf16.msra.mxu1 %v5383_v40  ;;  %v3776_v43 = vpop.permute.xlu1 %3775  ;;  %5350 = vmatprep.subr.bf16.mxu0 %v5349_v55 }
 0x9fd   : > { %3819 = vst.msk [vmem:[#allocation4 + $0x310] sm:$0xff] %vm1576_vm3, %v3778_v50  ;;  %5386 = vmatprep.subr.bf16.mxu1 %v5385_v45  ;;  %v3798_v4 = vsel %vm2202_vm11, %v3776_v43, %v3778_v50  ;;  %5352 = vmatpush1.bf16.msra.mxu0 %v5351_v16  ;;  %v3154_v16 = vld [vmem:[%s7903_s15 + $0x48] sm:$0xff] }
 0x9fe   : > { %5354 = vmatprep.subr.bf16.mxu0 %v5353_v29 }
 0xa00   : > { %v3710_v63 = vpop.permute.xlu0 %3709  ;;  %5388 = vmatpush3.bf16.msra.mxu1 %v5387_v41  ;;  %v3708_v1 = vpop.permute.xlu1 %3707  ;;  %v3909_v34 = vld [vmem:[#allocation4 + $0x280] sm:$0xff] }
 0xa01   : > { %3745 = vst.msk [vmem:[#allocation4 + $0x2e0] sm:$0xff] %vm1576_vm3, %v3710_v63  ;;  %v3721_v42 = vsel %vm2121_vm10, %v3706_v56, %v3708_v1  ;;  %v3722_v59 = vsel %vm2121_vm10, %v3708_v1, %v3710_v63  ;;  %v5389_v51 = vpack.c.bf16 %v3912_v15, %v3909_v34  ;;  %5356 = vmatpush1.bf16.msra.mxu0 %v5355_v21  ;;  %v3147_v21 = vld [vmem:[%s7903_s15 + $0x10] sm:$0xff]  ;;  %v3150_v63 = vld [vmem:[%s7903_s15 + $0x28] sm:$0xff]  ;;  %v3153_v1 = vld [vmem:[%s7903_s15 + $0x40] sm:$0xff] }
 0xa02   : > { %v5357_v10 = vpack.c.bf16 %v7571_v35, %v3722_v59  ;;  %v5359_v32 = vpack.c.bf16 %v7586_v5, %v3721_v42  ;;  %v3145_v35 = vld [vmem:[%s7903_s15] sm:$0xff]  ;;  %v3156_v34 = vld [vmem:[%s7903_s15 + $0x58] sm:$0xff] }
 0xa03   : > { %5390 = vmatprep.subr.bf16.mxu1 %v5389_v51  ;;  %v5519_v15 = vld [vmem:[%s7906_s18] sm:$0xff] }
 0xa04   : > { %v3784_v11 = vpop.permute.xlu0 %3783  ;;  %5392 = vmatpush3.bf16.msra.mxu1 %v5391_v38  ;;  %v3782_v12 = vpop.permute.xlu1 %3781  ;;  %5358 = vmatprep.subr.bf16.mxu0 %v5357_v10  ;;  %v3927_v0 = vld [vmem:[#allocation4 + $0x310] sm:$0xff] }
 0xa05   : > { %3822 = vst.msk [vmem:[#allocation4 + $0x328] sm:$0xff] %vm1576_vm3, %v3784_v11  ;;  %5394 = vmatprep.subr.bf16.mxu1 %v5393_v33  ;;  %v3800_v26 = vsel %vm2202_vm11, %v3782_v12, %v3784_v11  ;;  %5360 = vmatpush1.bf16.msra.mxu0 %v5359_v32 }
 0xa06   : > { %v5361_v60 = vpack.c.bf16 %v3800_v26, %v3798_v4 }
 0xa08   : > { %v3780_v39 = vpop.permute.xlu0 %3779  ;;  %5396 = vmatpush3.bf16.msra.mxu1 %v5395_v18  ;;  %v3774_v7 = vpop.permute.xlu1 %3773  ;;  %v3921_v28 = vld [vmem:[#allocation4 + $0x2e0] sm:$0xff]  ;;  %5362 = vmatprep.subr.bf16.mxu0 %v5361_v60 }
 0xa09   : > { %v3799_v46 = vsel %vm2202_vm11, %v3780_v39, %v3782_v12  ;;  %v3797_v56 = vsel %vm2202_vm11, %v3774_v7, %v3776_v43  ;;  %v5397_v5 = vpack.c.bf16 %v3924_v14, %v3921_v28  ;;  %4014 = vmatmul.mubr.f32.vlgmr.msra.gmra.mrb[24].mxu0 %v3145_v35 }
 0xa0a   : > { %v5363_v17 = vpack.c.bf16 %v3799_v46, %v3797_v56  ;;  %4019 = vmatprep.mubr.f32.mxu0 %v3149_v27 }
 0xa0b   : > { %5398 = vmatprep.subr.bf16.mxu1 %v5397_v5 }
 0xa0c   : > { %v3796_v6 = vpop.permute.xlu0 %3795  ;;  %5400 = vmatpush3.bf16.msra.mxu1 %v5399_v44  ;;  %v3794_v49 = vpop.permute.xlu1 %3793  ;;  %v3930_v31 = vld [vmem:[#allocation4 + $0x328] sm:$0xff]  ;;  %5364 = vmatpush1.bf16.msra.mxu0 %v5363_v17 }
 0xa0d   : > { %3828 = vst.msk [vmem:[#allocation4 + $0x358] sm:$0xff] %vm1576_vm3, %v3796_v6  ;;  %v3804_v19 = vsel %vm2202_vm11, %v3794_v49, %v3796_v6  ;;  %v5401_v9 = vpack.c.bf16 %v3930_v31, %v3927_v0  ;;  %4020 = vmatmul.mubr.f32.gmra.mrb[26].mxu0 %v3148_v24 }
 0xa0e   : > { %4025 = vmatprep.mubr.f32.mxu0 %v3152_v20 }
 0xa0f   : > { %4192 = vmatmul.mubr.f32.vlgmr.msra.gmra.mrb[36].mxu1 %v3145_v35  ;;  %5402 = vmatprep.subr.bf16.mxu1 %v5401_v9 }
 0xa10   : > { %v3790_v40 = vpop.permute.xlu0 %3789  ;;  %5404 = vmatpush3.bf16.msra.mxu1 %v5401_v9  ;;  %v3788_v52 = vpop.permute.xlu1 %3787  ;;  %4196 = vmatprep.mubr.f32.mxu1 %v3149_v27 }
 0xa11   : > { %3825 = vst.msk [vmem:[#allocation4 + $0x340] sm:$0xff] %vm1576_vm3, %v3790_v40  ;;  %v3802_v55 = vsel %vm2202_vm11, %v3788_v52, %v3790_v40  ;;  %4026 = vmatmul.mubr.f32.gmra.mrb[28].mxu0 %v3151_v57 }
 0xa12   : > { %v5365_v45 = vpack.c.bf16 %v3804_v19, %v3802_v55  ;;  %4031 = vmatprep.mubr.f32.mxu0 %v3155_v25 }
 0xa13   : > { %4197 = vmatmul.mubr.f32.gmra.mrb[38].mxu1 %v3148_v24 }
 0xa14   : > { %v3792_v61 = vpop.permute.xlu0 %3791  ;;  %v3786_v50 = vpop.permute.xlu1 %3785  ;;  %4201 = vmatprep.mubr.f32.mxu1 %v3152_v20  ;;  %5366 = vmatprep.subr.bf16.mxu0 %v5365_v45  ;;  %v3936_v41 = vld [vmem:[#allocation4 + $0x358] sm:$0xff] }
 0xa15   : > { %v3803_v43 = vsel %vm2202_vm11, %v3792_v61, %v3794_v49  ;;  %v3801_v29 = vsel %vm2202_vm11, %v3786_v50, %v3788_v52  ;;  %4032 = vmatmul.mubr.f32.gmra.mrb[30].mxu0 %v3154_v16 }
 0xa16   : > { %v5367_v4 = vpack.c.bf16 %v3803_v43, %v3801_v29  ;;  %4102 = vmatprep.mubr.f32.mxu0 %v7957_v62 }
 0xa17   : > { %4202 = vmatmul.mubr.f32.gmra.mrb[40].mxu1 %v3151_v57 }
 0xa18   : > { %4206 = vmatprep.mubr.f32.mxu1 %v3155_v25  ;;  %v3933_v36 = vld [vmem:[#allocation4 + $0x340] sm:$0xff]  ;;  %5368 = vmatpush1.bf16.msra.mxu0 %v5367_v4 }
 0xa19   : > { %v5405_v54 = vpack.c.bf16 %v3936_v41, %v3933_v36 }
 0xa1b   : > { %4207 = vmatmul.mubr.f32.gmra.mrb[42].mxu1 %v3154_v16  ;;  %5406 = vmatprep.subr.bf16.mxu1 %v5405_v54 }
 0xa1c   : > { %5408 = vmatpush3.bf16.msra.mxu1 %v5405_v54  ;;  %5021 = vmatprep.mubr.msk.f32.mxu1 %vm865_vm1, %v3147_v21 }
 0xa1d   : > { %4770 = vmatmul.mubr.msk.f32.vlgmr.msra.gmra.mrb[24].mxu0 %vm865_vm1, %v3147_v21 }
 0xa1e   : > { %4108 = vmatprep.mubr.f32.mxu0 %v7957_v62 }
 0xa1f   : > { %5022 = vmatmul.mubr.msk.f32.vlgmr.msra.gmra.mrb[44].mxu1 %vm865_vm1, %v3150_v63 }
 0xa20   : > { %5024 = vmatprep.mubr.msk.f32.mxu1 %vm865_vm1, %v3153_v1 }
 0xa21   : > { %4771 = vmatmul.mubr.msk.f32.gmra.mrb[26].mxu0 %vm865_vm1, %v3150_v63 }
 0xa22   : > { %4114 = vmatprep.mubr.f32.mxu0 %v7957_v62 }
 0xa23   : > { %5025 = vmatmul.mubr.msk.f32.gmra.mrb[46].mxu1 %vm865_vm1, %v3156_v34 }
 0xa24   : > { %5035 = vmatprep.mubr.msk.f32.mxu1 %vm865_vm1, %v5519_v15 }
 0xa25   : > { %4772 = vmatmul.mubr.msk.f32.gmra.mrb[28].mxu0 %vm865_vm1, %v3153_v1 }
 0xa26   : > { %4120 = vmatprep.mubr.f32.mxu0 %v7957_v62 }
 0xa29   : > { %4773 = vmatmul.mubr.msk.f32.gmra.mrb[30].mxu0 %vm865_vm1, %v3156_v34 }
 0xae2   : > { %v4935_v2 = vpop.f32.mrb[36].mxu1 }
 0xae3   : > { %v4936_v42 = vpop.f32.mrb[37].mxu1 }
 0xae4   : > { %v4937_v59 = vadd.f32 %v4936_v42, %v4935_v2 }
 0xae6   : > { %v4938_v51 = vpop.f32.mrb[38].mxu1 }
 0xae7   : > { %v4939_v37 = vpop.f32.mrb[39].mxu1 }
 0xae8   : > { %v4940_v38 = vadd.f32 %v4939_v37, %v4938_v51 }
 0xaea   : > { %v4941_v3 = vpop.f32.mrb[40].mxu1 }
 0xaeb   : > { %v4942_v10 = vpop.f32.mrb[41].mxu1 }
 0xaec   : > { %v4943_v32 = vadd.f32 %v4942_v10, %v4941_v3 }
 0xaee   : > { %v4944_v33 = vpop.f32.mrb[42].mxu1 }
 0xaef   : > { %v4945_v13 = vpop.f32.mrb[43].mxu1 }
 0xaf0   : > { %v4946_v11 = vadd.f32 %v4945_v13, %v4944_v33  ;;  %v7670_v12 = vpop.f32.mrb[24].mxu0 }
 0xaf1   : > { %v4297_v26 = vmul.f32 %v7670_v12, %v6930_v8  ;;  %v7674_v62 = vpop.f32.mrb[25].mxu0 }
 0xaf2   : > { %v5023_v22 = vpop.f32.mrb[44].mxu1  ;;  %v4298_v18 = vmul.f32 %v7674_v62, %v6932_v47 }
 0xaf3   : > { %v7678_v35 = vadd.f32 %v5023_v22, %v4940_v38  ;;  %v4278_v60 = vpop.f32.mrb[45].mxu1  ;;  %v4329_v30 = vmul.f32 %v4297_v26, %v4297_v26 }
 0xaf4   : > { %v7680_v27 = vadd.f32 %v4937_v59, %v4278_v60  ;;  %v4309_v39 = vadd.f32 %v4298_v18, %v4297_v26  ;;  %v4330_v7 = vmul.f32 %v4298_v18, %v4298_v18  ;;  %v7682_v28 = vpop.f32.mrb[26].mxu0 }
 0xaf5   : > { %v4302_v14 = vmul.f32 %v7678_v35, %v6936_v23  ;;  %v4300_v46 = vmul.f32 %v7682_v28, %v6930_v8  ;;  %v7688_v56 = vpop.f32.mrb[27].mxu0 }
 0xaf6   : > { %v4299_v5 = vmul.f32 %v7680_v27, %v6936_v23  ;;  %v5026_v58 = vpop.f32.mrb[46].mxu1  ;;  %v4341_v44 = vadd.f32 %v4330_v7, %v4329_v30  ;;  %v4301_v24 = vmul.f32 %v7688_v56, %v6932_v47 }
 0xaf7   : > { %v4334_v17 = vmul.f32 %v4302_v14, %v4302_v14  ;;  %v7694_v20 = vadd.f32 %v5026_v58, %v4946_v11  ;;  %v4288_v6 = vpop.f32.mrb[47].mxu1  ;;  %v4332_v49 = vmul.f32 %v4300_v46, %v4300_v46  ;;  %v4315_v34 = vsel %vm1576_vm3, %v4302_v14, 0.0 }
 0xaf8   : > { %v4310_v0 = vsel %vm1576_vm3, %v4299_v5, 0.0  ;;  %v4331_v31 = vmul.f32 %v4299_v5, %v4299_v5  ;;  %v7697_v19 = vadd.f32 %v4943_v32, %v4288_v6  ;;  %v4314_v9 = vadd.f32 %v4301_v24, %v4300_v46  ;;  %v7699_v57 = vpop.f32.mrb[28].mxu0 }
 0xaf9   : > { %v4333_v25 = vmul.f32 %v4301_v24, %v4301_v24  ;;  %v4311_v40 = vadd.f32 %v4310_v0, %v4309_v39  ;;  %v4303_v52 = vmul.f32 %v7699_v57, %v6930_v8  ;;  %v7703_v55 = vpop.f32.mrb[29].mxu0  ;;  %v4347_v61 = vsel %vm1576_vm3, %v4334_v17, 0.0 }
 0xafa   : > { %v4304_v16 = vmul.f32 %v7703_v55, %v6932_v47  ;;  %v4342_v45 = vsel %vm1576_vm3, %v4331_v31, 0.0  ;;  %v4308_v41 = vmul.f32 %v7694_v20, %v6936_v23  ;;  %v4305_v15 = vmul.f32 %v7697_v19, %v6936_v23 }
 0xafb   : > { %v4346_v50 = vadd.f32 %v4333_v25, %v4332_v49  ;;  %4312 = vadd.xlane.f32.xlu1 %v4311_v40  ;;  %v4335_v43 = vmul.f32 %v4303_v52, %v4303_v52  ;;  %v4343_v54 = vadd.f32 %v4342_v45, %v4341_v44  ;;  %v4316_v10 = vadd.f32 %v4315_v34, %v4314_v9  ;;  %v5520_v25 = vld [vmem:[%s7906_s18 + $0x8] sm:$0xff]  ;;  %v5521_v40 = vld [vmem:[%s7906_s18 + $0x10] sm:$0xff]  ;;  %v3161_v34 = vld [vmem:[%s7905_s17] sm:$0xff] }
 0xafc   : > { %v4319_v29 = vadd.f32 %v4304_v16, %v4303_v52  ;;  %v4336_v4 = vmul.f32 %v4304_v16, %v4304_v16  ;;  %v7709_v36 = vpop.f32.mrb[30].mxu0  ;;  %v4325_v38 = vsel %vm1576_vm3, %v4308_v41, 0.0  ;;  %v4340_v3 = vmul.f32 %v4308_v41, %v4308_v41  ;;  %v3158_v41 = vld [vmem:[%s7904_s16 + $0x8] sm:$0xff] }
 0xafd   : > { %v4306_v21 = vmul.f32 %v7709_v36, %v6930_v8  ;;  %v7715_v63 = vpop.f32.mrb[31].mxu0  ;;  %v4348_v1 = vadd.f32 %v4347_v61, %v4346_v50  ;;  %4344 = vadd.xlane.f32.xlu0 %v4343_v54  ;;  %v4320_v32 = vsel %vm1576_vm3, %v4305_v15, 0.0  ;;  %v4337_v33 = vmul.f32 %v4305_v15, %v4305_v15  ;;  %v3157_v54 = vld [vmem:[%s7904_s16] sm:$0xff]  ;;  %v3162_v15 = vld [vmem:[%s7905_s17 + $0x8] sm:$0xff] }
 0xafe   : > { %v4351_v2 = vadd.f32 %v4336_v4, %v4335_v43  ;;  %v4307_v42 = vmul.f32 %v7715_v63, %v6932_v47  ;;  %v4321_v26 = vadd.f32 %v4320_v32, %v4319_v29  ;;  %v4357_v22 = vsel %vm1576_vm3, %v4340_v3, 0.0 }
 0xaff   : > { %v4338_v59 = vmul.f32 %v4306_v21, %v4306_v21  ;;  %4349 = vadd.xlane.f32.xlu1 %v4348_v1  ;;  %v4352_v18 = vsel %vm1576_vm3, %v4337_v33, 0.0  ;;  %v3160_v1 = vld [vmem:[%s7904_s16 + $0x18] sm:$0xff] }
 0xb00   : > { %v4324_v51 = vadd.f32 %v4307_v42, %v4306_v21  ;;  %v4339_v37 = vmul.f32 %v4307_v42, %v4307_v42  ;;  %v4353_v30 = vadd.f32 %v4352_v18, %v4351_v2  ;;  %v3159_v21 = vld [vmem:[%s7904_s16 + $0x10] sm:$0xff]  ;;  %v7966_v2 = vmov 1  }
 0xb01   : > { %4317 = vadd.xlane.f32.xlu0 %v4316_v10 }
 0xb02   : > { %v4356_v13 = vadd.f32 %v4339_v37, %v4338_v59  ;;  %v4326_v11 = vadd.f32 %v4325_v38, %v4324_v51 }
 0xb04   : > { %4327 = vadd.xlane.f32.xlu1 %v4326_v11  ;;  %v4358_v60 = vadd.f32 %v4357_v22, %v4356_v13 }
 0xb05   : > { %4322 = vadd.xlane.f32.xlu0 %v4321_v26 }
 0xb08   : > { %4359 = vadd.xlane.f32.xlu1 %v4358_v60 }
 0xb09   : > { %4354 = vadd.xlane.f32.xlu0 %v4353_v30 }
 0xb88   : > { %v4313_v39 = vpop.xlane.xlu1 %4312 }
 0xb8a   : > { %v4345_v7 = vpop.xlane.xlu0 %4344 }
 0xb8b   : > { %v4361_v5 = vsel %vm2785_vm12, %v4313_v39, %v4345_v7 }
 0xb8c   : > { %v4350_v14 = vpop.xlane.xlu1 %4349 }
 0xb8e   : > { %v4318_v46 = vpop.xlane.xlu0 %4317 }
 0xb8f   : > { %v4362_v58 = vsel %vm2785_vm12, %v4318_v46, %v4350_v14  ;;  %v3164_v14 = vld [vmem:[%s7905_s17 + $0x18] sm:$0xff] }
 0xb90   : > { %v5409_v24 = vpack.c.bf16 %v4362_v58, %v4361_v5  ;;  %v3163_v58 = vld [vmem:[%s7905_s17 + $0x10] sm:$0xff] }
 0xb91   : > { %v4328_v44 = vpop.xlane.xlu1 %4327 }
 0xb92   : > { %5410 = vmatprep.subr.bf16.mxu1 %v5409_v24  ;;  %v4323_v17 = vpop.xlane.xlu0 %4322 }
 0xb93   : > { %5412 = vmatpush3.bf16.msra.mxu1 %v5409_v24 }
 0xb95   : > { %v4360_v6 = vpop.xlane.xlu1 %4359 }
 0xb96   : > { %v4355_v49 = vpop.xlane.xlu0 %4354  ;;  %v4364_v31 = vsel %vm2785_vm12, %v4328_v44, %v4360_v6 }
 0xb97   : > { %v4363_v0 = vsel %vm2785_vm12, %v4323_v17, %v4355_v49 }
 0xb98   : > { %v5413_v9 = vpack.c.bf16 %v4364_v31, %v4363_v0 }
 0xb9a   : > { %5414 = vmatprep.subr.bf16.mxu1 %v5413_v9 }
 0xb9b   : > { %5416 = vmatpush3.bf16.msra.mxu1 %v5413_v9 }
 0xb9e   : > { %5036 = vmatmul.mubr.msk.f32.vlgmr.msra.gmra.mrb[48].mxu1 %vm865_vm1, %v5520_v25 }
 0xb9f   : > { %5038 = vmatprep.mubr.msk.f32.mxu1 %vm865_vm1, %v5521_v40 }
 0xba2   : > { %5039 = vmatmul.mubr.msk.f32.gmra.mrb[50].mxu1 %vm865_vm1, %v5522_v48 }
 0xc71   : > { %v5037_v52 = vpop.f32.mrb[48].mxu1 }
 0xc72   : > { %v4451_v16 = vmul.f32 %v5037_v52, %v5037_v52  ;;  %v4431_v45 = vpop.f32.mrb[49].mxu1 }
 0xc73   : > { %v4450_v61 = vmul.f32 %v4431_v45, %v4431_v45 }
 0xc74   : > { %4460 = vrot.lane.b32.xlu1 %v4451_v16, %s7965_s28 }
 0xc75   : > { %4458 = vrot.lane.b32.xlu0 %v4450_v61, %s7965_s28  ;;  %v5040_v50 = vpop.f32.mrb[50].mxu1 }
 0xc76   : > { %v4453_v43 = vmul.f32 %v5040_v50, %v5040_v50  ;;  %v4441_v29 = vpop.f32.mrb[51].mxu1 }
 0xc77   : > { %v4452_v4 = vmul.f32 %v4441_v29, %v4441_v29 }
 0xc79   : > { %4464 = vrot.lane.b32.xlu0 %v4453_v43, %s7965_s28  ;;  %4462 = vrot.lane.b32.xlu1 %v4452_v4, %s7965_s28 }
 0xc7d   : > { %4485 = vperm.xlu0 %5494, %v5037_v52   ;;  %4480 = vperm.xlu1 %5493, %v4431_v45  }
 0xc81   : > { %4495 = vperm.xlu0 %5494, %v5040_v50   ;;  %4490 = vperm.xlu1 %5493, %v4441_v29  }
 0xc85   : > { %4557 = vperm.xlu1 %5493, %v3158_v41   ;;  %4552 = vperm.xlu0 %5494, %v3157_v54  }
 0xc89   : > { %4562 = vperm.xlu1 %5493, %v3159_v21   ;;  %4567 = vperm.xlu0 %5494, %v3160_v1  }
 0xc8d   : > { %4584 = vperm.xlu1 %5493, %v3161_v34   ;;  %4589 = vperm.xlu0 %5494, %v3162_v15  }
 0xc91   : > { %5495 = vset.pattern.permute.xlu0 %v7966_v2  ;;  %5496 = vset.pattern.permute.xlu1 %v7966_v2 }
 0xce6   : > { %v4461_v42 = vpop.permute.xlu1 %4460 }
 0xce7   : > { %v4471_v59 = vsub.f32 %v5037_v52, %v4461_v42  ;;  %v4459_v51 = vpop.permute.xlu0 %4458 }
 0xce8   : > { %v4470_v37 = vsub.f32 %v4431_v45, %v4459_v51 }
 0xce9   : > { %v4475_v38 = vmax.f32 %v4471_v59, 0.0 }
 0xcea   : > { %v4474_v3 = vmax.f32 %v4470_v37, 0.0 }
 0xceb   : > { %v4511_v10 = vadd.f32 1e-05, %v4475_v38  ;;  %v4465_v32 = vpop.permute.xlu0 %4464  ;;  %v4463_v33 = vpop.permute.xlu1 %4462 }
 0xcec   : > { %v4510_v13 = vadd.f32 1e-05, %v4474_v3  ;;  %v4473_v11 = vsub.f32 %v5040_v50, %v4465_v32  ;;  %v4472_v26 = vsub.f32 %v4441_v29, %v4463_v33 }
 0xced   : > { %5511 = vrsqrt.f32 %v4511_v10 }
 0xcee   : > { %5513 = vrsqrt.f32 %v4510_v13  ;;  %v4477_v22 = vmax.f32 %v4473_v11, 0.0  ;;  %v4476_v18 = vmax.f32 %v4472_v26, 0.0 }
 0xcf0   : > { %v4513_v60 = vadd.f32 1e-05, %v4477_v22  ;;  %v4512_v30 = vadd.f32 1e-05, %v4476_v18 }
 0xcf2   : > { %5515 = vrsqrt.f32 %v4513_v60 }
 0xcf3   : > { %5517 = vrsqrt.f32 %v4512_v30 }
 0xcf7   : > { %v5512_v39 = vpop.eup %5511 }
 0xcf8   : > { %v5514_v7 = vpop.eup %5513  ;;  %4525 = vperm.xlu0 %5495, %v5512_v39  }
 0xcf9   : > { %4520 = vperm.xlu1 %5496, %v5514_v7  }
 0xcfc   : > { %v5516_v46 = vpop.eup %5515  ;;  %5498 = vset.pattern.permute.xlu0 %v7958_v53  ;;  %v4486_v44 = vpop.permute.xlu0 %4485 }
 0xcfd   : > { %4535 = vperm.xlu1 %5496, %v5516_v46   ;;  %4599 = vperm.xlu0 %5498, %v3164_v14   ;;  %v5518_v5 = vpop.eup %5517  ;;  %v4481_v24 = vpop.permute.xlu1 %4480  ;;  %v4501_v48 = vsub.f32 %v7682_v28, %v4486_v44  ;;  %v4502_v52 = vsub.f32 %v7688_v56, %v4486_v44 }
 0xcfe   : > { %v4498_v16 = vsub.f32 %v7670_v12, %v4481_v24  ;;  %v4499_v45 = vsub.f32 %v7674_v62, %v4481_v24  ;;  %v4500_v61 = vsub.f32 %v7680_v27, %v4481_v24 }
 0xd00   : > { %v4496_v17 = vpop.permute.xlu0 %4495 }
 0xd01   : > { %4530 = vperm.xlu1 %5496, %v5518_v5   ;;  %v7778_v6 = vpop.permute.xlu1 %4490  ;;  %v4507_v50 = vsub.f32 %v7709_v36, %v4496_v17  ;;  %v4508_v29 = vsub.f32 %v7715_v63, %v4496_v17  ;;  %v4509_v56 = vsub.f32 %v7694_v20, %v4496_v17 }
 0xd02   : > { %v4504_v62 = vsub.f32 %v7699_v57, %v7778_v6  ;;  %v4505_v34 = vsub.f32 %v7703_v55, %v7778_v6  ;;  %v4506_v20 = vsub.f32 %v7697_v19, %v7778_v6 }
 0xd04   : > { %v4553_v49 = vpop.permute.xlu0 %4552 }
 0xd05   : > { %5497 = vset.pattern.permute.xlu1 %v7958_v53  ;;  %v4558_v0 = vpop.permute.xlu1 %4557  ;;  %v4503_v53 = vsub.f32 %v7678_v35, %v4486_v44 }
 0xd06   : > { %4594 = vperm.xlu1 %5497, %v3163_v58  }
 0xd08   : > { %v4568_v31 = vpop.permute.xlu0 %4567 }
 0xd09   : > { %v7780_v9 = vpop.permute.xlu1 %4562 }
 0xd0c   : > { %v4590_v25 = vpop.permute.xlu0 %4589 }
 0xd0d   : > { %v4585_v40 = vpop.permute.xlu1 %4584 }
 0xd77   : > { %v4526_v43 = vpop.permute.xlu0 %4525 }
 0xd78   : > { %v4541_v4 = vmul.f32 %v4526_v43, %v4501_v48  ;;  %v4542_v41 = vmul.f32 %v4526_v43, %v4502_v52  ;;  %v4543_v28 = vmul.f32 %v4526_v43, %v4503_v53  ;;  %v4521_v54 = vpop.permute.xlu1 %4520 }
 0xd79   : > { %v4538_v35 = vmul.f32 %v4521_v54, %v4498_v16  ;;  %v4539_v21 = vmul.f32 %v4521_v54, %v4499_v45  ;;  %v4540_v12 = vmul.f32 %v4521_v54, %v4500_v61 }
 0xd7a   : > { %v4573_v27 = vmul.f32 %v4558_v0, %v4541_v4  ;;  %v4574_v1 = vmul.f32 %v4558_v0, %v4542_v41  ;;  %v4575_v36 = vmul.f32 %v4558_v0, %v4543_v28 }
 0xd7b   : > { %v4570_v63 = vmul.f32 %v4553_v49, %v4538_v35  ;;  %v4571_v15 = vmul.f32 %v4553_v49, %v4539_v21  ;;  %v4572_v2 = vmul.f32 %v4553_v49, %v4540_v12 }
 0xd7c   : > { %v4605_v42 = vadd.f32 %v4590_v25, %v4573_v27  ;;  %v4606_v59 = vadd.f32 %v4590_v25, %v4574_v1  ;;  %v4607_v51 = vadd.f32 %v4590_v25, %v4575_v36  ;;  %v4536_v37 = vpop.permute.xlu1 %4535  ;;  %v4600_v60 = vpop.permute.xlu0 %4599 }
 0xd7d   : > { %v4602_v57 = vadd.f32 %v4585_v40, %v4570_v63  ;;  %v4603_v38 = vadd.f32 %v4585_v40, %v4571_v15  ;;  %v4604_v3 = vadd.f32 %v4585_v40, %v4572_v2  ;;  %v4547_v10 = vmul.f32 %v4536_v37, %v4507_v50 }
 0xd7e   : > { %v4617_v32 = vmax.f32 %v4605_v42, 0.0  ;;  %v4618_v33 = vmax.f32 %v4606_v59, 0.0  ;;  %v4619_v55 = vmax.f32 %v4607_v51, 0.0  ;;  %v4548_v13 = vmul.f32 %v4536_v37, %v4508_v29 }
 0xd7f   : > { %v4614_v11 = vmax.f32 %v4602_v57, 0.0  ;;  %v4615_v26 = vmax.f32 %v4603_v38, 0.0  ;;  %v4616_v22 = vmax.f32 %v4604_v3, 0.0  ;;  %v4549_v18 = vmul.f32 %v4536_v37, %v4509_v56 }
 0xd80   : > { %v4629_v19 = vmul.f32 %v4617_v32, %v6930_v8  ;;  %v4630_v30 = vmul.f32 %v4618_v33, %v6932_v47  ;;  %v4631_v39 = vmul.f32 %v4619_v55, %v6936_v23  ;;  %v4579_v7 = vmul.f32 %v4568_v31, %v4547_v10  ;;  %v4531_v14 = vpop.permute.xlu1 %4530 }
 0xd81   : > { %v4626_v46 = vmul.f32 %v4614_v11, %v6930_v8  ;;  %v4627_v5 = vmul.f32 %v4615_v26, %v6932_v47  ;;  %v4628_v58 = vmul.f32 %v4616_v22, %v6936_v23  ;;  %v4580_v44 = vmul.f32 %v4568_v31, %v4548_v13 }
 0xd82   : > { %4641 = vst [vmem:[%s7809_s11 + $0x18] sm:$0xff] %v4629_v19  ;;  %4642 = vst [vmem:[%s7809_s11 + $0x20] sm:$0xff] %v4630_v30  ;;  %v4581_v24 = vmul.f32 %v4568_v31, %v4549_v18  ;;  %v4611_v17 = vadd.f32 %v4600_v60, %v4579_v7  ;;  %v4544_v6 = vmul.f32 %v4531_v14, %v4504_v62 }
 0xd83   : > { %4643 = vst.msk [vmem:[%s7809_s11 + $0x28] sm:$0xff] %vm1576_vm3, %v4631_v39  ;;  %v4545_v49 = vmul.f32 %v4531_v14, %v4505_v34  ;;  %4638 = vst [vmem:[%s7809_s11] sm:$0xff] %v4626_v46  ;;  %v4612_v0 = vadd.f32 %v4600_v60, %v4580_v44  ;;  %v4546_v25 = vmul.f32 %v4531_v14, %v4506_v20 }
 0xd84   : > { %4639 = vst [vmem:[%s7809_s11 + $0x8] sm:$0xff] %v4627_v5  ;;  %4640 = vst.msk [vmem:[%s7809_s11 + $0x10] sm:$0xff] %vm1576_vm3, %v4628_v58  ;;  %v4613_v40 = vadd.f32 %v4600_v60, %v4581_v24  ;;  %v4623_v48 = vmax.f32 %v4611_v17, 0.0  ;;  %v4576_v52 = vmul.f32 %v7780_v9, %v4544_v6 }
 0xd85   : > { %v4577_v53 = vmul.f32 %v7780_v9, %v4545_v49  ;;  %v4624_v31 = vmax.f32 %v4612_v0, 0.0  ;;  %v4578_v16 = vmul.f32 %v7780_v9, %v4546_v25  ;;  %v4595_v45 = vpop.permute.xlu1 %4594 }
 0xd86   : > { %v4625_v61 = vmax.f32 %v4613_v40, 0.0  ;;  %v4635_v50 = vmul.f32 %v4623_v48, %v6930_v8  ;;  %v4608_v43 = vadd.f32 %v4595_v45, %v4576_v52 }
 0xd87   : > { %v4609_v29 = vadd.f32 %v4595_v45, %v4577_v53  ;;  %v4636_v4 = vmul.f32 %v4624_v31, %v6932_v47  ;;  %v4610_v41 = vadd.f32 %v4595_v45, %v4578_v16 }
 0xd88   : > { %v4637_v28 = vmul.f32 %v4625_v61, %v6936_v23  ;;  %4647 = vst [vmem:[%s7809_s11 + $0x48] sm:$0xff] %v4635_v50  ;;  %v4620_v9 = vmax.f32 %v4608_v43, 0.0 }
 0xd89   : > { %v4621_v54 = vmax.f32 %v4609_v29, 0.0  ;;  %4648 = vst [vmem:[%s7809_s11 + $0x50] sm:$0xff] %v4636_v4  ;;  %v4622_v56 = vmax.f32 %v4610_v41, 0.0 }
 0xd8a   : > { %4649 = vst.msk [vmem:[%s7809_s11 + $0x58] sm:$0xff] %vm1576_vm3, %v4637_v28  ;;  %v4632_v35 = vmul.f32 %v4620_v9, %v6930_v8 }
 0xd8b   : > { %v4633_v21 = vmul.f32 %v4621_v54, %v6932_v47  ;;  %v4634_v12 = vmul.f32 %v4622_v56, %v6936_v23 }
 0xd8c   : > { %4644 = vst [vmem:[%s7809_s11 + $0x30] sm:$0xff] %v4632_v35 }
 0xd8d   : > { %4645 = vst [vmem:[%s7809_s11 + $0x38] sm:$0xff] %v4633_v21  ;;  %4646 = vst.msk [vmem:[%s7809_s11 + $0x40] sm:$0xff] %vm1576_vm3, %v4634_v12 }
 0xd8e   : > { %5536 = shalt.err (!%p5533_p3)
}
 0xd8f   : > { %s5537_s27 = scalar_lea.hbm %s7839_s1, 1536  ;;  %s5541_s21 = scalar_lea.hbm %s7907_s19, 3072 }
 0xd90   : > { %p5538_p4 = scmp.ne.s32.totalorder %s7839_s1, %s5537_s27  ;;  %p5542_p9 = scmp.lt.u32.totalorder %s7839_s1, %s7907_s19 }
 0xd91   : > { %p5543_p10 = scmp.lt.u32.totalorder %s5541_s21, %s5537_s27  ;;  %p5545_p12 = scmp.lt.u32.totalorder %s5537_s27, %s7839_s1 }
 0xd92   : > { %p5539_p7 = pnand %p5538_p4, %p5741_p5 }
 0xd93   : > { %p5544_p11 = por %p5543_p10, %p5542_p9 }
 0xd94   : > { %p5540_p8 = pneg %p5539_p7 }
 0xd95   : > { %p5546_p13 = por %p5545_p12, %p5544_p11 }
 0xd97   : > { %p5547_p0 = pnand %p5546_p13, %p5540_p8 }
 0xd99   : > { %5550 = shalt.err (!%p5547_p0)
}
 0xd9a   : > { %s5601_s29 = smov 384   ;;  %s5602_s24 = smov 24  }
 0xd9b   : > { %5435 = dma.vmem_to_hbm [thread:$0]  (%p5741_p5), %s7833_s23, 1536, %s7839_s1, %s7847_s2, %s5601_s29, %s5601_s29, %s5602_s24  }
 0xd9c PF: > { %s7967_s30 = sld [smem:[#allocation8_spill]]  ;;  %p5441_p1 = scmp.ge.s32.totalorder %s5585_s20, 2 }
 0xd9e   : > { %p5438_p2 = pnand %p5441_p1, %p5745_p6 }
 0xda2   : > { %s4679_s22 = sand.u32 1, %s7967_s30  }
 0xda3   : > { %s4680_s27 = scalar_lea.sflag [#allocation6], %s4679_s22 }
 0xda4   : > { %5568 = dma.done.wait (!%p5438_p2), %s4680_s27, 1536  }
 0xda5   : > { %5570 = vsyncadd (!%p5438_p2), %s4680_s27, 4294965760  ;;  %s7969_s20 = sld [smem:[#allocation10_spill]]  ;;  %s7970_s21 = sld [smem:[#allocation9_spill]] }
 0xda6   : > { %s7971_s30 = sld [smem:[#allocation11_spill]]  ;;  %s7972_s29 = smov %s5577_s0 }
 0xdab   : > { %p29_p3 = scmp.ge.s32.totalorder %s7969_s20, 4   ;;  %s7973_s0 = smov %s7970_s21 }
 0xdad   :  { %31 = sbr.rel (!%p29_p3) target bundleno = 8 (0x8), region = 134 }
 0xdb4   :  { %4685 = vsyncpa [#allocation6], 1 }
 0xdb5   :  { %4687 = vsyncpa [#allocation6 + $0x1], 1 }

</bundles_post_ra>
